<compile_context>
chip_gen: v6e
topology: v6e:2x2x1
jax: 0.10.0
libtpu: 0.0.40
codegen_flags: <defaults>
</compile_context>

<pallas_src>
import functools
import numpy as np

import jax
import jax.numpy as jnp
from jax.experimental import pallas as pl
from jax.experimental.pallas import tpu as pltpu

# ----------------------- model config (small, consistent with the module) -----------------------
TIME_LEN = 16
PATCH_SIZE = 4
IN_CHANS = 4
EMBED_DIM = 32
DEPTH = 2
NUM_HEADS = 4
DEC_EMBED_DIM = 32
DEC_DEPTH = 2
DEC_NUM_HEADS = 4
MLP_RATIO = 4.0
NUM_PATCHES = TIME_LEN // PATCH_SIZE
MASK_RATIO = 0.5
LN_EPS = 1e-5

BLOCK_KEYS = ("ln1_g", "ln1_b", "w_qkv", "b_qkv", "w_proj", "b_proj",
              "ln2_g", "ln2_b", "w_fc1", "b_fc1", "w_fc2", "b_fc2")
N_BLOCK_PARAMS = len(BLOCK_KEYS)


# ----------------------------------- in-kernel helpers -----------------------------------

def _ln(x, g, b, eps=LN_EPS):
    """LayerNorm on an (L, D) f32 value; g, b are (1, D) values."""
    mu = jnp.mean(x, axis=-1, keepdims=True)
    xc = x - mu
    var = jnp.mean(xc * xc, axis=-1, keepdims=True)
    return xc * jax.lax.rsqrt(var + eps) * g + b


def _gelu(x):
    # TODO(synk): PyTorch nn.GELU default is the exact erf GELU; tanh approximation kept here
    # for robust Mosaic lowering (small numerical drift vs the reference).
    c = jnp.float32(np.sqrt(2.0 / np.pi))
    return 0.5 * x * (1.0 + jnp.tanh(c * (x + 0.044715 * x * x * x)))


def _block_diag_bias(batch, seq):
    """Additive attention bias (B*seq, B*seq): 0 within a batch block, -1e9 across batches.
    Built from iota comparisons (no integer div) and hoisted out of the block/head loops."""
    bl = batch * seq
    r = jax.lax.broadcasted_iota(jnp.int32, (bl, bl), 0)
    c = jax.lax.broadcasted_iota(jnp.int32, (bl, bl), 1)
    same = None
    for b in range(batch):
        rb = (r >= b * seq) & (r < (b + 1) * seq)
        cb = (c >= b * seq) & (c < (b + 1) * seq)
        blk = rb & cb
        same = blk if same is None else (same | blk)
    return jnp.where(same, 0.0, -1e9).astype(jnp.float32)


def _vit_block(x, brefs, num_heads, attn_bias):
    """Standard ViT block on a batch-folded (B*L, D) value kept entirely in vregs.

    x + Attn(LN1(x)); then x + MLP(LN2(x)).  The 1/sqrt(hd) scale is already folded into the
    Q columns of w_qkv/b_qkv.  Per-head outputs are accumulated straight into the output
    projection (no lane-relayout concatenate); cross-batch attention is suppressed by the
    block-diagonal additive bias."""
    (ln1_g, ln1_b, w_qkv, b_qkv, w_proj, b_proj,
     ln2_g, ln2_b, w_fc1, b_fc1, w_fc2, b_fc2) = brefs
    L, D = x.shape
    hd = D // num_heads

    # --- attention ---
    h = _ln(x, ln1_g[...], ln1_b[...])
    qkv = jnp.dot(h, w_qkv[...], preferred_element_type=jnp.float32) + b_qkv[...]   # (L, 3D)
    wp = w_proj[...]
    attn = jnp.zeros((L, D), jnp.float32)
    for hh in range(num_heads):
        q = qkv[:, hh * hd:(hh + 1) * hd]
        k = qkv[:, D + hh * hd:D + (hh + 1) * hd]
        v = qkv[:, 2 * D + hh * hd:2 * D + (hh + 1) * hd]
        # scores = q @ k^T (contract last dims, no explicit transpose) + block-diag bias
        s = jax.lax.dot_general(q, k, (((1,), (1,)), ((), ())),
                                preferred_element_type=jnp.float32) + attn_bias      # (L, L)
        s = s - jnp.max(s, axis=-1, keepdims=True)
        p = jnp.exp(s)
        p = p / jnp.sum(p, axis=-1, keepdims=True)
        o = jnp.dot(p, v, preferred_element_type=jnp.float32)                        # (L, hd)
        attn = attn + jnp.dot(o, wp[hh * hd:(hh + 1) * hd, :],
                              preferred_element_type=jnp.float32)                    # (L, D)
    x = x + attn + b_proj[...]

    # --- MLP ---
    h2 = _ln(x, ln2_g[...], ln2_b[...])
    m = _gelu(jnp.dot(h2, w_fc1[...], preferred_element_type=jnp.float32) + b_fc1[...])
    m = jnp.dot(m, w_fc2[...], preferred_element_type=jnp.float32) + b_fc2[...]
    return x + m


# ----------------------------------- fused MAE kernel -----------------------------------

def _mae_kernel(*refs, batch, num_patches, len_keep,
                depth, num_heads, dec_depth, dec_num_heads):
    """Full forward: patch-embed + pos -> one-hot mask gather + cls -> encoder blocks -> LN
    -> decoder embed -> one-hot unshuffle + mask tokens + pos -> decoder blocks -> LN -> pred
    -> fused masked-MSE loss.  Everything batch-folded on (B*L, D) values, all in vregs."""
    B = batch
    T = num_patches
    L_enc = 1 + len_keep
    L_dec = 1 + T
    f32 = jnp.float32

    cursor = [0]

    def take(n=1):
        out = refs[cursor[0]:cursor[0] + n]
        cursor[0] += n
        return out if n > 1 else out[0]

    enc_src_ref = take()            # (B*L_enc, 1) i32: -1 = cls row, else global patch index
    dec_src_ref = take()            # (B*L_dec, 1) i32: -1 = mask-token row, else latent row index
    patches_ref = take()            # (B*T, C*p)
    pos_patch_ref = take()          # (B*T, E)   (pos embed tiled over batch)
    cls_pos_ref = take()            # (1, E)     (cls_token + pos_embed[:, :1])
    pe_w_ref = take(); pe_b_ref = take()
    enc_blocks = [take(N_BLOCK_PARAMS) for _ in range(depth)]
    norm_g_ref = take(); norm_b_ref = take()
    dec_w_ref = take(); dec_b_ref = take()
    mask_tok_ref = take(); dec_pos_ref = take()
    dec_blocks = [take(N_BLOCK_PARAMS) for _ in range(dec_depth)]
    dnorm_g_ref = take(); dnorm_b_ref = take()
    pred_w_ref = take(); pred_b_ref = take()
    target_ref = take()             # (B*L_dec, C*p) (zeros on cls rows)
    mask_w_ref = take()             # (B*L_dec, 1)   (0 on cls rows, else mask[b,t])
    tok_w_ref = take()              # (B*L_dec, 1)   (0 on cls rows, else 1)
    pred_out_ref = take()           # (B*L_dec, C*p)
    loss_ref = take()               # (1, 1)

    # ---------------- encoder ----------------
    # Conv1d(kernel=stride=patch) == per-patch linear; pos-embed added before masking.
    emb = (jnp.dot(patches_ref[...], pe_w_ref[...], preferred_element_type=f32)
           + pe_b_ref[...] + pos_patch_ref[...])                                     # (B*T, E)

    # one-hot gather of kept tokens (MXU matmul) + cls token row
    src_e = enc_src_ref[...]
    col_e = jax.lax.broadcasted_iota(jnp.int32, (B * L_enc, B * T), 1)
    oh_e = jnp.where(col_e == src_e, 1.0, 0.0).astype(f32)                            # (B*L_enc, B*T)
    cls_ind = jnp.where(src_e < 0, 1.0, 0.0).astype(f32)                              # (B*L_enc, 1)
    x = jnp.dot(oh_e, emb, preferred_element_type=f32) + cls_ind * cls_pos_ref[...]   # (B*L_enc, E)

    bias_e = _block_diag_bias(B, L_enc)
    for d in range(depth):
        x = _vit_block(x, enc_blocks[d], num_heads, bias_e)
    x = _ln(x, norm_g_ref[...], norm_b_ref[...])           # latent, stays in vregs (never in HBM)

    # ---------------- decoder ----------------
    xd = jnp.dot(x, dec_w_ref[...], preferred_element_type=f32) + dec_b_ref[...]      # (B*L_enc, De)

    # one-hot unshuffle over the embedded latent + mask-token fill + decoder pos-embed
    src_d = dec_src_ref[...]
    col_d = jax.lax.broadcasted_iota(jnp.int32, (B * L_dec, B * L_enc), 1)
    oh_d = jnp.where(col_d == src_d, 1.0, 0.0).astype(f32)                             # (B*L_dec, B*L_enc)
    mtk_ind = jnp.where(src_d < 0, 1.0, 0.0).astype(f32)                               # (B*L_dec, 1)
    y = (jnp.dot(oh_d, xd, preferred_element_type=f32)
         + mtk_ind * mask_tok_ref[...]
         + dec_pos_ref[...])                                                           # (B*L_dec, De)

    bias_d = _block_diag_bias(B, L_dec)
    for d in range(dec_depth):
        y = _vit_block(y, dec_blocks[d], dec_num_heads, bias_d)
    y = _ln(y, dnorm_g_ref[...], dnorm_b_ref[...])
    pred = jnp.dot(y, pred_w_ref[...], preferred_element_type=f32) + pred_b_ref[...]   # (B*L_dec, C*p)
    pred_out_ref[...] = pred.astype(pred_out_ref.dtype)

    # ---------------- fused masked-MSE loss ----------------
    diff = pred - target_ref[...]
    mse = jnp.mean(diff * diff, axis=-1, keepdims=True)                                # (B*L_dec, 1)
    mask_w = mask_w_ref[...]
    num = jnp.sum(mse * mask_w, keepdims=True)                                          # (1, 1)
    den = jnp.sum(mask_w, keepdims=True)
    tot = jnp.sum(mse * tok_w_ref[...], keepdims=True)     # sum over real tokens (cls excluded)
    safe = jnp.where(den == 0.0, jnp.ones_like(den), den)
    # matches the reference: if mask.sum()==0 -> mean_mse.sum(), else masked mean
    loss_ref[...] = jnp.where(den == 0.0, tot, num / safe)


# ----------------------------------- wrapper (single pallas_call) -----------------------------------

def mae_forward(params, imgs, noise_key, *, mask_ratio):
    """imgs: (B, C, L) NCL float32.  Returns (loss, pred, mask) like the PyTorch module."""
    B, C, L = imgs.shape
    p_sz = PATCH_SIZE
    T = L // p_sz
    Cp = C * p_sz
    len_keep = int(T * (1.0 - mask_ratio))
    L_enc = 1 + len_keep
    L_dec = 1 + T

    # patchify (tiny XLA reshapes that fuse with the index glue below).  channel-major (C, p)
    # flatten matches Conv1d's weight layout; position-major (p, C) flatten matches the
    # reference patchify() used as the loss target (the PyTorch module uses both orderings).
    patches_cm = imgs.reshape(B, C, T, p_sz).transpose(0, 2, 1, 3).reshape(B * T, Cp)
    target_pm = imgs.transpose(0, 2, 1).reshape(B, T, Cp)

    # random masking bookkeeping.
    # TODO(synk): argsort has no Pallas lowering; the gathers themselves run inside the fused
    # kernel as one-hot MXU matmuls built from these int32 index vectors.
    noise = jax.random.uniform(noise_key, (B, T))
    ids_shuffle = jnp.argsort(noise, axis=1)
    ids_restore = jnp.argsort(ids_shuffle, axis=1).astype(jnp.int32)
    ids_keep = ids_shuffle[:, :len_keep].astype(jnp.int32)
    mask = (ids_restore >= len_keep).astype(jnp.float32)                     # (B, T)

    boff = jnp.arange(B, dtype=jnp.int32)[:, None]
    # encoder gather sources: row (b,0)=cls (-1); row (b,1+j)=global patch index b*T+ids_keep[b,j]
    enc_src = jnp.concatenate(
        [jnp.full((B, 1), -1, jnp.int32), ids_keep + boff * T], axis=1
    ).astype(jnp.int32).reshape(B * L_enc, 1)
    # decoder gather sources into the embedded latent rows (B*L_enc of them):
    #   row (b,0)   -> latent cls row  b*L_enc
    #   row (b,1+t) -> latent kept row b*L_enc + 1 + ids_restore[b,t] if kept, else -1 (mask token)
    kept_src = jnp.where(ids_restore < len_keep,
                         ids_restore + 1 + boff * L_enc, -1).astype(jnp.int32)
    dec_src = jnp.concatenate([boff * L_enc, kept_src], axis=1
                              ).astype(jnp.int32).reshape(B * L_dec, 1)

    # per-decoder-row loss weights (cls rows excluded) and the padded loss target
    zcol = jnp.zeros((B, 1), jnp.float32)
    mask_w = jnp.concatenate([zcol, mask], axis=1).reshape(B * L_dec, 1)
    tok_w = jnp.concatenate([zcol, jnp.ones((B, T), jnp.float32)], axis=1).reshape(B * L_dec, 1)
    target_full = jnp.concatenate([jnp.zeros((B, 1, Cp), jnp.float32), target_pm],
                                  axis=1).reshape(B * L_dec, Cp)

    # batch-tiled positional embeddings and cls+pos (tiny XLA ops, fuse with the glue above)
    pos_patch_t = jnp.tile(params["pos_patch"], (B, 1))                      # (B*T, E)
    dec_pos_t = jnp.tile(params["dec_pos_embed"], (B, 1))                    # (B*L_dec, De)
    cls_pos = params["cls_token"] + params["pos_cls"]                        # (1, E)

    inputs = [enc_src, dec_src, patches_cm, pos_patch_t, cls_pos,
              params["pe_w"], params["pe_b"]]
    for blk in params["blocks"]:
        inputs += [blk[k] for k in BLOCK_KEYS]
    inputs += [params["norm_g"], params["norm_b"],
               params["dec_w"], params["dec_b"], params["mask_token"], dec_pos_t]
    for blk in params["dec_blocks"]:
        inputs += [blk[k] for k in BLOCK_KEYS]
    inputs += [params["dnorm_g"], params["dnorm_b"], params["pred_w"], params["pred_b"],
               target_full, mask_w, tok_w]

    kernel = functools.partial(
        _mae_kernel, batch=B, num_patches=T, len_keep=len_keep,
        depth=DEPTH, num_heads=NUM_HEADS,
        dec_depth=DEC_DEPTH, dec_num_heads=DEC_NUM_HEADS)

    vmem = pl.BlockSpec(memory_space=pltpu.MemorySpace.VMEM)
    pred_full, loss = pl.pallas_call(
        kernel,
        out_shape=(jax.ShapeDtypeStruct((B * L_dec, Cp), jnp.float32),
                   jax.ShapeDtypeStruct((1, 1), jnp.float32)),
        in_specs=[vmem] * len(inputs),
        out_specs=(vmem, vmem),
    )(*inputs)

    pred = pred_full.reshape(B, L_dec, Cp)[:, 1:, :]                         # drop cls rows
    return loss[0, 0], pred, mask


# ----------------------------------- parameter init -----------------------------------

def get_1d_sincos_pos_embed(embed_dim, length, cls_token=False):
    pos = np.arange(length, dtype=np.float64)
    omega = np.arange(embed_dim // 2, dtype=np.float64) / (embed_dim / 2.0)
    omega = 1.0 / 10000 ** omega
    out = np.einsum("m,d->md", pos, omega)
    emb = np.concatenate([np.sin(out), np.cos(out)], axis=1)
    if cls_token:
        emb = np.concatenate([np.zeros([1, embed_dim]), emb], axis=0)
    return jnp.asarray(emb, dtype=jnp.float32)


def xavier_uniform(key, shape):
    fan_in, fan_out = shape
    limit = float(np.sqrt(6.0 / (fan_in + fan_out)))
    return jax.random.uniform(key, shape, jnp.float32, -limit, limit)


def init_block(key, dim, hidden):
    ks = jax.random.split(key, 4)
    return dict(
        ln1_g=jnp.ones((1, dim), jnp.float32), ln1_b=jnp.zeros((1, dim), jnp.float32),
        w_qkv=xavier_uniform(ks[0], (dim, 3 * dim)), b_qkv=jnp.zeros((1, 3 * dim), jnp.float32),
        w_proj=xavier_uniform(ks[1], (dim, dim)), b_proj=jnp.zeros((1, dim), jnp.float32),
        ln2_g=jnp.ones((1, dim), jnp.float32), ln2_b=jnp.zeros((1, dim), jnp.float32),
        w_fc1=xavier_uniform(ks[2], (dim, hidden)), b_fc1=jnp.zeros((1, hidden), jnp.float32),
        w_fc2=xavier_uniform(ks[3], (hidden, dim)), b_fc2=jnp.zeros((1, dim), jnp.float32),
    )


def init_params(key):
    n_keys = 6 + DEPTH + DEC_DEPTH
    k = jax.random.split(key, n_keys)
    hid_e = int(EMBED_DIM * MLP_RATIO)
    hid_d = int(DEC_EMBED_DIM * MLP_RATIO)
    p = {}
    # patch embed (Conv1d kernel=stride=patch -> per-patch linear, weight (C*p, E))
    p["pe_w"] = xavier_uniform(k[0], (IN_CHANS * PATCH_SIZE, EMBED_DIM))
    p["pe_b"] = jnp.zeros((1, EMBED_DIM), jnp.float32)
    p["cls_token"] = 0.02 * jax.random.normal(k[1], (1, EMBED_DIM), jnp.float32)
    pos_full = get_1d_sincos_pos_embed(EMBED_DIM, NUM_PATCHES, cls_token=True)
    p["pos_cls"], p["pos_patch"] = pos_full[:1], pos_full[1:]
    p["blocks"] = [init_block(k[2 + i], EMBED_DIM, hid_e) for i in range(DEPTH)]
    p["norm_g"] = jnp.ones((1, EMBED_DIM), jnp.float32)
    p["norm_b"] = jnp.zeros((1, EMBED_DIM), jnp.float32)
    p["dec_w"] = xavier_uniform(k[2 + DEPTH], (EMBED_DIM, DEC_EMBED_DIM))
    p["dec_b"] = jnp.zeros((1, DEC_EMBED_DIM), jnp.float32)
    p["mask_token"] = 0.02 * jax.random.normal(k[3 + DEPTH], (1, DEC_EMBED_DIM), jnp.float32)
    p["dec_pos_embed"] = get_1d_sincos_pos_embed(DEC_EMBED_DIM, NUM_PATCHES, cls_token=True)
    p["dec_blocks"] = [init_block(k[4 + DEPTH + i], DEC_EMBED_DIM, hid_d)
                       for i in range(DEC_DEPTH)]
    p["dnorm_g"] = jnp.ones((1, DEC_EMBED_DIM), jnp.float32)
    p["dnorm_b"] = jnp.zeros((1, DEC_EMBED_DIM), jnp.float32)
    p["pred_w"] = xavier_uniform(k[4 + DEPTH + DEC_DEPTH],
                                 (DEC_EMBED_DIM, IN_CHANS * PATCH_SIZE))
    p["pred_b"] = jnp.zeros((1, IN_CHANS * PATCH_SIZE), jnp.float32)
    return p


def fold_attention_scale(params):
    """Host-side, once: fold the 1/sqrt(head_dim) attention scale into the Q columns of every
    fused QKV weight/bias.  (q*s)·k == s*(q·k), so the forward output is identical while the
    kernel saves one VPU multiply per head per block per call."""
    def fold(blocks, dim, num_heads):
        hd = dim // num_heads
        scale = float(hd) ** -0.5
        out = []
        for blk in blocks:
            w, b = blk["w_qkv"], blk["b_qkv"]
            w = jnp.concatenate([w[:, :dim] * scale, w[:, dim:]], axis=1)
            b = jnp.concatenate([b[:, :dim] * scale, b[:, dim:]], axis=1)
            out.append({**blk, "w_qkv": w, "b_qkv": b})
        return out

    p = dict(params)
    p["blocks"] = fold(params["blocks"], EMBED_DIM, NUM_HEADS)
    p["dec_blocks"] = fold(params["dec_blocks"], DEC_EMBED_DIM, DEC_NUM_HEADS)
    return p


# ----------------------------------- main -----------------------------------

if __name__ == "__main__":
    key = jax.random.PRNGKey(0)
    pkey, xkey, nkey = jax.random.split(key, 3)

    params = fold_attention_scale(init_params(pkey))
    imgs = jax.random.normal(xkey, (2, IN_CHANS, TIME_LEN), jnp.float32)   # (B, C, L)

    fwd = jax.jit(functools.partial(mae_forward, mask_ratio=MASK_RATIO))
    loss, pred, mask = fwd(params, imgs, nkey)
    jax.block_until_ready((loss, pred, mask))

    assert pred.shape == (2, NUM_PATCHES, IN_CHANS * PATCH_SIZE)
    assert mask.shape == (2, NUM_PATCHES)
    assert loss.shape == ()
    assert bool(jnp.isfinite(loss))
    print("KERNEL_OK")
</pallas_src>

<mosaic_0001>
module attributes {stable_mosaic.version = 11 : i64} {
  func.func @_mae_kernel(%arg0: memref<6x1xi32, #tpu.memory_space<vmem>>, %arg1: memref<10x1xi32, #tpu.memory_space<vmem>>, %arg2: memref<8x16xf32, #tpu.memory_space<vmem>>, %arg3: memref<8x32xf32, #tpu.memory_space<vmem>>, %arg4: memref<1x32xf32, #tpu.memory_space<vmem>>, %arg5: memref<16x32xf32, #tpu.memory_space<vmem>>, %arg6: memref<1x32xf32, #tpu.memory_space<vmem>>, %arg7: memref<1x32xf32, #tpu.memory_space<vmem>>, %arg8: memref<1x32xf32, #tpu.memory_space<vmem>>, %arg9: memref<32x96xf32, #tpu.memory_space<vmem>>, %arg10: memref<1x96xf32, #tpu.memory_space<vmem>>, %arg11: memref<32x32xf32, #tpu.memory_space<vmem>>, %arg12: memref<1x32xf32, #tpu.memory_space<vmem>>, %arg13: memref<1x32xf32, #tpu.memory_space<vmem>>, %arg14: memref<1x32xf32, #tpu.memory_space<vmem>>, %arg15: memref<32x128xf32, #tpu.memory_space<vmem>>, %arg16: memref<1x128xf32, #tpu.memory_space<vmem>>, %arg17: memref<128x32xf32, #tpu.memory_space<vmem>>, %arg18: memref<1x32xf32, #tpu.memory_space<vmem>>, %arg19: memref<1x32xf32, #tpu.memory_space<vmem>>, %arg20: memref<1x32xf32, #tpu.memory_space<vmem>>, %arg21: memref<32x96xf32, #tpu.memory_space<vmem>>, %arg22: memref<1x96xf32, #tpu.memory_space<vmem>>, %arg23: memref<32x32xf32, #tpu.memory_space<vmem>>, %arg24: memref<1x32xf32, #tpu.memory_space<vmem>>, %arg25: memref<1x32xf32, #tpu.memory_space<vmem>>, %arg26: memref<1x32xf32, #tpu.memory_space<vmem>>, %arg27: memref<32x128xf32, #tpu.memory_space<vmem>>, %arg28: memref<1x128xf32, #tpu.memory_space<vmem>>, %arg29: memref<128x32xf32, #tpu.memory_space<vmem>>, %arg30: memref<1x32xf32, #tpu.memory_space<vmem>>, %arg31: memref<1x32xf32, #tpu.memory_space<vmem>>, %arg32: memref<1x32xf32, #tpu.memory_space<vmem>>, %arg33: memref<32x32xf32, #tpu.memory_space<vmem>>, %arg34: memref<1x32xf32, #tpu.memory_space<vmem>>, %arg35: memref<1x32xf32, #tpu.memory_space<vmem>>, %arg36: memref<10x32xf32, #tpu.memory_space<vmem>>, %arg37: memref<1x32xf32, #tpu.memory_space<vmem>>, %arg38: memref<1x32xf32, #tpu.memory_space<vmem>>, %arg39: memref<32x96xf32, #tpu.memory_space<vmem>>, %arg40: memref<1x96xf32, #tpu.memory_space<vmem>>, %arg41: memref<32x32xf32, #tpu.memory_space<vmem>>, %arg42: memref<1x32xf32, #tpu.memory_space<vmem>>, %arg43: memref<1x32xf32, #tpu.memory_space<vmem>>, %arg44: memref<1x32xf32, #tpu.memory_space<vmem>>, %arg45: memref<32x128xf32, #tpu.memory_space<vmem>>, %arg46: memref<1x128xf32, #tpu.memory_space<vmem>>, %arg47: memref<128x32xf32, #tpu.memory_space<vmem>>, %arg48: memref<1x32xf32, #tpu.memory_space<vmem>>, %arg49: memref<1x32xf32, #tpu.memory_space<vmem>>, %arg50: memref<1x32xf32, #tpu.memory_space<vmem>>, %arg51: memref<32x96xf32, #tpu.memory_space<vmem>>, %arg52: memref<1x96xf32, #tpu.memory_space<vmem>>, %arg53: memref<32x32xf32, #tpu.memory_space<vmem>>, %arg54: memref<1x32xf32, #tpu.memory_space<vmem>>, %arg55: memref<1x32xf32, #tpu.memory_space<vmem>>, %arg56: memref<1x32xf32, #tpu.memory_space<vmem>>, %arg57: memref<32x128xf32, #tpu.memory_space<vmem>>, %arg58: memref<1x128xf32, #tpu.memory_space<vmem>>, %arg59: memref<128x32xf32, #tpu.memory_space<vmem>>, %arg60: memref<1x32xf32, #tpu.memory_space<vmem>>, %arg61: memref<1x32xf32, #tpu.memory_space<vmem>>, %arg62: memref<1x32xf32, #tpu.memory_space<vmem>>, %arg63: memref<32x16xf32, #tpu.memory_space<vmem>>, %arg64: memref<1x16xf32, #tpu.memory_space<vmem>>, %arg65: memref<10x16xf32, #tpu.memory_space<vmem>>, %arg66: memref<10x1xf32, #tpu.memory_space<vmem>>, %arg67: memref<10x1xf32, #tpu.memory_space<vmem>>, %arg68: memref<10x16xf32, #tpu.memory_space<vmem>>, %arg69: memref<1x1xf32, #tpu.memory_space<vmem>>) attributes {dimension_semantics = [], scalar_prefetch = 0 : i64, scratch_operands = 0 : i64, tpu.core_type = #tpu.core_type<tc>} {
    %c0 = arith.constant 0 : index
    %c0_0 = arith.constant 0 : index
    %0 = vector.load %arg2[%c0, %c0_0] : memref<8x16xf32, #tpu.memory_space<vmem>>, vector<8x16xf32>
    %c0_1 = arith.constant 0 : index
    %c0_2 = arith.constant 0 : index
    %1 = vector.load %arg5[%c0_1, %c0_2] : memref<16x32xf32, #tpu.memory_space<vmem>>, vector<16x32xf32>
    %cst = arith.constant dense<0.000000e+00> : vector<8x32xf32>
    %2 = tpu.matmul %0, %1, %cst {dimension_numbers = #tpu.dot_dimension_numbers<[1], [0], [0], [1], [0, 0, 1, 1], [], []>} : vector<8x16xf32>, vector<16x32xf32>, vector<8x32xf32> -> vector<8x32xf32>
    %c0_3 = arith.constant 0 : index
    %c0_4 = arith.constant 0 : index
    %3 = vector.load %arg6[%c0_3, %c0_4] : memref<1x32xf32, #tpu.memory_space<vmem>>, vector<1x32xf32>
    %4 = vector.broadcast %3 : vector<1x32xf32> to vector<8x32xf32>
    %5 = arith.addf %2, %4 : vector<8x32xf32>
    %c0_5 = arith.constant 0 : index
    %c0_6 = arith.constant 0 : index
    %6 = vector.load %arg3[%c0_5, %c0_6] : memref<8x32xf32, #tpu.memory_space<vmem>>, vector<8x32xf32>
    %7 = arith.addf %5, %6 : vector<8x32xf32>
    %c0_7 = arith.constant 0 : index
    %c0_8 = arith.constant 0 : index
    %8 = vector.load %arg0[%c0_7, %c0_8] : memref<6x1xi32, #tpu.memory_space<vmem>>, vector<6x1xi32>
    %9 = tpu.iota {dimensions = array<i32: 1>} : vector<6x8xi32>
    %10 = vector.broadcast %8 : vector<6x1xi32> to vector<6x8xi32>
    %11 = arith.cmpi eq, %9, %10 : vector<6x8xi32>
    %cst_9 = arith.constant 1.000000e+00 : f32
    %cst_10 = arith.constant 0.000000e+00 : f32
    %12 = vector.broadcast %cst_9 : f32 to vector<6x8xf32>
    %13 = vector.broadcast %cst_10 : f32 to vector<6x8xf32>
    %14 = arith.select %11, %12, %13 : vector<6x8xi1>, vector<6x8xf32>
    %c0_i32 = arith.constant 0 : i32
    %15 = vector.broadcast %c0_i32 : i32 to vector<6x1xi32>
    %16 = arith.cmpi slt, %8, %15 : vector<6x1xi32>
    %cst_11 = arith.constant 1.000000e+00 : f32
    %cst_12 = arith.constant 0.000000e+00 : f32
    %17 = vector.broadcast %cst_11 : f32 to vector<6x1xf32>
    %18 = vector.broadcast %cst_12 : f32 to vector<6x1xf32>
    %19 = arith.select %16, %17, %18 : vector<6x1xi1>, vector<6x1xf32>
    %cst_13 = arith.constant dense<0.000000e+00> : vector<6x32xf32>
    %20 = tpu.matmul %14, %7, %cst_13 {dimension_numbers = #tpu.dot_dimension_numbers<[1], [0], [0], [1], [0, 0, 1, 1], [], []>} : vector<6x8xf32>, vector<8x32xf32>, vector<6x32xf32> -> vector<6x32xf32>
    %c0_14 = arith.constant 0 : index
    %c0_15 = arith.constant 0 : index
    %21 = vector.load %arg4[%c0_14, %c0_15] : memref<1x32xf32, #tpu.memory_space<vmem>>, vector<1x32xf32>
    %22 = vector.broadcast %19 : vector<6x1xf32> to vector<6x32xf32>
    %23 = vector.broadcast %21 : vector<1x32xf32> to vector<6x32xf32>
    %24 = arith.mulf %22, %23 : vector<6x32xf32>
    %25 = arith.addf %20, %24 : vector<6x32xf32>
    %26 = tpu.iota {dimensions = array<i32: 0>} : vector<6x6xi32>
    %27 = tpu.iota {dimensions = array<i32: 1>} : vector<6x6xi32>
    %c0_i32_16 = arith.constant 0 : i32
    %28 = vector.broadcast %c0_i32_16 : i32 to vector<6x6xi32>
    %29 = arith.cmpi sge, %26, %28 : vector<6x6xi32>
    %c3_i32 = arith.constant 3 : i32
    %30 = vector.broadcast %c3_i32 : i32 to vector<6x6xi32>
    %31 = arith.cmpi slt, %26, %30 : vector<6x6xi32>
    %32 = arith.andi %29, %31 : vector<6x6xi1>
    %c0_i32_17 = arith.constant 0 : i32
    %33 = vector.broadcast %c0_i32_17 : i32 to vector<6x6xi32>
    %34 = arith.cmpi sge, %27, %33 : vector<6x6xi32>
    %c3_i32_18 = arith.constant 3 : i32
    %35 = vector.broadcast %c3_i32_18 : i32 to vector<6x6xi32>
    %36 = arith.cmpi slt, %27, %35 : vector<6x6xi32>
    %37 = arith.andi %34, %36 : vector<6x6xi1>
    %38 = arith.andi %32, %37 : vector<6x6xi1>
    %c3_i32_19 = arith.constant 3 : i32
    %39 = vector.broadcast %c3_i32_19 : i32 to vector<6x6xi32>
    %40 = arith.cmpi sge, %26, %39 : vector<6x6xi32>
    %c6_i32 = arith.constant 6 : i32
    %41 = vector.broadcast %c6_i32 : i32 to vector<6x6xi32>
    %42 = arith.cmpi slt, %26, %41 : vector<6x6xi32>
    %43 = arith.andi %40, %42 : vector<6x6xi1>
    %c3_i32_20 = arith.constant 3 : i32
    %44 = vector.broadcast %c3_i32_20 : i32 to vector<6x6xi32>
    %45 = arith.cmpi sge, %27, %44 : vector<6x6xi32>
    %c6_i32_21 = arith.constant 6 : i32
    %46 = vector.broadcast %c6_i32_21 : i32 to vector<6x6xi32>
    %47 = arith.cmpi slt, %27, %46 : vector<6x6xi32>
    %48 = arith.andi %45, %47 : vector<6x6xi1>
    %49 = arith.andi %43, %48 : vector<6x6xi1>
    %50 = arith.ori %38, %49 : vector<6x6xi1>
    %cst_22 = arith.constant 0.000000e+00 : f32
    %cst_23 = arith.constant -1.000000e+09 : f32
    %51 = vector.broadcast %cst_22 : f32 to vector<6x6xf32>
    %52 = vector.broadcast %cst_23 : f32 to vector<6x6xf32>
    %53 = arith.select %50, %51, %52 : vector<6x6xi1>, vector<6x6xf32>
    %c0_24 = arith.constant 0 : index
    %c0_25 = arith.constant 0 : index
    %54 = vector.load %arg7[%c0_24, %c0_25] : memref<1x32xf32, #tpu.memory_space<vmem>>, vector<1x32xf32>
    %c0_26 = arith.constant 0 : index
    %c0_27 = arith.constant 0 : index
    %55 = vector.load %arg8[%c0_26, %c0_27] : memref<1x32xf32, #tpu.memory_space<vmem>>, vector<1x32xf32>
    %cst_28 = arith.constant dense<0.000000e+00> : vector<6xf32>
    %56 = vector.multi_reduction <add>, %25, %cst_28 [1] : vector<6x32xf32> to vector<6xf32>
    %57 = vector.shape_cast %56 : vector<6xf32> to vector<6x1xf32>
    %cst_29 = arith.constant 3.200000e+01 : f32
    %58 = vector.broadcast %cst_29 : f32 to vector<6x1xf32>
    %59 = arith.divf %57, %58 : vector<6x1xf32>
    %60 = vector.broadcast %59 : vector<6x1xf32> to vector<6x32xf32>
    %61 = arith.subf %25, %60 : vector<6x32xf32>
    %62 = arith.mulf %61, %61 : vector<6x32xf32>
    %cst_30 = arith.constant dense<0.000000e+00> : vector<6xf32>
    %63 = vector.multi_reduction <add>, %62, %cst_30 [1] : vector<6x32xf32> to vector<6xf32>
    %64 = vector.shape_cast %63 : vector<6xf32> to vector<6x1xf32>
    %cst_31 = arith.constant 3.200000e+01 : f32
    %65 = vector.broadcast %cst_31 : f32 to vector<6x1xf32>
    %66 = arith.divf %64, %65 : vector<6x1xf32>
    %cst_32 = arith.constant 9.99999974E-6 : f32
    %67 = vector.broadcast %cst_32 : f32 to vector<6x1xf32>
    %68 = arith.addf %66, %67 : vector<6x1xf32>
    %69 = math.rsqrt %68 : vector<6x1xf32>
    %70 = vector.broadcast %69 : vector<6x1xf32> to vector<6x32xf32>
    %71 = arith.mulf %61, %70 : vector<6x32xf32>
    %72 = vector.broadcast %54 : vector<1x32xf32> to vector<6x32xf32>
    %73 = arith.mulf %71, %72 : vector<6x32xf32>
    %74 = vector.broadcast %55 : vector<1x32xf32> to vector<6x32xf32>
    %75 = arith.addf %73, %74 : vector<6x32xf32>
    %c0_33 = arith.constant 0 : index
    %c0_34 = arith.constant 0 : index
    %76 = vector.load %arg9[%c0_33, %c0_34] : memref<32x96xf32, #tpu.memory_space<vmem>>, vector<32x96xf32>
    %cst_35 = arith.constant dense<0.000000e+00> : vector<6x96xf32>
    %77 = tpu.matmul %75, %76, %cst_35 {dimension_numbers = #tpu.dot_dimension_numbers<[1], [0], [0], [1], [0, 0, 1, 1], [], []>} : vector<6x32xf32>, vector<32x96xf32>, vector<6x96xf32> -> vector<6x96xf32>
    %c0_36 = arith.constant 0 : index
    %c0_37 = arith.constant 0 : index
    %78 = vector.load %arg10[%c0_36, %c0_37] : memref<1x96xf32, #tpu.memory_space<vmem>>, vector<1x96xf32>
    %79 = vector.broadcast %78 : vector<1x96xf32> to vector<6x96xf32>
    %80 = arith.addf %77, %79 : vector<6x96xf32>
    %c0_38 = arith.constant 0 : index
    %c0_39 = arith.constant 0 : index
    %81 = vector.load %arg11[%c0_38, %c0_39] : memref<32x32xf32, #tpu.memory_space<vmem>>, vector<32x32xf32>
    %cst_40 = arith.constant 0.000000e+00 : f32
    %82 = vector.broadcast %cst_40 : f32 to vector<6x32xf32>
    %83 = vector.extract_strided_slice %80 {offsets = [0, 0], sizes = [6, 8], strides = [1, 1]} : vector<6x96xf32> to vector<6x8xf32>
    %84 = vector.extract_strided_slice %80 {offsets = [0, 32], sizes = [6, 8], strides = [1, 1]} : vector<6x96xf32> to vector<6x8xf32>
    %85 = vector.extract_strided_slice %80 {offsets = [0, 64], sizes = [6, 8], strides = [1, 1]} : vector<6x96xf32> to vector<6x8xf32>
    %cst_41 = arith.constant dense<0.000000e+00> : vector<6x6xf32>
    %86 = tpu.matmul %83, %84, %cst_41 {dimension_numbers = #tpu.dot_dimension_numbers<[1], [1], [0], [0], [0, 0, 1, 0], [], []>} : vector<6x8xf32>, vector<6x8xf32>, vector<6x6xf32> -> vector<6x6xf32>
    %87 = arith.addf %86, %53 : vector<6x6xf32>
    %cst_42 = arith.constant dense<0xFF800000> : vector<6xf32>
    %88 = vector.multi_reduction <maximumf>, %87, %cst_42 [1] : vector<6x6xf32> to vector<6xf32>
    %89 = vector.shape_cast %88 : vector<6xf32> to vector<6x1xf32>
    %90 = vector.broadcast %89 : vector<6x1xf32> to vector<6x6xf32>
    %91 = arith.subf %87, %90 : vector<6x6xf32>
    %92 = math.exp %91 : vector<6x6xf32>
    %cst_43 = arith.constant dense<0.000000e+00> : vector<6xf32>
    %93 = vector.multi_reduction <add>, %92, %cst_43 [1] : vector<6x6xf32> to vector<6xf32>
    %94 = vector.shape_cast %93 : vector<6xf32> to vector<6x1xf32>
    %95 = vector.broadcast %94 : vector<6x1xf32> to vector<6x6xf32>
    %96 = arith.divf %92, %95 : vector<6x6xf32>
    %cst_44 = arith.constant dense<0.000000e+00> : vector<6x8xf32>
    %97 = tpu.matmul %96, %85, %cst_44 {dimension_numbers = #tpu.dot_dimension_numbers<[1], [0], [0], [1], [0, 0, 1, 1], [], []>} : vector<6x6xf32>, vector<6x8xf32>, vector<6x8xf32> -> vector<6x8xf32>
    %98 = vector.extract_strided_slice %81 {offsets = [0, 0], sizes = [8, 32], strides = [1, 1]} : vector<32x32xf32> to vector<8x32xf32>
    %cst_45 = arith.constant dense<0.000000e+00> : vector<6x32xf32>
    %99 = tpu.matmul %97, %98, %cst_45 {dimension_numbers = #tpu.dot_dimension_numbers<[1], [0], [0], [1], [0, 0, 1, 1], [], []>} : vector<6x8xf32>, vector<8x32xf32>, vector<6x32xf32> -> vector<6x32xf32>
    %100 = arith.addf %82, %99 : vector<6x32xf32>
    %101 = vector.extract_strided_slice %80 {offsets = [0, 8], sizes = [6, 8], strides = [1, 1]} : vector<6x96xf32> to vector<6x8xf32>
    %102 = vector.extract_strided_slice %80 {offsets = [0, 40], sizes = [6, 8], strides = [1, 1]} : vector<6x96xf32> to vector<6x8xf32>
    %103 = vector.extract_strided_slice %80 {offsets = [0, 72], sizes = [6, 8], strides = [1, 1]} : vector<6x96xf32> to vector<6x8xf32>
    %cst_46 = arith.constant dense<0.000000e+00> : vector<6x6xf32>
    %104 = tpu.matmul %101, %102, %cst_46 {dimension_numbers = #tpu.dot_dimension_numbers<[1], [1], [0], [0], [0, 0, 1, 0], [], []>} : vector<6x8xf32>, vector<6x8xf32>, vector<6x6xf32> -> vector<6x6xf32>
    %105 = arith.addf %104, %53 : vector<6x6xf32>
    %cst_47 = arith.constant dense<0xFF800000> : vector<6xf32>
    %106 = vector.multi_reduction <maximumf>, %105, %cst_47 [1] : vector<6x6xf32> to vector<6xf32>
    %107 = vector.shape_cast %106 : vector<6xf32> to vector<6x1xf32>
    %108 = vector.broadcast %107 : vector<6x1xf32> to vector<6x6xf32>
    %109 = arith.subf %105, %108 : vector<6x6xf32>
    %110 = math.exp %109 : vector<6x6xf32>
    %cst_48 = arith.constant dense<0.000000e+00> : vector<6xf32>
    %111 = vector.multi_reduction <add>, %110, %cst_48 [1] : vector<6x6xf32> to vector<6xf32>
    %112 = vector.shape_cast %111 : vector<6xf32> to vector<6x1xf32>
    %113 = vector.broadcast %112 : vector<6x1xf32> to vector<6x6xf32>
    %114 = arith.divf %110, %113 : vector<6x6xf32>
    %cst_49 = arith.constant dense<0.000000e+00> : vector<6x8xf32>
    %115 = tpu.matmul %114, %103, %cst_49 {dimension_numbers = #tpu.dot_dimension_numbers<[1], [0], [0], [1], [0, 0, 1, 1], [], []>} : vector<6x6xf32>, vector<6x8xf32>, vector<6x8xf32> -> vector<6x8xf32>
    %116 = vector.extract_strided_slice %81 {offsets = [8, 0], sizes = [8, 32], strides = [1, 1]} : vector<32x32xf32> to vector<8x32xf32>
    %cst_50 = arith.constant dense<0.000000e+00> : vector<6x32xf32>
    %117 = tpu.matmul %115, %116, %cst_50 {dimension_numbers = #tpu.dot_dimension_numbers<[1], [0], [0], [1], [0, 0, 1, 1], [], []>} : vector<6x8xf32>, vector<8x32xf32>, vector<6x32xf32> -> vector<6x32xf32>
    %118 = arith.addf %100, %117 : vector<6x32xf32>
    %119 = vector.extract_strided_slice %80 {offsets = [0, 16], sizes = [6, 8], strides = [1, 1]} : vector<6x96xf32> to vector<6x8xf32>
    %120 = vector.extract_strided_slice %80 {offsets = [0, 48], sizes = [6, 8], strides = [1, 1]} : vector<6x96xf32> to vector<6x8xf32>
    %121 = vector.extract_strided_slice %80 {offsets = [0, 80], sizes = [6, 8], strides = [1, 1]} : vector<6x96xf32> to vector<6x8xf32>
    %cst_51 = arith.constant dense<0.000000e+00> : vector<6x6xf32>
    %122 = tpu.matmul %119, %120, %cst_51 {dimension_numbers = #tpu.dot_dimension_numbers<[1], [1], [0], [0], [0, 0, 1, 0], [], []>} : vector<6x8xf32>, vector<6x8xf32>, vector<6x6xf32> -> vector<6x6xf32>
    %123 = arith.addf %122, %53 : vector<6x6xf32>
    %cst_52 = arith.constant dense<0xFF800000> : vector<6xf32>
    %124 = vector.multi_reduction <maximumf>, %123, %cst_52 [1] : vector<6x6xf32> to vector<6xf32>
    %125 = vector.shape_cast %124 : vector<6xf32> to vector<6x1xf32>
    %126 = vector.broadcast %125 : vector<6x1xf32> to vector<6x6xf32>
    %127 = arith.subf %123, %126 : vector<6x6xf32>
    %128 = math.exp %127 : vector<6x6xf32>
    %cst_53 = arith.constant dense<0.000000e+00> : vector<6xf32>
    %129 = vector.multi_reduction <add>, %128, %cst_53 [1] : vector<6x6xf32> to vector<6xf32>
    %130 = vector.shape_cast %129 : vector<6xf32> to vector<6x1xf32>
    %131 = vector.broadcast %130 : vector<6x1xf32> to vector<6x6xf32>
    %132 = arith.divf %128, %131 : vector<6x6xf32>
    %cst_54 = arith.constant dense<0.000000e+00> : vector<6x8xf32>
    %133 = tpu.matmul %132, %121, %cst_54 {dimension_numbers = #tpu.dot_dimension_numbers<[1], [0], [0], [1], [0, 0, 1, 1], [], []>} : vector<6x6xf32>, vector<6x8xf32>, vector<6x8xf32> -> vector<6x8xf32>
    %134 = vector.extract_strided_slice %81 {offsets = [16, 0], sizes = [8, 32], strides = [1, 1]} : vector<32x32xf32> to vector<8x32xf32>
    %cst_55 = arith.constant dense<0.000000e+00> : vector<6x32xf32>
    %135 = tpu.matmul %133, %134, %cst_55 {dimension_numbers = #tpu.dot_dimension_numbers<[1], [0], [0], [1], [0, 0, 1, 1], [], []>} : vector<6x8xf32>, vector<8x32xf32>, vector<6x32xf32> -> vector<6x32xf32>
    %136 = arith.addf %118, %135 : vector<6x32xf32>
    %137 = vector.extract_strided_slice %80 {offsets = [0, 24], sizes = [6, 8], strides = [1, 1]} : vector<6x96xf32> to vector<6x8xf32>
    %138 = vector.extract_strided_slice %80 {offsets = [0, 56], sizes = [6, 8], strides = [1, 1]} : vector<6x96xf32> to vector<6x8xf32>
    %139 = vector.extract_strided_slice %80 {offsets = [0, 88], sizes = [6, 8], strides = [1, 1]} : vector<6x96xf32> to vector<6x8xf32>
    %cst_56 = arith.constant dense<0.000000e+00> : vector<6x6xf32>
    %140 = tpu.matmul %137, %138, %cst_56 {dimension_numbers = #tpu.dot_dimension_numbers<[1], [1], [0], [0], [0, 0, 1, 0], [], []>} : vector<6x8xf32>, vector<6x8xf32>, vector<6x6xf32> -> vector<6x6xf32>
    %141 = arith.addf %140, %53 : vector<6x6xf32>
    %cst_57 = arith.constant dense<0xFF800000> : vector<6xf32>
    %142 = vector.multi_reduction <maximumf>, %141, %cst_57 [1] : vector<6x6xf32> to vector<6xf32>
    %143 = vector.shape_cast %142 : vector<6xf32> to vector<6x1xf32>
    %144 = vector.broadcast %143 : vector<6x1xf32> to vector<6x6xf32>
    %145 = arith.subf %141, %144 : vector<6x6xf32>
    %146 = math.exp %145 : vector<6x6xf32>
    %cst_58 = arith.constant dense<0.000000e+00> : vector<6xf32>
    %147 = vector.multi_reduction <add>, %146, %cst_58 [1] : vector<6x6xf32> to vector<6xf32>
    %148 = vector.shape_cast %147 : vector<6xf32> to vector<6x1xf32>
    %149 = vector.broadcast %148 : vector<6x1xf32> to vector<6x6xf32>
    %150 = arith.divf %146, %149 : vector<6x6xf32>
    %cst_59 = arith.constant dense<0.000000e+00> : vector<6x8xf32>
    %151 = tpu.matmul %150, %139, %cst_59 {dimension_numbers = #tpu.dot_dimension_numbers<[1], [0], [0], [1], [0, 0, 1, 1], [], []>} : vector<6x6xf32>, vector<6x8xf32>, vector<6x8xf32> -> vector<6x8xf32>
    %152 = vector.extract_strided_slice %81 {offsets = [24, 0], sizes = [8, 32], strides = [1, 1]} : vector<32x32xf32> to vector<8x32xf32>
    %cst_60 = arith.constant dense<0.000000e+00> : vector<6x32xf32>
    %153 = tpu.matmul %151, %152, %cst_60 {dimension_numbers = #tpu.dot_dimension_numbers<[1], [0], [0], [1], [0, 0, 1, 1], [], []>} : vector<6x8xf32>, vector<8x32xf32>, vector<6x32xf32> -> vector<6x32xf32>
    %154 = arith.addf %136, %153 : vector<6x32xf32>
    %155 = arith.addf %25, %154 : vector<6x32xf32>
    %c0_61 = arith.constant 0 : index
    %c0_62 = arith.constant 0 : index
    %156 = vector.load %arg12[%c0_61, %c0_62] : memref<1x32xf32, #tpu.memory_space<vmem>>, vector<1x32xf32>
    %157 = vector.broadcast %156 : vector<1x32xf32> to vector<6x32xf32>
    %158 = arith.addf %155, %157 : vector<6x32xf32>
    %c0_63 = arith.constant 0 : index
    %c0_64 = arith.constant 0 : index
    %159 = vector.load %arg13[%c0_63, %c0_64] : memref<1x32xf32, #tpu.memory_space<vmem>>, vector<1x32xf32>
    %c0_65 = arith.constant 0 : index
    %c0_66 = arith.constant 0 : index
    %160 = vector.load %arg14[%c0_65, %c0_66] : memref<1x32xf32, #tpu.memory_space<vmem>>, vector<1x32xf32>
    %cst_67 = arith.constant dense<0.000000e+00> : vector<6xf32>
    %161 = vector.multi_reduction <add>, %158, %cst_67 [1] : vector<6x32xf32> to vector<6xf32>
    %162 = vector.shape_cast %161 : vector<6xf32> to vector<6x1xf32>
    %cst_68 = arith.constant 3.200000e+01 : f32
    %163 = vector.broadcast %cst_68 : f32 to vector<6x1xf32>
    %164 = arith.divf %162, %163 : vector<6x1xf32>
    %165 = vector.broadcast %164 : vector<6x1xf32> to vector<6x32xf32>
    %166 = arith.subf %158, %165 : vector<6x32xf32>
    %167 = arith.mulf %166, %166 : vector<6x32xf32>
    %cst_69 = arith.constant dense<0.000000e+00> : vector<6xf32>
    %168 = vector.multi_reduction <add>, %167, %cst_69 [1] : vector<6x32xf32> to vector<6xf32>
    %169 = vector.shape_cast %168 : vector<6xf32> to vector<6x1xf32>
    %cst_70 = arith.constant 3.200000e+01 : f32
    %170 = vector.broadcast %cst_70 : f32 to vector<6x1xf32>
    %171 = arith.divf %169, %170 : vector<6x1xf32>
    %cst_71 = arith.constant 9.99999974E-6 : f32
    %172 = vector.broadcast %cst_71 : f32 to vector<6x1xf32>
    %173 = arith.addf %171, %172 : vector<6x1xf32>
    %174 = math.rsqrt %173 : vector<6x1xf32>
    %175 = vector.broadcast %174 : vector<6x1xf32> to vector<6x32xf32>
    %176 = arith.mulf %166, %175 : vector<6x32xf32>
    %177 = vector.broadcast %159 : vector<1x32xf32> to vector<6x32xf32>
    %178 = arith.mulf %176, %177 : vector<6x32xf32>
    %179 = vector.broadcast %160 : vector<1x32xf32> to vector<6x32xf32>
    %180 = arith.addf %178, %179 : vector<6x32xf32>
    %c0_72 = arith.constant 0 : index
    %c0_73 = arith.constant 0 : index
    %181 = vector.load %arg15[%c0_72, %c0_73] : memref<32x128xf32, #tpu.memory_space<vmem>>, vector<32x128xf32>
    %cst_74 = arith.constant dense<0.000000e+00> : vector<6x128xf32>
    %182 = tpu.matmul %180, %181, %cst_74 {dimension_numbers = #tpu.dot_dimension_numbers<[1], [0], [0], [1], [0, 0, 1, 1], [], []>} : vector<6x32xf32>, vector<32x128xf32>, vector<6x128xf32> -> vector<6x128xf32>
    %c0_75 = arith.constant 0 : index
    %c0_76 = arith.constant 0 : index
    %183 = vector.load %arg16[%c0_75, %c0_76] : memref<1x128xf32, #tpu.memory_space<vmem>>, vector<1x128xf32>
    %184 = vector.broadcast %183 : vector<1x128xf32> to vector<6x128xf32>
    %185 = arith.addf %182, %184 : vector<6x128xf32>
    %cst_77 = arith.constant 5.000000e-01 : f32
    %186 = vector.broadcast %cst_77 : f32 to vector<6x128xf32>
    %187 = arith.mulf %186, %185 : vector<6x128xf32>
    %cst_78 = arith.constant 4.471500e-02 : f32
    %188 = vector.broadcast %cst_78 : f32 to vector<6x128xf32>
    %189 = arith.mulf %188, %185 : vector<6x128xf32>
    %190 = arith.mulf %189, %185 : vector<6x128xf32>
    %191 = arith.mulf %190, %185 : vector<6x128xf32>
    %192 = arith.addf %185, %191 : vector<6x128xf32>
    %cst_79 = arith.constant 0.797884583 : f32
    %193 = vector.broadcast %cst_79 : f32 to vector<6x128xf32>
    %194 = arith.mulf %193, %192 : vector<6x128xf32>
    %195 = math.tanh %194 : vector<6x128xf32>
    %cst_80 = arith.constant 1.000000e+00 : f32
    %196 = vector.broadcast %cst_80 : f32 to vector<6x128xf32>
    %197 = arith.addf %196, %195 : vector<6x128xf32>
    %198 = arith.mulf %187, %197 : vector<6x128xf32>
    %c0_81 = arith.constant 0 : index
    %c0_82 = arith.constant 0 : index
    %199 = vector.load %arg17[%c0_81, %c0_82] : memref<128x32xf32, #tpu.memory_space<vmem>>, vector<128x32xf32>
    %cst_83 = arith.constant dense<0.000000e+00> : vector<6x32xf32>
    %200 = tpu.matmul %198, %199, %cst_83 {dimension_numbers = #tpu.dot_dimension_numbers<[1], [0], [0], [1], [0, 0, 1, 1], [], []>} : vector<6x128xf32>, vector<128x32xf32>, vector<6x32xf32> -> vector<6x32xf32>
    %c0_84 = arith.constant 0 : index
    %c0_85 = arith.constant 0 : index
    %201 = vector.load %arg18[%c0_84, %c0_85] : memref<1x32xf32, #tpu.memory_space<vmem>>, vector<1x32xf32>
    %202 = vector.broadcast %201 : vector<1x32xf32> to vector<6x32xf32>
    %203 = arith.addf %200, %202 : vector<6x32xf32>
    %204 = arith.addf %158, %203 : vector<6x32xf32>
    %c0_86 = arith.constant 0 : index
    %c0_87 = arith.constant 0 : index
    %205 = vector.load %arg19[%c0_86, %c0_87] : memref<1x32xf32, #tpu.memory_space<vmem>>, vector<1x32xf32>
    %c0_88 = arith.constant 0 : index
    %c0_89 = arith.constant 0 : index
    %206 = vector.load %arg20[%c0_88, %c0_89] : memref<1x32xf32, #tpu.memory_space<vmem>>, vector<1x32xf32>
    %cst_90 = arith.constant dense<0.000000e+00> : vector<6xf32>
    %207 = vector.multi_reduction <add>, %204, %cst_90 [1] : vector<6x32xf32> to vector<6xf32>
    %208 = vector.shape_cast %207 : vector<6xf32> to vector<6x1xf32>
    %cst_91 = arith.constant 3.200000e+01 : f32
    %209 = vector.broadcast %cst_91 : f32 to vector<6x1xf32>
    %210 = arith.divf %208, %209 : vector<6x1xf32>
    %211 = vector.broadcast %210 : vector<6x1xf32> to vector<6x32xf32>
    %212 = arith.subf %204, %211 : vector<6x32xf32>
    %213 = arith.mulf %212, %212 : vector<6x32xf32>
    %cst_92 = arith.constant dense<0.000000e+00> : vector<6xf32>
    %214 = vector.multi_reduction <add>, %213, %cst_92 [1] : vector<6x32xf32> to vector<6xf32>
    %215 = vector.shape_cast %214 : vector<6xf32> to vector<6x1xf32>
    %cst_93 = arith.constant 3.200000e+01 : f32
    %216 = vector.broadcast %cst_93 : f32 to vector<6x1xf32>
    %217 = arith.divf %215, %216 : vector<6x1xf32>
    %cst_94 = arith.constant 9.99999974E-6 : f32
    %218 = vector.broadcast %cst_94 : f32 to vector<6x1xf32>
    %219 = arith.addf %217, %218 : vector<6x1xf32>
    %220 = math.rsqrt %219 : vector<6x1xf32>
    %221 = vector.broadcast %220 : vector<6x1xf32> to vector<6x32xf32>
    %222 = arith.mulf %212, %221 : vector<6x32xf32>
    %223 = vector.broadcast %205 : vector<1x32xf32> to vector<6x32xf32>
    %224 = arith.mulf %222, %223 : vector<6x32xf32>
    %225 = vector.broadcast %206 : vector<1x32xf32> to vector<6x32xf32>
    %226 = arith.addf %224, %225 : vector<6x32xf32>
    %c0_95 = arith.constant 0 : index
    %c0_96 = arith.constant 0 : index
    %227 = vector.load %arg21[%c0_95, %c0_96] : memref<32x96xf32, #tpu.memory_space<vmem>>, vector<32x96xf32>
    %cst_97 = arith.constant dense<0.000000e+00> : vector<6x96xf32>
    %228 = tpu.matmul %226, %227, %cst_97 {dimension_numbers = #tpu.dot_dimension_numbers<[1], [0], [0], [1], [0, 0, 1, 1], [], []>} : vector<6x32xf32>, vector<32x96xf32>, vector<6x96xf32> -> vector<6x96xf32>
    %c0_98 = arith.constant 0 : index
    %c0_99 = arith.constant 0 : index
    %229 = vector.load %arg22[%c0_98, %c0_99] : memref<1x96xf32, #tpu.memory_space<vmem>>, vector<1x96xf32>
    %230 = vector.broadcast %229 : vector<1x96xf32> to vector<6x96xf32>
    %231 = arith.addf %228, %230 : vector<6x96xf32>
    %c0_100 = arith.constant 0 : index
    %c0_101 = arith.constant 0 : index
    %232 = vector.load %arg23[%c0_100, %c0_101] : memref<32x32xf32, #tpu.memory_space<vmem>>, vector<32x32xf32>
    %cst_102 = arith.constant 0.000000e+00 : f32
    %233 = vector.broadcast %cst_102 : f32 to vector<6x32xf32>
    %234 = vector.extract_strided_slice %231 {offsets = [0, 0], sizes = [6, 8], strides = [1, 1]} : vector<6x96xf32> to vector<6x8xf32>
    %235 = vector.extract_strided_slice %231 {offsets = [0, 32], sizes = [6, 8], strides = [1, 1]} : vector<6x96xf32> to vector<6x8xf32>
    %236 = vector.extract_strided_slice %231 {offsets = [0, 64], sizes = [6, 8], strides = [1, 1]} : vector<6x96xf32> to vector<6x8xf32>
    %cst_103 = arith.constant dense<0.000000e+00> : vector<6x6xf32>
    %237 = tpu.matmul %234, %235, %cst_103 {dimension_numbers = #tpu.dot_dimension_numbers<[1], [1], [0], [0], [0, 0, 1, 0], [], []>} : vector<6x8xf32>, vector<6x8xf32>, vector<6x6xf32> -> vector<6x6xf32>
    %238 = arith.addf %237, %53 : vector<6x6xf32>
    %cst_104 = arith.constant dense<0xFF800000> : vector<6xf32>
    %239 = vector.multi_reduction <maximumf>, %238, %cst_104 [1] : vector<6x6xf32> to vector<6xf32>
    %240 = vector.shape_cast %239 : vector<6xf32> to vector<6x1xf32>
    %241 = vector.broadcast %240 : vector<6x1xf32> to vector<6x6xf32>
    %242 = arith.subf %238, %241 : vector<6x6xf32>
    %243 = math.exp %242 : vector<6x6xf32>
    %cst_105 = arith.constant dense<0.000000e+00> : vector<6xf32>
    %244 = vector.multi_reduction <add>, %243, %cst_105 [1] : vector<6x6xf32> to vector<6xf32>
    %245 = vector.shape_cast %244 : vector<6xf32> to vector<6x1xf32>
    %246 = vector.broadcast %245 : vector<6x1xf32> to vector<6x6xf32>
    %247 = arith.divf %243, %246 : vector<6x6xf32>
    %cst_106 = arith.constant dense<0.000000e+00> : vector<6x8xf32>
    %248 = tpu.matmul %247, %236, %cst_106 {dimension_numbers = #tpu.dot_dimension_numbers<[1], [0], [0], [1], [0, 0, 1, 1], [], []>} : vector<6x6xf32>, vector<6x8xf32>, vector<6x8xf32> -> vector<6x8xf32>
    %249 = vector.extract_strided_slice %232 {offsets = [0, 0], sizes = [8, 32], strides = [1, 1]} : vector<32x32xf32> to vector<8x32xf32>
    %cst_107 = arith.constant dense<0.000000e+00> : vector<6x32xf32>
    %250 = tpu.matmul %248, %249, %cst_107 {dimension_numbers = #tpu.dot_dimension_numbers<[1], [0], [0], [1], [0, 0, 1, 1], [], []>} : vector<6x8xf32>, vector<8x32xf32>, vector<6x32xf32> -> vector<6x32xf32>
    %251 = arith.addf %233, %250 : vector<6x32xf32>
    %252 = vector.extract_strided_slice %231 {offsets = [0, 8], sizes = [6, 8], strides = [1, 1]} : vector<6x96xf32> to vector<6x8xf32>
    %253 = vector.extract_strided_slice %231 {offsets = [0, 40], sizes = [6, 8], strides = [1, 1]} : vector<6x96xf32> to vector<6x8xf32>
    %254 = vector.extract_strided_slice %231 {offsets = [0, 72], sizes = [6, 8], strides = [1, 1]} : vector<6x96xf32> to vector<6x8xf32>
    %cst_108 = arith.constant dense<0.000000e+00> : vector<6x6xf32>
    %255 = tpu.matmul %252, %253, %cst_108 {dimension_numbers = #tpu.dot_dimension_numbers<[1], [1], [0], [0], [0, 0, 1, 0], [], []>} : vector<6x8xf32>, vector<6x8xf32>, vector<6x6xf32> -> vector<6x6xf32>
    %256 = arith.addf %255, %53 : vector<6x6xf32>
    %cst_109 = arith.constant dense<0xFF800000> : vector<6xf32>
    %257 = vector.multi_reduction <maximumf>, %256, %cst_109 [1] : vector<6x6xf32> to vector<6xf32>
    %258 = vector.shape_cast %257 : vector<6xf32> to vector<6x1xf32>
    %259 = vector.broadcast %258 : vector<6x1xf32> to vector<6x6xf32>
    %260 = arith.subf %256, %259 : vector<6x6xf32>
    %261 = math.exp %260 : vector<6x6xf32>
    %cst_110 = arith.constant dense<0.000000e+00> : vector<6xf32>
    %262 = vector.multi_reduction <add>, %261, %cst_110 [1] : vector<6x6xf32> to vector<6xf32>
    %263 = vector.shape_cast %262 : vector<6xf32> to vector<6x1xf32>
    %264 = vector.broadcast %263 : vector<6x1xf32> to vector<6x6xf32>
    %265 = arith.divf %261, %264 : vector<6x6xf32>
    %cst_111 = arith.constant dense<0.000000e+00> : vector<6x8xf32>
    %266 = tpu.matmul %265, %254, %cst_111 {dimension_numbers = #tpu.dot_dimension_numbers<[1], [0], [0], [1], [0, 0, 1, 1], [], []>} : vector<6x6xf32>, vector<6x8xf32>, vector<6x8xf32> -> vector<6x8xf32>
    %267 = vector.extract_strided_slice %232 {offsets = [8, 0], sizes = [8, 32], strides = [1, 1]} : vector<32x32xf32> to vector<8x32xf32>
    %cst_112 = arith.constant dense<0.000000e+00> : vector<6x32xf32>
    %268 = tpu.matmul %266, %267, %cst_112 {dimension_numbers = #tpu.dot_dimension_numbers<[1], [0], [0], [1], [0, 0, 1, 1], [], []>} : vector<6x8xf32>, vector<8x32xf32>, vector<6x32xf32> -> vector<6x32xf32>
    %269 = arith.addf %251, %268 : vector<6x32xf32>
    %270 = vector.extract_strided_slice %231 {offsets = [0, 16], sizes = [6, 8], strides = [1, 1]} : vector<6x96xf32> to vector<6x8xf32>
    %271 = vector.extract_strided_slice %231 {offsets = [0, 48], sizes = [6, 8], strides = [1, 1]} : vector<6x96xf32> to vector<6x8xf32>
    %272 = vector.extract_strided_slice %231 {offsets = [0, 80], sizes = [6, 8], strides = [1, 1]} : vector<6x96xf32> to vector<6x8xf32>
    %cst_113 = arith.constant dense<0.000000e+00> : vector<6x6xf32>
    %273 = tpu.matmul %270, %271, %cst_113 {dimension_numbers = #tpu.dot_dimension_numbers<[1], [1], [0], [0], [0, 0, 1, 0], [], []>} : vector<6x8xf32>, vector<6x8xf32>, vector<6x6xf32> -> vector<6x6xf32>
    %274 = arith.addf %273, %53 : vector<6x6xf32>
    %cst_114 = arith.constant dense<0xFF800000> : vector<6xf32>
    %275 = vector.multi_reduction <maximumf>, %274, %cst_114 [1] : vector<6x6xf32> to vector<6xf32>
    %276 = vector.shape_cast %275 : vector<6xf32> to vector<6x1xf32>
    %277 = vector.broadcast %276 : vector<6x1xf32> to vector<6x6xf32>
    %278 = arith.subf %274, %277 : vector<6x6xf32>
    %279 = math.exp %278 : vector<6x6xf32>
    %cst_115 = arith.constant dense<0.000000e+00> : vector<6xf32>
    %280 = vector.multi_reduction <add>, %279, %cst_115 [1] : vector<6x6xf32> to vector<6xf32>
    %281 = vector.shape_cast %280 : vector<6xf32> to vector<6x1xf32>
    %282 = vector.broadcast %281 : vector<6x1xf32> to vector<6x6xf32>
    %283 = arith.divf %279, %282 : vector<6x6xf32>
    %cst_116 = arith.constant dense<0.000000e+00> : vector<6x8xf32>
    %284 = tpu.matmul %283, %272, %cst_116 {dimension_numbers = #tpu.dot_dimension_numbers<[1], [0], [0], [1], [0, 0, 1, 1], [], []>} : vector<6x6xf32>, vector<6x8xf32>, vector<6x8xf32> -> vector<6x8xf32>
    %285 = vector.extract_strided_slice %232 {offsets = [16, 0], sizes = [8, 32], strides = [1, 1]} : vector<32x32xf32> to vector<8x32xf32>
    %cst_117 = arith.constant dense<0.000000e+00> : vector<6x32xf32>
    %286 = tpu.matmul %284, %285, %cst_117 {dimension_numbers = #tpu.dot_dimension_numbers<[1], [0], [0], [1], [0, 0, 1, 1], [], []>} : vector<6x8xf32>, vector<8x32xf32>, vector<6x32xf32> -> vector<6x32xf32>
    %287 = arith.addf %269, %286 : vector<6x32xf32>
    %288 = vector.extract_strided_slice %231 {offsets = [0, 24], sizes = [6, 8], strides = [1, 1]} : vector<6x96xf32> to vector<6x8xf32>
    %289 = vector.extract_strided_slice %231 {offsets = [0, 56], sizes = [6, 8], strides = [1, 1]} : vector<6x96xf32> to vector<6x8xf32>
    %290 = vector.extract_strided_slice %231 {offsets = [0, 88], sizes = [6, 8], strides = [1, 1]} : vector<6x96xf32> to vector<6x8xf32>
    %cst_118 = arith.constant dense<0.000000e+00> : vector<6x6xf32>
    %291 = tpu.matmul %288, %289, %cst_118 {dimension_numbers = #tpu.dot_dimension_numbers<[1], [1], [0], [0], [0, 0, 1, 0], [], []>} : vector<6x8xf32>, vector<6x8xf32>, vector<6x6xf32> -> vector<6x6xf32>
    %292 = arith.addf %291, %53 : vector<6x6xf32>
    %cst_119 = arith.constant dense<0xFF800000> : vector<6xf32>
    %293 = vector.multi_reduction <maximumf>, %292, %cst_119 [1] : vector<6x6xf32> to vector<6xf32>
    %294 = vector.shape_cast %293 : vector<6xf32> to vector<6x1xf32>
    %295 = vector.broadcast %294 : vector<6x1xf32> to vector<6x6xf32>
    %296 = arith.subf %292, %295 : vector<6x6xf32>
    %297 = math.exp %296 : vector<6x6xf32>
    %cst_120 = arith.constant dense<0.000000e+00> : vector<6xf32>
    %298 = vector.multi_reduction <add>, %297, %cst_120 [1] : vector<6x6xf32> to vector<6xf32>
    %299 = vector.shape_cast %298 : vector<6xf32> to vector<6x1xf32>
    %300 = vector.broadcast %299 : vector<6x1xf32> to vector<6x6xf32>
    %301 = arith.divf %297, %300 : vector<6x6xf32>
    %cst_121 = arith.constant dense<0.000000e+00> : vector<6x8xf32>
    %302 = tpu.matmul %301, %290, %cst_121 {dimension_numbers = #tpu.dot_dimension_numbers<[1], [0], [0], [1], [0, 0, 1, 1], [], []>} : vector<6x6xf32>, vector<6x8xf32>, vector<6x8xf32> -> vector<6x8xf32>
    %303 = vector.extract_strided_slice %232 {offsets = [24, 0], sizes = [8, 32], strides = [1, 1]} : vector<32x32xf32> to vector<8x32xf32>
    %cst_122 = arith.constant dense<0.000000e+00> : vector<6x32xf32>
    %304 = tpu.matmul %302, %303, %cst_122 {dimension_numbers = #tpu.dot_dimension_numbers<[1], [0], [0], [1], [0, 0, 1, 1], [], []>} : vector<6x8xf32>, vector<8x32xf32>, vector<6x32xf32> -> vector<6x32xf32>
    %305 = arith.addf %287, %304 : vector<6x32xf32>
    %306 = arith.addf %204, %305 : vector<6x32xf32>
    %c0_123 = arith.constant 0 : index
    %c0_124 = arith.constant 0 : index
    %307 = vector.load %arg24[%c0_123, %c0_124] : memref<1x32xf32, #tpu.memory_space<vmem>>, vector<1x32xf32>
    %308 = vector.broadcast %307 : vector<1x32xf32> to vector<6x32xf32>
    %309 = arith.addf %306, %308 : vector<6x32xf32>
    %c0_125 = arith.constant 0 : index
    %c0_126 = arith.constant 0 : index
    %310 = vector.load %arg25[%c0_125, %c0_126] : memref<1x32xf32, #tpu.memory_space<vmem>>, vector<1x32xf32>
    %c0_127 = arith.constant 0 : index
    %c0_128 = arith.constant 0 : index
    %311 = vector.load %arg26[%c0_127, %c0_128] : memref<1x32xf32, #tpu.memory_space<vmem>>, vector<1x32xf32>
    %cst_129 = arith.constant dense<0.000000e+00> : vector<6xf32>
    %312 = vector.multi_reduction <add>, %309, %cst_129 [1] : vector<6x32xf32> to vector<6xf32>
    %313 = vector.shape_cast %312 : vector<6xf32> to vector<6x1xf32>
    %cst_130 = arith.constant 3.200000e+01 : f32
    %314 = vector.broadcast %cst_130 : f32 to vector<6x1xf32>
    %315 = arith.divf %313, %314 : vector<6x1xf32>
    %316 = vector.broadcast %315 : vector<6x1xf32> to vector<6x32xf32>
    %317 = arith.subf %309, %316 : vector<6x32xf32>
    %318 = arith.mulf %317, %317 : vector<6x32xf32>
    %cst_131 = arith.constant dense<0.000000e+00> : vector<6xf32>
    %319 = vector.multi_reduction <add>, %318, %cst_131 [1] : vector<6x32xf32> to vector<6xf32>
    %320 = vector.shape_cast %319 : vector<6xf32> to vector<6x1xf32>
    %cst_132 = arith.constant 3.200000e+01 : f32
    %321 = vector.broadcast %cst_132 : f32 to vector<6x1xf32>
    %322 = arith.divf %320, %321 : vector<6x1xf32>
    %cst_133 = arith.constant 9.99999974E-6 : f32
    %323 = vector.broadcast %cst_133 : f32 to vector<6x1xf32>
    %324 = arith.addf %322, %323 : vector<6x1xf32>
    %325 = math.rsqrt %324 : vector<6x1xf32>
    %326 = vector.broadcast %325 : vector<6x1xf32> to vector<6x32xf32>
    %327 = arith.mulf %317, %326 : vector<6x32xf32>
    %328 = vector.broadcast %310 : vector<1x32xf32> to vector<6x32xf32>
    %329 = arith.mulf %327, %328 : vector<6x32xf32>
    %330 = vector.broadcast %311 : vector<1x32xf32> to vector<6x32xf32>
    %331 = arith.addf %329, %330 : vector<6x32xf32>
    %c0_134 = arith.constant 0 : index
    %c0_135 = arith.constant 0 : index
    %332 = vector.load %arg27[%c0_134, %c0_135] : memref<32x128xf32, #tpu.memory_space<vmem>>, vector<32x128xf32>
    %cst_136 = arith.constant dense<0.000000e+00> : vector<6x128xf32>
    %333 = tpu.matmul %331, %332, %cst_136 {dimension_numbers = #tpu.dot_dimension_numbers<[1], [0], [0], [1], [0, 0, 1, 1], [], []>} : vector<6x32xf32>, vector<32x128xf32>, vector<6x128xf32> -> vector<6x128xf32>
    %c0_137 = arith.constant 0 : index
    %c0_138 = arith.constant 0 : index
    %334 = vector.load %arg28[%c0_137, %c0_138] : memref<1x128xf32, #tpu.memory_space<vmem>>, vector<1x128xf32>
    %335 = vector.broadcast %334 : vector<1x128xf32> to vector<6x128xf32>
    %336 = arith.addf %333, %335 : vector<6x128xf32>
    %cst_139 = arith.constant 5.000000e-01 : f32
    %337 = vector.broadcast %cst_139 : f32 to vector<6x128xf32>
    %338 = arith.mulf %337, %336 : vector<6x128xf32>
    %cst_140 = arith.constant 4.471500e-02 : f32
    %339 = vector.broadcast %cst_140 : f32 to vector<6x128xf32>
    %340 = arith.mulf %339, %336 : vector<6x128xf32>
    %341 = arith.mulf %340, %336 : vector<6x128xf32>
    %342 = arith.mulf %341, %336 : vector<6x128xf32>
    %343 = arith.addf %336, %342 : vector<6x128xf32>
    %cst_141 = arith.constant 0.797884583 : f32
    %344 = vector.broadcast %cst_141 : f32 to vector<6x128xf32>
    %345 = arith.mulf %344, %343 : vector<6x128xf32>
    %346 = math.tanh %345 : vector<6x128xf32>
    %cst_142 = arith.constant 1.000000e+00 : f32
    %347 = vector.broadcast %cst_142 : f32 to vector<6x128xf32>
    %348 = arith.addf %347, %346 : vector<6x128xf32>
    %349 = arith.mulf %338, %348 : vector<6x128xf32>
    %c0_143 = arith.constant 0 : index
    %c0_144 = arith.constant 0 : index
    %350 = vector.load %arg29[%c0_143, %c0_144] : memref<128x32xf32, #tpu.memory_space<vmem>>, vector<128x32xf32>
    %cst_145 = arith.constant dense<0.000000e+00> : vector<6x32xf32>
    %351 = tpu.matmul %349, %350, %cst_145 {dimension_numbers = #tpu.dot_dimension_numbers<[1], [0], [0], [1], [0, 0, 1, 1], [], []>} : vector<6x128xf32>, vector<128x32xf32>, vector<6x32xf32> -> vector<6x32xf32>
    %c0_146 = arith.constant 0 : index
    %c0_147 = arith.constant 0 : index
    %352 = vector.load %arg30[%c0_146, %c0_147] : memref<1x32xf32, #tpu.memory_space<vmem>>, vector<1x32xf32>
    %353 = vector.broadcast %352 : vector<1x32xf32> to vector<6x32xf32>
    %354 = arith.addf %351, %353 : vector<6x32xf32>
    %355 = arith.addf %309, %354 : vector<6x32xf32>
    %c0_148 = arith.constant 0 : index
    %c0_149 = arith.constant 0 : index
    %356 = vector.load %arg31[%c0_148, %c0_149] : memref<1x32xf32, #tpu.memory_space<vmem>>, vector<1x32xf32>
    %c0_150 = arith.constant 0 : index
    %c0_151 = arith.constant 0 : index
    %357 = vector.load %arg32[%c0_150, %c0_151] : memref<1x32xf32, #tpu.memory_space<vmem>>, vector<1x32xf32>
    %cst_152 = arith.constant dense<0.000000e+00> : vector<6xf32>
    %358 = vector.multi_reduction <add>, %355, %cst_152 [1] : vector<6x32xf32> to vector<6xf32>
    %359 = vector.shape_cast %358 : vector<6xf32> to vector<6x1xf32>
    %cst_153 = arith.constant 3.200000e+01 : f32
    %360 = vector.broadcast %cst_153 : f32 to vector<6x1xf32>
    %361 = arith.divf %359, %360 : vector<6x1xf32>
    %362 = vector.broadcast %361 : vector<6x1xf32> to vector<6x32xf32>
    %363 = arith.subf %355, %362 : vector<6x32xf32>
    %364 = arith.mulf %363, %363 : vector<6x32xf32>
    %cst_154 = arith.constant dense<0.000000e+00> : vector<6xf32>
    %365 = vector.multi_reduction <add>, %364, %cst_154 [1] : vector<6x32xf32> to vector<6xf32>
    %366 = vector.shape_cast %365 : vector<6xf32> to vector<6x1xf32>
    %cst_155 = arith.constant 3.200000e+01 : f32
    %367 = vector.broadcast %cst_155 : f32 to vector<6x1xf32>
    %368 = arith.divf %366, %367 : vector<6x1xf32>
    %cst_156 = arith.constant 9.99999974E-6 : f32
    %369 = vector.broadcast %cst_156 : f32 to vector<6x1xf32>
    %370 = arith.addf %368, %369 : vector<6x1xf32>
    %371 = math.rsqrt %370 : vector<6x1xf32>
    %372 = vector.broadcast %371 : vector<6x1xf32> to vector<6x32xf32>
    %373 = arith.mulf %363, %372 : vector<6x32xf32>
    %374 = vector.broadcast %356 : vector<1x32xf32> to vector<6x32xf32>
    %375 = arith.mulf %373, %374 : vector<6x32xf32>
    %376 = vector.broadcast %357 : vector<1x32xf32> to vector<6x32xf32>
    %377 = arith.addf %375, %376 : vector<6x32xf32>
    %c0_157 = arith.constant 0 : index
    %c0_158 = arith.constant 0 : index
    %378 = vector.load %arg33[%c0_157, %c0_158] : memref<32x32xf32, #tpu.memory_space<vmem>>, vector<32x32xf32>
    %cst_159 = arith.constant dense<0.000000e+00> : vector<6x32xf32>
    %379 = tpu.matmul %377, %378, %cst_159 {dimension_numbers = #tpu.dot_dimension_numbers<[1], [0], [0], [1], [0, 0, 1, 1], [], []>} : vector<6x32xf32>, vector<32x32xf32>, vector<6x32xf32> -> vector<6x32xf32>
    %c0_160 = arith.constant 0 : index
    %c0_161 = arith.constant 0 : index
    %380 = vector.load %arg34[%c0_160, %c0_161] : memref<1x32xf32, #tpu.memory_space<vmem>>, vector<1x32xf32>
    %381 = vector.broadcast %380 : vector<1x32xf32> to vector<6x32xf32>
    %382 = arith.addf %379, %381 : vector<6x32xf32>
    %c0_162 = arith.constant 0 : index
    %c0_163 = arith.constant 0 : index
    %383 = vector.load %arg1[%c0_162, %c0_163] : memref<10x1xi32, #tpu.memory_space<vmem>>, vector<10x1xi32>
    %384 = tpu.iota {dimensions = array<i32: 1>} : vector<10x6xi32>
    %385 = vector.broadcast %383 : vector<10x1xi32> to vector<10x6xi32>
    %386 = arith.cmpi eq, %384, %385 : vector<10x6xi32>
    %cst_164 = arith.constant 1.000000e+00 : f32
    %cst_165 = arith.constant 0.000000e+00 : f32
    %387 = vector.broadcast %cst_164 : f32 to vector<10x6xf32>
    %388 = vector.broadcast %cst_165 : f32 to vector<10x6xf32>
    %389 = arith.select %386, %387, %388 : vector<10x6xi1>, vector<10x6xf32>
    %c0_i32_166 = arith.constant 0 : i32
    %390 = vector.broadcast %c0_i32_166 : i32 to vector<10x1xi32>
    %391 = arith.cmpi slt, %383, %390 : vector<10x1xi32>
    %cst_167 = arith.constant 1.000000e+00 : f32
    %cst_168 = arith.constant 0.000000e+00 : f32
    %392 = vector.broadcast %cst_167 : f32 to vector<10x1xf32>
    %393 = vector.broadcast %cst_168 : f32 to vector<10x1xf32>
    %394 = arith.select %391, %392, %393 : vector<10x1xi1>, vector<10x1xf32>
    %cst_169 = arith.constant dense<0.000000e+00> : vector<10x32xf32>
    %395 = tpu.matmul %389, %382, %cst_169 {dimension_numbers = #tpu.dot_dimension_numbers<[1], [0], [0], [1], [0, 0, 1, 1], [], []>} : vector<10x6xf32>, vector<6x32xf32>, vector<10x32xf32> -> vector<10x32xf32>
    %c0_170 = arith.constant 0 : index
    %c0_171 = arith.constant 0 : index
    %396 = vector.load %arg35[%c0_170, %c0_171] : memref<1x32xf32, #tpu.memory_space<vmem>>, vector<1x32xf32>
    %397 = vector.broadcast %394 : vector<10x1xf32> to vector<10x32xf32>
    %398 = vector.broadcast %396 : vector<1x32xf32> to vector<10x32xf32>
    %399 = arith.mulf %397, %398 : vector<10x32xf32>
    %400 = arith.addf %395, %399 : vector<10x32xf32>
    %c0_172 = arith.constant 0 : index
    %c0_173 = arith.constant 0 : index
    %401 = vector.load %arg36[%c0_172, %c0_173] : memref<10x32xf32, #tpu.memory_space<vmem>>, vector<10x32xf32>
    %402 = arith.addf %400, %401 : vector<10x32xf32>
    %403 = tpu.iota {dimensions = array<i32: 0>} : vector<10x10xi32>
    %404 = tpu.iota {dimensions = array<i32: 1>} : vector<10x10xi32>
    %c0_i32_174 = arith.constant 0 : i32
    %405 = vector.broadcast %c0_i32_174 : i32 to vector<10x10xi32>
    %406 = arith.cmpi sge, %403, %405 : vector<10x10xi32>
    %c5_i32 = arith.constant 5 : i32
    %407 = vector.broadcast %c5_i32 : i32 to vector<10x10xi32>
    %408 = arith.cmpi slt, %403, %407 : vector<10x10xi32>
    %409 = arith.andi %406, %408 : vector<10x10xi1>
    %c0_i32_175 = arith.constant 0 : i32
    %410 = vector.broadcast %c0_i32_175 : i32 to vector<10x10xi32>
    %411 = arith.cmpi sge, %404, %410 : vector<10x10xi32>
    %c5_i32_176 = arith.constant 5 : i32
    %412 = vector.broadcast %c5_i32_176 : i32 to vector<10x10xi32>
    %413 = arith.cmpi slt, %404, %412 : vector<10x10xi32>
    %414 = arith.andi %411, %413 : vector<10x10xi1>
    %415 = arith.andi %409, %414 : vector<10x10xi1>
    %c5_i32_177 = arith.constant 5 : i32
    %416 = vector.broadcast %c5_i32_177 : i32 to vector<10x10xi32>
    %417 = arith.cmpi sge, %403, %416 : vector<10x10xi32>
    %c10_i32 = arith.constant 10 : i32
    %418 = vector.broadcast %c10_i32 : i32 to vector<10x10xi32>
    %419 = arith.cmpi slt, %403, %418 : vector<10x10xi32>
    %420 = arith.andi %417, %419 : vector<10x10xi1>
    %c5_i32_178 = arith.constant 5 : i32
    %421 = vector.broadcast %c5_i32_178 : i32 to vector<10x10xi32>
    %422 = arith.cmpi sge, %404, %421 : vector<10x10xi32>
    %c10_i32_179 = arith.constant 10 : i32
    %423 = vector.broadcast %c10_i32_179 : i32 to vector<10x10xi32>
    %424 = arith.cmpi slt, %404, %423 : vector<10x10xi32>
    %425 = arith.andi %422, %424 : vector<10x10xi1>
    %426 = arith.andi %420, %425 : vector<10x10xi1>
    %427 = arith.ori %415, %426 : vector<10x10xi1>
    %cst_180 = arith.constant 0.000000e+00 : f32
    %cst_181 = arith.constant -1.000000e+09 : f32
    %428 = vector.broadcast %cst_180 : f32 to vector<10x10xf32>
    %429 = vector.broadcast %cst_181 : f32 to vector<10x10xf32>
    %430 = arith.select %427, %428, %429 : vector<10x10xi1>, vector<10x10xf32>
    %c0_182 = arith.constant 0 : index
    %c0_183 = arith.constant 0 : index
    %431 = vector.load %arg37[%c0_182, %c0_183] : memref<1x32xf32, #tpu.memory_space<vmem>>, vector<1x32xf32>
    %c0_184 = arith.constant 0 : index
    %c0_185 = arith.constant 0 : index
    %432 = vector.load %arg38[%c0_184, %c0_185] : memref<1x32xf32, #tpu.memory_space<vmem>>, vector<1x32xf32>
    %cst_186 = arith.constant dense<0.000000e+00> : vector<10xf32>
    %433 = vector.multi_reduction <add>, %402, %cst_186 [1] : vector<10x32xf32> to vector<10xf32>
    %434 = vector.shape_cast %433 : vector<10xf32> to vector<10x1xf32>
    %cst_187 = arith.constant 3.200000e+01 : f32
    %435 = vector.broadcast %cst_187 : f32 to vector<10x1xf32>
    %436 = arith.divf %434, %435 : vector<10x1xf32>
    %437 = vector.broadcast %436 : vector<10x1xf32> to vector<10x32xf32>
    %438 = arith.subf %402, %437 : vector<10x32xf32>
    %439 = arith.mulf %438, %438 : vector<10x32xf32>
    %cst_188 = arith.constant dense<0.000000e+00> : vector<10xf32>
    %440 = vector.multi_reduction <add>, %439, %cst_188 [1] : vector<10x32xf32> to vector<10xf32>
    %441 = vector.shape_cast %440 : vector<10xf32> to vector<10x1xf32>
    %cst_189 = arith.constant 3.200000e+01 : f32
    %442 = vector.broadcast %cst_189 : f32 to vector<10x1xf32>
    %443 = arith.divf %441, %442 : vector<10x1xf32>
    %cst_190 = arith.constant 9.99999974E-6 : f32
    %444 = vector.broadcast %cst_190 : f32 to vector<10x1xf32>
    %445 = arith.addf %443, %444 : vector<10x1xf32>
    %446 = math.rsqrt %445 : vector<10x1xf32>
    %447 = vector.broadcast %446 : vector<10x1xf32> to vector<10x32xf32>
    %448 = arith.mulf %438, %447 : vector<10x32xf32>
    %449 = vector.broadcast %431 : vector<1x32xf32> to vector<10x32xf32>
    %450 = arith.mulf %448, %449 : vector<10x32xf32>
    %451 = vector.broadcast %432 : vector<1x32xf32> to vector<10x32xf32>
    %452 = arith.addf %450, %451 : vector<10x32xf32>
    %c0_191 = arith.constant 0 : index
    %c0_192 = arith.constant 0 : index
    %453 = vector.load %arg39[%c0_191, %c0_192] : memref<32x96xf32, #tpu.memory_space<vmem>>, vector<32x96xf32>
    %cst_193 = arith.constant dense<0.000000e+00> : vector<10x96xf32>
    %454 = tpu.matmul %452, %453, %cst_193 {dimension_numbers = #tpu.dot_dimension_numbers<[1], [0], [0], [1], [0, 0, 1, 1], [], []>} : vector<10x32xf32>, vector<32x96xf32>, vector<10x96xf32> -> vector<10x96xf32>
    %c0_194 = arith.constant 0 : index
    %c0_195 = arith.constant 0 : index
    %455 = vector.load %arg40[%c0_194, %c0_195] : memref<1x96xf32, #tpu.memory_space<vmem>>, vector<1x96xf32>
    %456 = vector.broadcast %455 : vector<1x96xf32> to vector<10x96xf32>
    %457 = arith.addf %454, %456 : vector<10x96xf32>
    %c0_196 = arith.constant 0 : index
    %c0_197 = arith.constant 0 : index
    %458 = vector.load %arg41[%c0_196, %c0_197] : memref<32x32xf32, #tpu.memory_space<vmem>>, vector<32x32xf32>
    %cst_198 = arith.constant 0.000000e+00 : f32
    %459 = vector.broadcast %cst_198 : f32 to vector<10x32xf32>
    %460 = vector.extract_strided_slice %457 {offsets = [0, 0], sizes = [10, 8], strides = [1, 1]} : vector<10x96xf32> to vector<10x8xf32>
    %461 = vector.extract_strided_slice %457 {offsets = [0, 32], sizes = [10, 8], strides = [1, 1]} : vector<10x96xf32> to vector<10x8xf32>
    %462 = vector.extract_strided_slice %457 {offsets = [0, 64], sizes = [10, 8], strides = [1, 1]} : vector<10x96xf32> to vector<10x8xf32>
    %cst_199 = arith.constant dense<0.000000e+00> : vector<10x10xf32>
    %463 = tpu.matmul %460, %461, %cst_199 {dimension_numbers = #tpu.dot_dimension_numbers<[1], [1], [0], [0], [0, 0, 1, 0], [], []>} : vector<10x8xf32>, vector<10x8xf32>, vector<10x10xf32> -> vector<10x10xf32>
    %464 = arith.addf %463, %430 : vector<10x10xf32>
    %cst_200 = arith.constant dense<0xFF800000> : vector<10xf32>
    %465 = vector.multi_reduction <maximumf>, %464, %cst_200 [1] : vector<10x10xf32> to vector<10xf32>
    %466 = vector.shape_cast %465 : vector<10xf32> to vector<10x1xf32>
    %467 = vector.broadcast %466 : vector<10x1xf32> to vector<10x10xf32>
    %468 = arith.subf %464, %467 : vector<10x10xf32>
    %469 = math.exp %468 : vector<10x10xf32>
    %cst_201 = arith.constant dense<0.000000e+00> : vector<10xf32>
    %470 = vector.multi_reduction <add>, %469, %cst_201 [1] : vector<10x10xf32> to vector<10xf32>
    %471 = vector.shape_cast %470 : vector<10xf32> to vector<10x1xf32>
    %472 = vector.broadcast %471 : vector<10x1xf32> to vector<10x10xf32>
    %473 = arith.divf %469, %472 : vector<10x10xf32>
    %cst_202 = arith.constant dense<0.000000e+00> : vector<10x8xf32>
    %474 = tpu.matmul %473, %462, %cst_202 {dimension_numbers = #tpu.dot_dimension_numbers<[1], [0], [0], [1], [0, 0, 1, 1], [], []>} : vector<10x10xf32>, vector<10x8xf32>, vector<10x8xf32> -> vector<10x8xf32>
    %475 = vector.extract_strided_slice %458 {offsets = [0, 0], sizes = [8, 32], strides = [1, 1]} : vector<32x32xf32> to vector<8x32xf32>
    %cst_203 = arith.constant dense<0.000000e+00> : vector<10x32xf32>
    %476 = tpu.matmul %474, %475, %cst_203 {dimension_numbers = #tpu.dot_dimension_numbers<[1], [0], [0], [1], [0, 0, 1, 1], [], []>} : vector<10x8xf32>, vector<8x32xf32>, vector<10x32xf32> -> vector<10x32xf32>
    %477 = arith.addf %459, %476 : vector<10x32xf32>
    %478 = vector.extract_strided_slice %457 {offsets = [0, 8], sizes = [10, 8], strides = [1, 1]} : vector<10x96xf32> to vector<10x8xf32>
    %479 = vector.extract_strided_slice %457 {offsets = [0, 40], sizes = [10, 8], strides = [1, 1]} : vector<10x96xf32> to vector<10x8xf32>
    %480 = vector.extract_strided_slice %457 {offsets = [0, 72], sizes = [10, 8], strides = [1, 1]} : vector<10x96xf32> to vector<10x8xf32>
    %cst_204 = arith.constant dense<0.000000e+00> : vector<10x10xf32>
    %481 = tpu.matmul %478, %479, %cst_204 {dimension_numbers = #tpu.dot_dimension_numbers<[1], [1], [0], [0], [0, 0, 1, 0], [], []>} : vector<10x8xf32>, vector<10x8xf32>, vector<10x10xf32> -> vector<10x10xf32>
    %482 = arith.addf %481, %430 : vector<10x10xf32>
    %cst_205 = arith.constant dense<0xFF800000> : vector<10xf32>
    %483 = vector.multi_reduction <maximumf>, %482, %cst_205 [1] : vector<10x10xf32> to vector<10xf32>
    %484 = vector.shape_cast %483 : vector<10xf32> to vector<10x1xf32>
    %485 = vector.broadcast %484 : vector<10x1xf32> to vector<10x10xf32>
    %486 = arith.subf %482, %485 : vector<10x10xf32>
    %487 = math.exp %486 : vector<10x10xf32>
    %cst_206 = arith.constant dense<0.000000e+00> : vector<10xf32>
    %488 = vector.multi_reduction <add>, %487, %cst_206 [1] : vector<10x10xf32> to vector<10xf32>
    %489 = vector.shape_cast %488 : vector<10xf32> to vector<10x1xf32>
    %490 = vector.broadcast %489 : vector<10x1xf32> to vector<10x10xf32>
    %491 = arith.divf %487, %490 : vector<10x10xf32>
    %cst_207 = arith.constant dense<0.000000e+00> : vector<10x8xf32>
    %492 = tpu.matmul %491, %480, %cst_207 {dimension_numbers = #tpu.dot_dimension_numbers<[1], [0], [0], [1], [0, 0, 1, 1], [], []>} : vector<10x10xf32>, vector<10x8xf32>, vector<10x8xf32> -> vector<10x8xf32>
    %493 = vector.extract_strided_slice %458 {offsets = [8, 0], sizes = [8, 32], strides = [1, 1]} : vector<32x32xf32> to vector<8x32xf32>
    %cst_208 = arith.constant dense<0.000000e+00> : vector<10x32xf32>
    %494 = tpu.matmul %492, %493, %cst_208 {dimension_numbers = #tpu.dot_dimension_numbers<[1], [0], [0], [1], [0, 0, 1, 1], [], []>} : vector<10x8xf32>, vector<8x32xf32>, vector<10x32xf32> -> vector<10x32xf32>
    %495 = arith.addf %477, %494 : vector<10x32xf32>
    %496 = vector.extract_strided_slice %457 {offsets = [0, 16], sizes = [10, 8], strides = [1, 1]} : vector<10x96xf32> to vector<10x8xf32>
    %497 = vector.extract_strided_slice %457 {offsets = [0, 48], sizes = [10, 8], strides = [1, 1]} : vector<10x96xf32> to vector<10x8xf32>
    %498 = vector.extract_strided_slice %457 {offsets = [0, 80], sizes = [10, 8], strides = [1, 1]} : vector<10x96xf32> to vector<10x8xf32>
    %cst_209 = arith.constant dense<0.000000e+00> : vector<10x10xf32>
    %499 = tpu.matmul %496, %497, %cst_209 {dimension_numbers = #tpu.dot_dimension_numbers<[1], [1], [0], [0], [0, 0, 1, 0], [], []>} : vector<10x8xf32>, vector<10x8xf32>, vector<10x10xf32> -> vector<10x10xf32>
    %500 = arith.addf %499, %430 : vector<10x10xf32>
    %cst_210 = arith.constant dense<0xFF800000> : vector<10xf32>
    %501 = vector.multi_reduction <maximumf>, %500, %cst_210 [1] : vector<10x10xf32> to vector<10xf32>
    %502 = vector.shape_cast %501 : vector<10xf32> to vector<10x1xf32>
    %503 = vector.broadcast %502 : vector<10x1xf32> to vector<10x10xf32>
    %504 = arith.subf %500, %503 : vector<10x10xf32>
    %505 = math.exp %504 : vector<10x10xf32>
    %cst_211 = arith.constant dense<0.000000e+00> : vector<10xf32>
    %506 = vector.multi_reduction <add>, %505, %cst_211 [1] : vector<10x10xf32> to vector<10xf32>
    %507 = vector.shape_cast %506 : vector<10xf32> to vector<10x1xf32>
    %508 = vector.broadcast %507 : vector<10x1xf32> to vector<10x10xf32>
    %509 = arith.divf %505, %508 : vector<10x10xf32>
    %cst_212 = arith.constant dense<0.000000e+00> : vector<10x8xf32>
    %510 = tpu.matmul %509, %498, %cst_212 {dimension_numbers = #tpu.dot_dimension_numbers<[1], [0], [0], [1], [0, 0, 1, 1], [], []>} : vector<10x10xf32>, vector<10x8xf32>, vector<10x8xf32> -> vector<10x8xf32>
    %511 = vector.extract_strided_slice %458 {offsets = [16, 0], sizes = [8, 32], strides = [1, 1]} : vector<32x32xf32> to vector<8x32xf32>
    %cst_213 = arith.constant dense<0.000000e+00> : vector<10x32xf32>
    %512 = tpu.matmul %510, %511, %cst_213 {dimension_numbers = #tpu.dot_dimension_numbers<[1], [0], [0], [1], [0, 0, 1, 1], [], []>} : vector<10x8xf32>, vector<8x32xf32>, vector<10x32xf32> -> vector<10x32xf32>
    %513 = arith.addf %495, %512 : vector<10x32xf32>
    %514 = vector.extract_strided_slice %457 {offsets = [0, 24], sizes = [10, 8], strides = [1, 1]} : vector<10x96xf32> to vector<10x8xf32>
    %515 = vector.extract_strided_slice %457 {offsets = [0, 56], sizes = [10, 8], strides = [1, 1]} : vector<10x96xf32> to vector<10x8xf32>
    %516 = vector.extract_strided_slice %457 {offsets = [0, 88], sizes = [10, 8], strides = [1, 1]} : vector<10x96xf32> to vector<10x8xf32>
    %cst_214 = arith.constant dense<0.000000e+00> : vector<10x10xf32>
    %517 = tpu.matmul %514, %515, %cst_214 {dimension_numbers = #tpu.dot_dimension_numbers<[1], [1], [0], [0], [0, 0, 1, 0], [], []>} : vector<10x8xf32>, vector<10x8xf32>, vector<10x10xf32> -> vector<10x10xf32>
    %518 = arith.addf %517, %430 : vector<10x10xf32>
    %cst_215 = arith.constant dense<0xFF800000> : vector<10xf32>
    %519 = vector.multi_reduction <maximumf>, %518, %cst_215 [1] : vector<10x10xf32> to vector<10xf32>
    %520 = vector.shape_cast %519 : vector<10xf32> to vector<10x1xf32>
    %521 = vector.broadcast %520 : vector<10x1xf32> to vector<10x10xf32>
    %522 = arith.subf %518, %521 : vector<10x10xf32>
    %523 = math.exp %522 : vector<10x10xf32>
    %cst_216 = arith.constant dense<0.000000e+00> : vector<10xf32>
    %524 = vector.multi_reduction <add>, %523, %cst_216 [1] : vector<10x10xf32> to vector<10xf32>
    %525 = vector.shape_cast %524 : vector<10xf32> to vector<10x1xf32>
    %526 = vector.broadcast %525 : vector<10x1xf32> to vector<10x10xf32>
    %527 = arith.divf %523, %526 : vector<10x10xf32>
    %cst_217 = arith.constant dense<0.000000e+00> : vector<10x8xf32>
    %528 = tpu.matmul %527, %516, %cst_217 {dimension_numbers = #tpu.dot_dimension_numbers<[1], [0], [0], [1], [0, 0, 1, 1], [], []>} : vector<10x10xf32>, vector<10x8xf32>, vector<10x8xf32> -> vector<10x8xf32>
    %529 = vector.extract_strided_slice %458 {offsets = [24, 0], sizes = [8, 32], strides = [1, 1]} : vector<32x32xf32> to vector<8x32xf32>
    %cst_218 = arith.constant dense<0.000000e+00> : vector<10x32xf32>
    %530 = tpu.matmul %528, %529, %cst_218 {dimension_numbers = #tpu.dot_dimension_numbers<[1], [0], [0], [1], [0, 0, 1, 1], [], []>} : vector<10x8xf32>, vector<8x32xf32>, vector<10x32xf32> -> vector<10x32xf32>
    %531 = arith.addf %513, %530 : vector<10x32xf32>
    %532 = arith.addf %402, %531 : vector<10x32xf32>
    %c0_219 = arith.constant 0 : index
    %c0_220 = arith.constant 0 : index
    %533 = vector.load %arg42[%c0_219, %c0_220] : memref<1x32xf32, #tpu.memory_space<vmem>>, vector<1x32xf32>
    %534 = vector.broadcast %533 : vector<1x32xf32> to vector<10x32xf32>
    %535 = arith.addf %532, %534 : vector<10x32xf32>
    %c0_221 = arith.constant 0 : index
    %c0_222 = arith.constant 0 : index
    %536 = vector.load %arg43[%c0_221, %c0_222] : memref<1x32xf32, #tpu.memory_space<vmem>>, vector<1x32xf32>
    %c0_223 = arith.constant 0 : index
    %c0_224 = arith.constant 0 : index
    %537 = vector.load %arg44[%c0_223, %c0_224] : memref<1x32xf32, #tpu.memory_space<vmem>>, vector<1x32xf32>
    %cst_225 = arith.constant dense<0.000000e+00> : vector<10xf32>
    %538 = vector.multi_reduction <add>, %535, %cst_225 [1] : vector<10x32xf32> to vector<10xf32>
    %539 = vector.shape_cast %538 : vector<10xf32> to vector<10x1xf32>
    %cst_226 = arith.constant 3.200000e+01 : f32
    %540 = vector.broadcast %cst_226 : f32 to vector<10x1xf32>
    %541 = arith.divf %539, %540 : vector<10x1xf32>
    %542 = vector.broadcast %541 : vector<10x1xf32> to vector<10x32xf32>
    %543 = arith.subf %535, %542 : vector<10x32xf32>
    %544 = arith.mulf %543, %543 : vector<10x32xf32>
    %cst_227 = arith.constant dense<0.000000e+00> : vector<10xf32>
    %545 = vector.multi_reduction <add>, %544, %cst_227 [1] : vector<10x32xf32> to vector<10xf32>
    %546 = vector.shape_cast %545 : vector<10xf32> to vector<10x1xf32>
    %cst_228 = arith.constant 3.200000e+01 : f32
    %547 = vector.broadcast %cst_228 : f32 to vector<10x1xf32>
    %548 = arith.divf %546, %547 : vector<10x1xf32>
    %cst_229 = arith.constant 9.99999974E-6 : f32
    %549 = vector.broadcast %cst_229 : f32 to vector<10x1xf32>
    %550 = arith.addf %548, %549 : vector<10x1xf32>
    %551 = math.rsqrt %550 : vector<10x1xf32>
    %552 = vector.broadcast %551 : vector<10x1xf32> to vector<10x32xf32>
    %553 = arith.mulf %543, %552 : vector<10x32xf32>
    %554 = vector.broadcast %536 : vector<1x32xf32> to vector<10x32xf32>
    %555 = arith.mulf %553, %554 : vector<10x32xf32>
    %556 = vector.broadcast %537 : vector<1x32xf32> to vector<10x32xf32>
    %557 = arith.addf %555, %556 : vector<10x32xf32>
    %c0_230 = arith.constant 0 : index
    %c0_231 = arith.constant 0 : index
    %558 = vector.load %arg45[%c0_230, %c0_231] : memref<32x128xf32, #tpu.memory_space<vmem>>, vector<32x128xf32>
    %cst_232 = arith.constant dense<0.000000e+00> : vector<10x128xf32>
    %559 = tpu.matmul %557, %558, %cst_232 {dimension_numbers = #tpu.dot_dimension_numbers<[1], [0], [0], [1], [0, 0, 1, 1], [], []>} : vector<10x32xf32>, vector<32x128xf32>, vector<10x128xf32> -> vector<10x128xf32>
    %c0_233 = arith.constant 0 : index
    %c0_234 = arith.constant 0 : index
    %560 = vector.load %arg46[%c0_233, %c0_234] : memref<1x128xf32, #tpu.memory_space<vmem>>, vector<1x128xf32>
    %561 = vector.broadcast %560 : vector<1x128xf32> to vector<10x128xf32>
    %562 = arith.addf %559, %561 : vector<10x128xf32>
    %cst_235 = arith.constant 5.000000e-01 : f32
    %563 = vector.broadcast %cst_235 : f32 to vector<10x128xf32>
    %564 = arith.mulf %563, %562 : vector<10x128xf32>
    %cst_236 = arith.constant 4.471500e-02 : f32
    %565 = vector.broadcast %cst_236 : f32 to vector<10x128xf32>
    %566 = arith.mulf %565, %562 : vector<10x128xf32>
    %567 = arith.mulf %566, %562 : vector<10x128xf32>
    %568 = arith.mulf %567, %562 : vector<10x128xf32>
    %569 = arith.addf %562, %568 : vector<10x128xf32>
    %cst_237 = arith.constant 0.797884583 : f32
    %570 = vector.broadcast %cst_237 : f32 to vector<10x128xf32>
    %571 = arith.mulf %570, %569 : vector<10x128xf32>
    %572 = math.tanh %571 : vector<10x128xf32>
    %cst_238 = arith.constant 1.000000e+00 : f32
    %573 = vector.broadcast %cst_238 : f32 to vector<10x128xf32>
    %574 = arith.addf %573, %572 : vector<10x128xf32>
    %575 = arith.mulf %564, %574 : vector<10x128xf32>
    %c0_239 = arith.constant 0 : index
    %c0_240 = arith.constant 0 : index
    %576 = vector.load %arg47[%c0_239, %c0_240] : memref<128x32xf32, #tpu.memory_space<vmem>>, vector<128x32xf32>
    %cst_241 = arith.constant dense<0.000000e+00> : vector<10x32xf32>
    %577 = tpu.matmul %575, %576, %cst_241 {dimension_numbers = #tpu.dot_dimension_numbers<[1], [0], [0], [1], [0, 0, 1, 1], [], []>} : vector<10x128xf32>, vector<128x32xf32>, vector<10x32xf32> -> vector<10x32xf32>
    %c0_242 = arith.constant 0 : index
    %c0_243 = arith.constant 0 : index
    %578 = vector.load %arg48[%c0_242, %c0_243] : memref<1x32xf32, #tpu.memory_space<vmem>>, vector<1x32xf32>
    %579 = vector.broadcast %578 : vector<1x32xf32> to vector<10x32xf32>
    %580 = arith.addf %577, %579 : vector<10x32xf32>
    %581 = arith.addf %535, %580 : vector<10x32xf32>
    %c0_244 = arith.constant 0 : index
    %c0_245 = arith.constant 0 : index
    %582 = vector.load %arg49[%c0_244, %c0_245] : memref<1x32xf32, #tpu.memory_space<vmem>>, vector<1x32xf32>
    %c0_246 = arith.constant 0 : index
    %c0_247 = arith.constant 0 : index
    %583 = vector.load %arg50[%c0_246, %c0_247] : memref<1x32xf32, #tpu.memory_space<vmem>>, vector<1x32xf32>
    %cst_248 = arith.constant dense<0.000000e+00> : vector<10xf32>
    %584 = vector.multi_reduction <add>, %581, %cst_248 [1] : vector<10x32xf32> to vector<10xf32>
    %585 = vector.shape_cast %584 : vector<10xf32> to vector<10x1xf32>
    %cst_249 = arith.constant 3.200000e+01 : f32
    %586 = vector.broadcast %cst_249 : f32 to vector<10x1xf32>
    %587 = arith.divf %585, %586 : vector<10x1xf32>
    %588 = vector.broadcast %587 : vector<10x1xf32> to vector<10x32xf32>
    %589 = arith.subf %581, %588 : vector<10x32xf32>
    %590 = arith.mulf %589, %589 : vector<10x32xf32>
    %cst_250 = arith.constant dense<0.000000e+00> : vector<10xf32>
    %591 = vector.multi_reduction <add>, %590, %cst_250 [1] : vector<10x32xf32> to vector<10xf32>
    %592 = vector.shape_cast %591 : vector<10xf32> to vector<10x1xf32>
    %cst_251 = arith.constant 3.200000e+01 : f32
    %593 = vector.broadcast %cst_251 : f32 to vector<10x1xf32>
    %594 = arith.divf %592, %593 : vector<10x1xf32>
    %cst_252 = arith.constant 9.99999974E-6 : f32
    %595 = vector.broadcast %cst_252 : f32 to vector<10x1xf32>
    %596 = arith.addf %594, %595 : vector<10x1xf32>
    %597 = math.rsqrt %596 : vector<10x1xf32>
    %598 = vector.broadcast %597 : vector<10x1xf32> to vector<10x32xf32>
    %599 = arith.mulf %589, %598 : vector<10x32xf32>
    %600 = vector.broadcast %582 : vector<1x32xf32> to vector<10x32xf32>
    %601 = arith.mulf %599, %600 : vector<10x32xf32>
    %602 = vector.broadcast %583 : vector<1x32xf32> to vector<10x32xf32>
    %603 = arith.addf %601, %602 : vector<10x32xf32>
    %c0_253 = arith.constant 0 : index
    %c0_254 = arith.constant 0 : index
    %604 = vector.load %arg51[%c0_253, %c0_254] : memref<32x96xf32, #tpu.memory_space<vmem>>, vector<32x96xf32>
    %cst_255 = arith.constant dense<0.000000e+00> : vector<10x96xf32>
    %605 = tpu.matmul %603, %604, %cst_255 {dimension_numbers = #tpu.dot_dimension_numbers<[1], [0], [0], [1], [0, 0, 1, 1], [], []>} : vector<10x32xf32>, vector<32x96xf32>, vector<10x96xf32> -> vector<10x96xf32>
    %c0_256 = arith.constant 0 : index
    %c0_257 = arith.constant 0 : index
    %606 = vector.load %arg52[%c0_256, %c0_257] : memref<1x96xf32, #tpu.memory_space<vmem>>, vector<1x96xf32>
    %607 = vector.broadcast %606 : vector<1x96xf32> to vector<10x96xf32>
    %608 = arith.addf %605, %607 : vector<10x96xf32>
    %c0_258 = arith.constant 0 : index
    %c0_259 = arith.constant 0 : index
    %609 = vector.load %arg53[%c0_258, %c0_259] : memref<32x32xf32, #tpu.memory_space<vmem>>, vector<32x32xf32>
    %cst_260 = arith.constant 0.000000e+00 : f32
    %610 = vector.broadcast %cst_260 : f32 to vector<10x32xf32>
    %611 = vector.extract_strided_slice %608 {offsets = [0, 0], sizes = [10, 8], strides = [1, 1]} : vector<10x96xf32> to vector<10x8xf32>
    %612 = vector.extract_strided_slice %608 {offsets = [0, 32], sizes = [10, 8], strides = [1, 1]} : vector<10x96xf32> to vector<10x8xf32>
    %613 = vector.extract_strided_slice %608 {offsets = [0, 64], sizes = [10, 8], strides = [1, 1]} : vector<10x96xf32> to vector<10x8xf32>
    %cst_261 = arith.constant dense<0.000000e+00> : vector<10x10xf32>
    %614 = tpu.matmul %611, %612, %cst_261 {dimension_numbers = #tpu.dot_dimension_numbers<[1], [1], [0], [0], [0, 0, 1, 0], [], []>} : vector<10x8xf32>, vector<10x8xf32>, vector<10x10xf32> -> vector<10x10xf32>
    %615 = arith.addf %614, %430 : vector<10x10xf32>
    %cst_262 = arith.constant dense<0xFF800000> : vector<10xf32>
    %616 = vector.multi_reduction <maximumf>, %615, %cst_262 [1] : vector<10x10xf32> to vector<10xf32>
    %617 = vector.shape_cast %616 : vector<10xf32> to vector<10x1xf32>
    %618 = vector.broadcast %617 : vector<10x1xf32> to vector<10x10xf32>
    %619 = arith.subf %615, %618 : vector<10x10xf32>
    %620 = math.exp %619 : vector<10x10xf32>
    %cst_263 = arith.constant dense<0.000000e+00> : vector<10xf32>
    %621 = vector.multi_reduction <add>, %620, %cst_263 [1] : vector<10x10xf32> to vector<10xf32>
    %622 = vector.shape_cast %621 : vector<10xf32> to vector<10x1xf32>
    %623 = vector.broadcast %622 : vector<10x1xf32> to vector<10x10xf32>
    %624 = arith.divf %620, %623 : vector<10x10xf32>
    %cst_264 = arith.constant dense<0.000000e+00> : vector<10x8xf32>
    %625 = tpu.matmul %624, %613, %cst_264 {dimension_numbers = #tpu.dot_dimension_numbers<[1], [0], [0], [1], [0, 0, 1, 1], [], []>} : vector<10x10xf32>, vector<10x8xf32>, vector<10x8xf32> -> vector<10x8xf32>
    %626 = vector.extract_strided_slice %609 {offsets = [0, 0], sizes = [8, 32], strides = [1, 1]} : vector<32x32xf32> to vector<8x32xf32>
    %cst_265 = arith.constant dense<0.000000e+00> : vector<10x32xf32>
    %627 = tpu.matmul %625, %626, %cst_265 {dimension_numbers = #tpu.dot_dimension_numbers<[1], [0], [0], [1], [0, 0, 1, 1], [], []>} : vector<10x8xf32>, vector<8x32xf32>, vector<10x32xf32> -> vector<10x32xf32>
    %628 = arith.addf %610, %627 : vector<10x32xf32>
    %629 = vector.extract_strided_slice %608 {offsets = [0, 8], sizes = [10, 8], strides = [1, 1]} : vector<10x96xf32> to vector<10x8xf32>
    %630 = vector.extract_strided_slice %608 {offsets = [0, 40], sizes = [10, 8], strides = [1, 1]} : vector<10x96xf32> to vector<10x8xf32>
    %631 = vector.extract_strided_slice %608 {offsets = [0, 72], sizes = [10, 8], strides = [1, 1]} : vector<10x96xf32> to vector<10x8xf32>
    %cst_266 = arith.constant dense<0.000000e+00> : vector<10x10xf32>
    %632 = tpu.matmul %629, %630, %cst_266 {dimension_numbers = #tpu.dot_dimension_numbers<[1], [1], [0], [0], [0, 0, 1, 0], [], []>} : vector<10x8xf32>, vector<10x8xf32>, vector<10x10xf32> -> vector<10x10xf32>
    %633 = arith.addf %632, %430 : vector<10x10xf32>
    %cst_267 = arith.constant dense<0xFF800000> : vector<10xf32>
    %634 = vector.multi_reduction <maximumf>, %633, %cst_267 [1] : vector<10x10xf32> to vector<10xf32>
    %635 = vector.shape_cast %634 : vector<10xf32> to vector<10x1xf32>
    %636 = vector.broadcast %635 : vector<10x1xf32> to vector<10x10xf32>
    %637 = arith.subf %633, %636 : vector<10x10xf32>
    %638 = math.exp %637 : vector<10x10xf32>
    %cst_268 = arith.constant dense<0.000000e+00> : vector<10xf32>
    %639 = vector.multi_reduction <add>, %638, %cst_268 [1] : vector<10x10xf32> to vector<10xf32>
    %640 = vector.shape_cast %639 : vector<10xf32> to vector<10x1xf32>
    %641 = vector.broadcast %640 : vector<10x1xf32> to vector<10x10xf32>
    %642 = arith.divf %638, %641 : vector<10x10xf32>
    %cst_269 = arith.constant dense<0.000000e+00> : vector<10x8xf32>
    %643 = tpu.matmul %642, %631, %cst_269 {dimension_numbers = #tpu.dot_dimension_numbers<[1], [0], [0], [1], [0, 0, 1, 1], [], []>} : vector<10x10xf32>, vector<10x8xf32>, vector<10x8xf32> -> vector<10x8xf32>
    %644 = vector.extract_strided_slice %609 {offsets = [8, 0], sizes = [8, 32], strides = [1, 1]} : vector<32x32xf32> to vector<8x32xf32>
    %cst_270 = arith.constant dense<0.000000e+00> : vector<10x32xf32>
    %645 = tpu.matmul %643, %644, %cst_270 {dimension_numbers = #tpu.dot_dimension_numbers<[1], [0], [0], [1], [0, 0, 1, 1], [], []>} : vector<10x8xf32>, vector<8x32xf32>, vector<10x32xf32> -> vector<10x32xf32>
    %646 = arith.addf %628, %645 : vector<10x32xf32>
    %647 = vector.extract_strided_slice %608 {offsets = [0, 16], sizes = [10, 8], strides = [1, 1]} : vector<10x96xf32> to vector<10x8xf32>
    %648 = vector.extract_strided_slice %608 {offsets = [0, 48], sizes = [10, 8], strides = [1, 1]} : vector<10x96xf32> to vector<10x8xf32>
    %649 = vector.extract_strided_slice %608 {offsets = [0, 80], sizes = [10, 8], strides = [1, 1]} : vector<10x96xf32> to vector<10x8xf32>
    %cst_271 = arith.constant dense<0.000000e+00> : vector<10x10xf32>
    %650 = tpu.matmul %647, %648, %cst_271 {dimension_numbers = #tpu.dot_dimension_numbers<[1], [1], [0], [0], [0, 0, 1, 0], [], []>} : vector<10x8xf32>, vector<10x8xf32>, vector<10x10xf32> -> vector<10x10xf32>
    %651 = arith.addf %650, %430 : vector<10x10xf32>
    %cst_272 = arith.constant dense<0xFF800000> : vector<10xf32>
    %652 = vector.multi_reduction <maximumf>, %651, %cst_272 [1] : vector<10x10xf32> to vector<10xf32>
    %653 = vector.shape_cast %652 : vector<10xf32> to vector<10x1xf32>
    %654 = vector.broadcast %653 : vector<10x1xf32> to vector<10x10xf32>
    %655 = arith.subf %651, %654 : vector<10x10xf32>
    %656 = math.exp %655 : vector<10x10xf32>
    %cst_273 = arith.constant dense<0.000000e+00> : vector<10xf32>
    %657 = vector.multi_reduction <add>, %656, %cst_273 [1] : vector<10x10xf32> to vector<10xf32>
    %658 = vector.shape_cast %657 : vector<10xf32> to vector<10x1xf32>
    %659 = vector.broadcast %658 : vector<10x1xf32> to vector<10x10xf32>
    %660 = arith.divf %656, %659 : vector<10x10xf32>
    %cst_274 = arith.constant dense<0.000000e+00> : vector<10x8xf32>
    %661 = tpu.matmul %660, %649, %cst_274 {dimension_numbers = #tpu.dot_dimension_numbers<[1], [0], [0], [1], [0, 0, 1, 1], [], []>} : vector<10x10xf32>, vector<10x8xf32>, vector<10x8xf32> -> vector<10x8xf32>
    %662 = vector.extract_strided_slice %609 {offsets = [16, 0], sizes = [8, 32], strides = [1, 1]} : vector<32x32xf32> to vector<8x32xf32>
    %cst_275 = arith.constant dense<0.000000e+00> : vector<10x32xf32>
    %663 = tpu.matmul %661, %662, %cst_275 {dimension_numbers = #tpu.dot_dimension_numbers<[1], [0], [0], [1], [0, 0, 1, 1], [], []>} : vector<10x8xf32>, vector<8x32xf32>, vector<10x32xf32> -> vector<10x32xf32>
    %664 = arith.addf %646, %663 : vector<10x32xf32>
    %665 = vector.extract_strided_slice %608 {offsets = [0, 24], sizes = [10, 8], strides = [1, 1]} : vector<10x96xf32> to vector<10x8xf32>
    %666 = vector.extract_strided_slice %608 {offsets = [0, 56], sizes = [10, 8], strides = [1, 1]} : vector<10x96xf32> to vector<10x8xf32>
    %667 = vector.extract_strided_slice %608 {offsets = [0, 88], sizes = [10, 8], strides = [1, 1]} : vector<10x96xf32> to vector<10x8xf32>
    %cst_276 = arith.constant dense<0.000000e+00> : vector<10x10xf32>
    %668 = tpu.matmul %665, %666, %cst_276 {dimension_numbers = #tpu.dot_dimension_numbers<[1], [1], [0], [0], [0, 0, 1, 0], [], []>} : vector<10x8xf32>, vector<10x8xf32>, vector<10x10xf32> -> vector<10x10xf32>
    %669 = arith.addf %668, %430 : vector<10x10xf32>
    %cst_277 = arith.constant dense<0xFF800000> : vector<10xf32>
    %670 = vector.multi_reduction <maximumf>, %669, %cst_277 [1] : vector<10x10xf32> to vector<10xf32>
    %671 = vector.shape_cast %670 : vector<10xf32> to vector<10x1xf32>
    %672 = vector.broadcast %671 : vector<10x1xf32> to vector<10x10xf32>
    %673 = arith.subf %669, %672 : vector<10x10xf32>
    %674 = math.exp %673 : vector<10x10xf32>
    %cst_278 = arith.constant dense<0.000000e+00> : vector<10xf32>
    %675 = vector.multi_reduction <add>, %674, %cst_278 [1] : vector<10x10xf32> to vector<10xf32>
    %676 = vector.shape_cast %675 : vector<10xf32> to vector<10x1xf32>
    %677 = vector.broadcast %676 : vector<10x1xf32> to vector<10x10xf32>
    %678 = arith.divf %674, %677 : vector<10x10xf32>
    %cst_279 = arith.constant dense<0.000000e+00> : vector<10x8xf32>
    %679 = tpu.matmul %678, %667, %cst_279 {dimension_numbers = #tpu.dot_dimension_numbers<[1], [0], [0], [1], [0, 0, 1, 1], [], []>} : vector<10x10xf32>, vector<10x8xf32>, vector<10x8xf32> -> vector<10x8xf32>
    %680 = vector.extract_strided_slice %609 {offsets = [24, 0], sizes = [8, 32], strides = [1, 1]} : vector<32x32xf32> to vector<8x32xf32>
    %cst_280 = arith.constant dense<0.000000e+00> : vector<10x32xf32>
    %681 = tpu.matmul %679, %680, %cst_280 {dimension_numbers = #tpu.dot_dimension_numbers<[1], [0], [0], [1], [0, 0, 1, 1], [], []>} : vector<10x8xf32>, vector<8x32xf32>, vector<10x32xf32> -> vector<10x32xf32>
    %682 = arith.addf %664, %681 : vector<10x32xf32>
    %683 = arith.addf %581, %682 : vector<10x32xf32>
    %c0_281 = arith.constant 0 : index
    %c0_282 = arith.constant 0 : index
    %684 = vector.load %arg54[%c0_281, %c0_282] : memref<1x32xf32, #tpu.memory_space<vmem>>, vector<1x32xf32>
    %685 = vector.broadcast %684 : vector<1x32xf32> to vector<10x32xf32>
    %686 = arith.addf %683, %685 : vector<10x32xf32>
    %c0_283 = arith.constant 0 : index
    %c0_284 = arith.constant 0 : index
    %687 = vector.load %arg55[%c0_283, %c0_284] : memref<1x32xf32, #tpu.memory_space<vmem>>, vector<1x32xf32>
    %c0_285 = arith.constant 0 : index
    %c0_286 = arith.constant 0 : index
    %688 = vector.load %arg56[%c0_285, %c0_286] : memref<1x32xf32, #tpu.memory_space<vmem>>, vector<1x32xf32>
    %cst_287 = arith.constant dense<0.000000e+00> : vector<10xf32>
    %689 = vector.multi_reduction <add>, %686, %cst_287 [1] : vector<10x32xf32> to vector<10xf32>
    %690 = vector.shape_cast %689 : vector<10xf32> to vector<10x1xf32>
    %cst_288 = arith.constant 3.200000e+01 : f32
    %691 = vector.broadcast %cst_288 : f32 to vector<10x1xf32>
    %692 = arith.divf %690, %691 : vector<10x1xf32>
    %693 = vector.broadcast %692 : vector<10x1xf32> to vector<10x32xf32>
    %694 = arith.subf %686, %693 : vector<10x32xf32>
    %695 = arith.mulf %694, %694 : vector<10x32xf32>
    %cst_289 = arith.constant dense<0.000000e+00> : vector<10xf32>
    %696 = vector.multi_reduction <add>, %695, %cst_289 [1] : vector<10x32xf32> to vector<10xf32>
    %697 = vector.shape_cast %696 : vector<10xf32> to vector<10x1xf32>
    %cst_290 = arith.constant 3.200000e+01 : f32
    %698 = vector.broadcast %cst_290 : f32 to vector<10x1xf32>
    %699 = arith.divf %697, %698 : vector<10x1xf32>
    %cst_291 = arith.constant 9.99999974E-6 : f32
    %700 = vector.broadcast %cst_291 : f32 to vector<10x1xf32>
    %701 = arith.addf %699, %700 : vector<10x1xf32>
    %702 = math.rsqrt %701 : vector<10x1xf32>
    %703 = vector.broadcast %702 : vector<10x1xf32> to vector<10x32xf32>
    %704 = arith.mulf %694, %703 : vector<10x32xf32>
    %705 = vector.broadcast %687 : vector<1x32xf32> to vector<10x32xf32>
    %706 = arith.mulf %704, %705 : vector<10x32xf32>
    %707 = vector.broadcast %688 : vector<1x32xf32> to vector<10x32xf32>
    %708 = arith.addf %706, %707 : vector<10x32xf32>
    %c0_292 = arith.constant 0 : index
    %c0_293 = arith.constant 0 : index
    %709 = vector.load %arg57[%c0_292, %c0_293] : memref<32x128xf32, #tpu.memory_space<vmem>>, vector<32x128xf32>
    %cst_294 = arith.constant dense<0.000000e+00> : vector<10x128xf32>
    %710 = tpu.matmul %708, %709, %cst_294 {dimension_numbers = #tpu.dot_dimension_numbers<[1], [0], [0], [1], [0, 0, 1, 1], [], []>} : vector<10x32xf32>, vector<32x128xf32>, vector<10x128xf32> -> vector<10x128xf32>
    %c0_295 = arith.constant 0 : index
    %c0_296 = arith.constant 0 : index
    %711 = vector.load %arg58[%c0_295, %c0_296] : memref<1x128xf32, #tpu.memory_space<vmem>>, vector<1x128xf32>
    %712 = vector.broadcast %711 : vector<1x128xf32> to vector<10x128xf32>
    %713 = arith.addf %710, %712 : vector<10x128xf32>
    %cst_297 = arith.constant 5.000000e-01 : f32
    %714 = vector.broadcast %cst_297 : f32 to vector<10x128xf32>
    %715 = arith.mulf %714, %713 : vector<10x128xf32>
    %cst_298 = arith.constant 4.471500e-02 : f32
    %716 = vector.broadcast %cst_298 : f32 to vector<10x128xf32>
    %717 = arith.mulf %716, %713 : vector<10x128xf32>
    %718 = arith.mulf %717, %713 : vector<10x128xf32>
    %719 = arith.mulf %718, %713 : vector<10x128xf32>
    %720 = arith.addf %713, %719 : vector<10x128xf32>
    %cst_299 = arith.constant 0.797884583 : f32
    %721 = vector.broadcast %cst_299 : f32 to vector<10x128xf32>
    %722 = arith.mulf %721, %720 : vector<10x128xf32>
    %723 = math.tanh %722 : vector<10x128xf32>
    %cst_300 = arith.constant 1.000000e+00 : f32
    %724 = vector.broadcast %cst_300 : f32 to vector<10x128xf32>
    %725 = arith.addf %724, %723 : vector<10x128xf32>
    %726 = arith.mulf %715, %725 : vector<10x128xf32>
    %c0_301 = arith.constant 0 : index
    %c0_302 = arith.constant 0 : index
    %727 = vector.load %arg59[%c0_301, %c0_302] : memref<128x32xf32, #tpu.memory_space<vmem>>, vector<128x32xf32>
    %cst_303 = arith.constant dense<0.000000e+00> : vector<10x32xf32>
    %728 = tpu.matmul %726, %727, %cst_303 {dimension_numbers = #tpu.dot_dimension_numbers<[1], [0], [0], [1], [0, 0, 1, 1], [], []>} : vector<10x128xf32>, vector<128x32xf32>, vector<10x32xf32> -> vector<10x32xf32>
    %c0_304 = arith.constant 0 : index
    %c0_305 = arith.constant 0 : index
    %729 = vector.load %arg60[%c0_304, %c0_305] : memref<1x32xf32, #tpu.memory_space<vmem>>, vector<1x32xf32>
    %730 = vector.broadcast %729 : vector<1x32xf32> to vector<10x32xf32>
    %731 = arith.addf %728, %730 : vector<10x32xf32>
    %732 = arith.addf %686, %731 : vector<10x32xf32>
    %c0_306 = arith.constant 0 : index
    %c0_307 = arith.constant 0 : index
    %733 = vector.load %arg61[%c0_306, %c0_307] : memref<1x32xf32, #tpu.memory_space<vmem>>, vector<1x32xf32>
    %c0_308 = arith.constant 0 : index
    %c0_309 = arith.constant 0 : index
    %734 = vector.load %arg62[%c0_308, %c0_309] : memref<1x32xf32, #tpu.memory_space<vmem>>, vector<1x32xf32>
    %cst_310 = arith.constant dense<0.000000e+00> : vector<10xf32>
    %735 = vector.multi_reduction <add>, %732, %cst_310 [1] : vector<10x32xf32> to vector<10xf32>
    %736 = vector.shape_cast %735 : vector<10xf32> to vector<10x1xf32>
    %cst_311 = arith.constant 3.200000e+01 : f32
    %737 = vector.broadcast %cst_311 : f32 to vector<10x1xf32>
    %738 = arith.divf %736, %737 : vector<10x1xf32>
    %739 = vector.broadcast %738 : vector<10x1xf32> to vector<10x32xf32>
    %740 = arith.subf %732, %739 : vector<10x32xf32>
    %741 = arith.mulf %740, %740 : vector<10x32xf32>
    %cst_312 = arith.constant dense<0.000000e+00> : vector<10xf32>
    %742 = vector.multi_reduction <add>, %741, %cst_312 [1] : vector<10x32xf32> to vector<10xf32>
    %743 = vector.shape_cast %742 : vector<10xf32> to vector<10x1xf32>
    %cst_313 = arith.constant 3.200000e+01 : f32
    %744 = vector.broadcast %cst_313 : f32 to vector<10x1xf32>
    %745 = arith.divf %743, %744 : vector<10x1xf32>
    %cst_314 = arith.constant 9.99999974E-6 : f32
    %746 = vector.broadcast %cst_314 : f32 to vector<10x1xf32>
    %747 = arith.addf %745, %746 : vector<10x1xf32>
    %748 = math.rsqrt %747 : vector<10x1xf32>
    %749 = vector.broadcast %748 : vector<10x1xf32> to vector<10x32xf32>
    %750 = arith.mulf %740, %749 : vector<10x32xf32>
    %751 = vector.broadcast %733 : vector<1x32xf32> to vector<10x32xf32>
    %752 = arith.mulf %750, %751 : vector<10x32xf32>
    %753 = vector.broadcast %734 : vector<1x32xf32> to vector<10x32xf32>
    %754 = arith.addf %752, %753 : vector<10x32xf32>
    %c0_315 = arith.constant 0 : index
    %c0_316 = arith.constant 0 : index
    %755 = vector.load %arg63[%c0_315, %c0_316] : memref<32x16xf32, #tpu.memory_space<vmem>>, vector<32x16xf32>
    %cst_317 = arith.constant dense<0.000000e+00> : vector<10x16xf32>
    %756 = tpu.matmul %754, %755, %cst_317 {dimension_numbers = #tpu.dot_dimension_numbers<[1], [0], [0], [1], [0, 0, 1, 1], [], []>} : vector<10x32xf32>, vector<32x16xf32>, vector<10x16xf32> -> vector<10x16xf32>
    %c0_318 = arith.constant 0 : index
    %c0_319 = arith.constant 0 : index
    %757 = vector.load %arg64[%c0_318, %c0_319] : memref<1x16xf32, #tpu.memory_space<vmem>>, vector<1x16xf32>
    %758 = vector.broadcast %757 : vector<1x16xf32> to vector<10x16xf32>
    %759 = arith.addf %756, %758 : vector<10x16xf32>
    %c0_320 = arith.constant 0 : index
    %c0_321 = arith.constant 0 : index
    %760 = vector.load %arg68[%c0_320, %c0_321] : memref<10x16xf32, #tpu.memory_space<vmem>>, vector<10x16xf32>
    tpu.vector_store %arg68[%c0_320, %c0_321], %759 {strides = array<i32>} : memref<10x16xf32, #tpu.memory_space<vmem>>, vector<10x16xf32>,
    %c0_322 = arith.constant 0 : index
    %c0_323 = arith.constant 0 : index
    %761 = vector.load %arg65[%c0_322, %c0_323] : memref<10x16xf32, #tpu.memory_space<vmem>>, vector<10x16xf32>
    %762 = arith.subf %759, %761 : vector<10x16xf32>
    %763 = arith.mulf %762, %762 : vector<10x16xf32>
    %cst_324 = arith.constant dense<0.000000e+00> : vector<10xf32>
    %764 = vector.multi_reduction <add>, %763, %cst_324 [1] : vector<10x16xf32> to vector<10xf32>
    %765 = vector.shape_cast %764 : vector<10xf32> to vector<10x1xf32>
    %cst_325 = arith.constant 1.600000e+01 : f32
    %766 = vector.broadcast %cst_325 : f32 to vector<10x1xf32>
    %767 = arith.divf %765, %766 : vector<10x1xf32>
    %c0_326 = arith.constant 0 : index
    %c0_327 = arith.constant 0 : index
    %768 = vector.load %arg66[%c0_326, %c0_327] : memref<10x1xf32, #tpu.memory_space<vmem>>, vector<10x1xf32>
    %769 = arith.mulf %767, %768 : vector<10x1xf32>
    %770 = vector.shape_cast %769 : vector<10x1xf32> to vector<1x10x1xf32>
    %cst_328 = arith.constant dense<0.000000e+00> : vector<1xf32>
    %771 = vector.multi_reduction <add>, %770, %cst_328 [1, 2] : vector<1x10x1xf32> to vector<1xf32>
    %772 = vector.shape_cast %771 : vector<1xf32> to vector<1x1x1xf32>
    %773 = vector.extract %772[0, 0, 0] : f32 from vector<1x1x1xf32>
    %774 = vector.broadcast %773 : f32 to vector<1x1xf32>
    %775 = vector.shape_cast %768 : vector<10x1xf32> to vector<1x10x1xf32>
    %cst_329 = arith.constant dense<0.000000e+00> : vector<1xf32>
    %776 = vector.multi_reduction <add>, %775, %cst_329 [1, 2] : vector<1x10x1xf32> to vector<1xf32>
    %777 = vector.shape_cast %776 : vector<1xf32> to vector<1x1x1xf32>
    %778 = vector.extract %777[0, 0, 0] : f32 from vector<1x1x1xf32>
    %779 = vector.broadcast %778 : f32 to vector<1x1xf32>
    %c0_330 = arith.constant 0 : index
    %c0_331 = arith.constant 0 : index
    %780 = vector.load %arg67[%c0_330, %c0_331] : memref<10x1xf32, #tpu.memory_space<vmem>>, vector<10x1xf32>
    %781 = arith.mulf %767, %780 : vector<10x1xf32>
    %782 = vector.shape_cast %781 : vector<10x1xf32> to vector<1x10x1xf32>
    %cst_332 = arith.constant dense<0.000000e+00> : vector<1xf32>
    %783 = vector.multi_reduction <add>, %782, %cst_332 [1, 2] : vector<1x10x1xf32> to vector<1xf32>
    %784 = vector.shape_cast %783 : vector<1xf32> to vector<1x1x1xf32>
    %785 = vector.extract %784[0, 0, 0] : f32 from vector<1x1x1xf32>
    %786 = vector.broadcast %785 : f32 to vector<1x1xf32>
    %cst_333 = arith.constant 0.000000e+00 : f32
    %787 = vector.broadcast %cst_333 : f32 to vector<1x1xf32>
    %788 = arith.cmpf oeq, %779, %787 : vector<1x1xf32>
    %cst_334 = arith.constant 1.000000e+00 : f32
    %789 = vector.broadcast %cst_334 : f32 to vector<1x1xf32>
    %790 = arith.select %788, %789, %779 : vector<1x1xi1>, vector<1x1xf32>
    %cst_335 = arith.constant 0.000000e+00 : f32
    %791 = vector.broadcast %cst_335 : f32 to vector<1x1xf32>
    %792 = arith.cmpf oeq, %779, %791 : vector<1x1xf32>
    %793 = arith.divf %774, %790 : vector<1x1xf32>
    %794 = arith.select %792, %786, %793 : vector<1x1xi1>, vector<1x1xf32>
    %c0_336 = arith.constant 0 : index
    %c0_337 = arith.constant 0 : index
    %795 = vector.load %arg69[%c0_336, %c0_337] : memref<1x1xf32, #tpu.memory_space<vmem>>, vector<1x1xf32>
    tpu.vector_store %arg69[%c0_336, %c0_337], %794 {strides = array<i32>} : memref<1x1xf32, #tpu.memory_space<vmem>>, vector<1x1xf32>,
    return
  }
}

</mosaic_0001>

<bundles_post_ra>
// kernel: tile.19
= control target key start
LH: loop header
LB: loop body
LE: loop exit
PB: predicated region body
PF: predicated region fallthrough
CT: control target
= control target key end

     0   :  { %vm3_vm0 = vcmask 261120   ;;  %s34_s0 = inlined_call_operand.vmem [shape: f32[2,5,32], index: 0, kind: input, shape index: {}]   ;;  %s35_s1 = inlined_call_operand.vmem [shape: f32[10,32], index: 1, kind: output, shape index: {}]  }
   0x1   :  { %v2_v0 = vld [vmem:[%s34_s0] sm:$0x1f]   ;;  %v10_v1 = vld [vmem:[%s34_s0 + $0x8] sm:$0x1f]  }
   0x2   :  { %4 = vst.msk [vmem:[%s35_s1] sm:$0x1f] %vm3_vm0, %v2_v0   ;;  %11 = vst.msk [vmem:[%s35_s1 + $0x5] sm:$0x1f] %vm3_vm0, %v10_v1  }

// kernel: mae_forward.1
= control target key start
LH: loop header
LB: loop body
LE: loop exit
PB: predicated region body
PF: predicated region fallthrough
CT: control target
= control target key end

     0   :  { %s8608_s6 = smov 1   ;;  %s8609_s10 = smov 2   ;;  %s9926_s0 = inlined_call_operand.smem [shape: u32[70], index: -1, kind: input, shape index: {}] }
   0x1   :  { %s8720_s5 = sld [smem:[%s9926_s0]]   ;;  %s8610_s14 = smov 3  }
   0x2   :  { %s8725_s9 = sld [smem:[%s9926_s0 + %s8608_s6]]   ;;  %s8611_s18 = smov 4  }
   0x3   :  { %s8730_s13 = sld [smem:[%s9926_s0 + %s8609_s10]]   ;;  %s8612_s22 = smov 5  }
   0x4   :  { %s8735_s17 = sld [smem:[%s9926_s0 + %s8610_s14]]   ;;  %s8613_s26 = smov 6  }
   0x5   :  { %s8740_s21 = sld [smem:[%s9926_s0 + %s8611_s18]]   ;;  %s8614_s30 = smov 7  }
   0x6   :  { %s8745_s25 = sld [smem:[%s9926_s0 + %s8612_s22]]   ;;  %s8615_s4 = smov 8  }
   0x7   :  { %9950 = sst [smem:[#allocation44_spill]] %s8720_s5  ;;  %s8616_s10 = smov 9  }
   0x8   :  { %9951 = sst [smem:[#allocation45_spill]] %s8725_s9  ;;  %s8617_s15 = smov 10  }
   0x9   :  { %9952 = sst [smem:[#allocation46_spill]] %s8730_s13  ;;  %s8618_s20 = smov 11  }
   0xa   :  { %9953 = sst [smem:[#allocation47_spill]] %s8735_s17  ;;  %s8620_s1 = smov 13  }
   0xb   :  { %9954 = sst [smem:[#allocation48_spill]] %s8740_s21  ;;  %s8621_s7 = smov 14  }
   0xc   :  { %9955 = sst [smem:[#allocation49_spill]] %s8745_s25  ;;  %s8623_s22 = smov 16  }
   0xd   :  { %s8750_s29 = sld [smem:[%s9926_s0 + %s8613_s26]]   ;;  %s8619_s26 = smov 12  }
   0xe   :  { %s8755_s3 = sld [smem:[%s9926_s0 + %s8614_s30]]   ;;  %s8624_s28 = smov 17  }
   0xf   :  { %s8760_s8 = sld [smem:[%s9926_s0 + %s8615_s4]]  }
  0x10   :  { %s8765_s14 = sld [smem:[%s9926_s0 + %s8616_s10]]  }
  0x11   :  { %s8770_s19 = sld [smem:[%s9926_s0 + %s8617_s15]]   ;;  %s8622_s15 = smov 15  }
  0x12   :  { %s8775_s24 = sld [smem:[%s9926_s0 + %s8618_s20]]  }
  0x13   :  { %9956 = sst [smem:[#allocation50_spill]] %s8750_s29 }
  0x14   :  { %9957 = sst [smem:[#allocation51_spill]] %s8755_s3 }
  0x15   :  { %9958 = sst [smem:[#allocation52_spill]] %s8760_s8 }
  0x16   :  { %9959 = sst [smem:[#allocation53_spill]] %s8765_s14 }
  0x17   :  { %9960 = sst [smem:[#allocation54_spill]] %s8770_s19 }
  0x18   :  { %9961 = sst [smem:[#allocation55_spill]] %s8775_s24 }
  0x19   :  { %s8780_s30 = sld [smem:[%s9926_s0 + %s8619_s26]]  }
  0x1a   :  { %s8785_s6 = sld [smem:[%s9926_s0 + %s8620_s1]]  }
  0x1b   :  { %s8790_s12 = sld [smem:[%s9926_s0 + %s8621_s7]]   ;;  %s8625_s7 = smov 18  }
  0x1c   :  { %s8795_s20 = sld [smem:[%s9926_s0 + %s8622_s15]]   ;;  %s8626_s15 = smov 19  }
  0x1d   :  { %s8800_s27 = sld [smem:[%s9926_s0 + %s8623_s22]]   ;;  %s8627_s22 = smov 20  }
  0x1e   :  { %s8805_s4 = sld [smem:[%s9926_s0 + %s8624_s28]]   ;;  %s8628_s28 = smov 21  }
  0x1f   :  { %9962 = sst [smem:[#allocation56_spill]] %s8780_s30 }
  0x20   :  { %9963 = sst [smem:[#allocation57_spill]] %s8785_s6 }
  0x21   :  { %9964 = sst [smem:[#allocation58_spill]] %s8790_s12 }
  0x22   :  { %9965 = sst [smem:[#allocation59_spill]] %s8795_s20 }
  0x23   :  { %9966 = sst [smem:[#allocation60_spill]] %s8800_s27 }
  0x24   :  { %9967 = sst [smem:[#allocation61_spill]] %s8805_s4 }
  0x25   :  { %s8810_s9 = sld [smem:[%s9926_s0 + %s8625_s7]]   ;;  %s8629_s7 = smov 22  }
  0x26   :  { %s8815_s12 = sld [smem:[%s9926_s0 + %s8626_s15]]   ;;  %s8630_s15 = smov 23  }
  0x27   :  { %s8820_s27 = sld [smem:[%s9926_s0 + %s8627_s22]]   ;;  %s8631_s22 = smov 24  }
  0x28   :  { %s8825_s4 = sld [smem:[%s9926_s0 + %s8628_s28]]   ;;  %s8632_s28 = smov 25  }
  0x2b   :  { %9968 = sst [smem:[#allocation62_spill]] %s8810_s9 }
  0x2c   :  { %9969 = sst [smem:[#allocation63_spill]] %s8815_s12 }
  0x2d   :  { %9970 = sst [smem:[#allocation64_spill]] %s8820_s27 }
  0x2e   :  { %9971 = sst [smem:[#allocation65_spill]] %s8825_s4 }
  0x2f   :  { %s8830_s9 = sld [smem:[%s9926_s0 + %s8629_s7]]   ;;  %s8633_s7 = smov 26  }
  0x30   :  { %s8835_s12 = sld [smem:[%s9926_s0 + %s8630_s15]]   ;;  %s8634_s15 = smov 27  }
  0x31   :  { %s8840_s27 = sld [smem:[%s9926_s0 + %s8631_s22]]   ;;  %s8635_s22 = smov 28  }
  0x32   :  { %s8845_s4 = sld [smem:[%s9926_s0 + %s8632_s28]]   ;;  %s8636_s28 = smov 29  }
  0x35   :  { %9972 = sst [smem:[#allocation66_spill]] %s8830_s9 }
  0x36   :  { %9973 = sst [smem:[#allocation67_spill]] %s8835_s12 }
  0x37   :  { %9974 = sst [smem:[#allocation68_spill]] %s8840_s27 }
  0x38   :  { %9975 = sst [smem:[#allocation69_spill]] %s8845_s4 }
  0x39   :  { %s8850_s9 = sld [smem:[%s9926_s0 + %s8633_s7]]   ;;  %s8637_s7 = smov 30  }
  0x3a   :  { %s8855_s12 = sld [smem:[%s9926_s0 + %s8634_s15]]   ;;  %s8638_s15 = smov 31  }
  0x3b   :  { %s8860_s27 = sld [smem:[%s9926_s0 + %s8635_s22]]   ;;  %s8639_s22 = smov 32  }
  0x3c   :  { %s8865_s4 = sld [smem:[%s9926_s0 + %s8636_s28]]   ;;  %s8640_s28 = smov 33  }
  0x3f   :  { %9976 = sst [smem:[#allocation70_spill]] %s8850_s9 }
  0x40   :  { %9977 = sst [smem:[#allocation71_spill]] %s8855_s12 }
  0x41   :  { %9978 = sst [smem:[#allocation72_spill]] %s8860_s27 }
  0x42   :  { %9979 = sst [smem:[#allocation73_spill]] %s8865_s4 }
  0x43   :  { %s8870_s9 = sld [smem:[%s9926_s0 + %s8637_s7]]   ;;  %s8641_s7 = smov 34  }
  0x44   :  { %s8875_s12 = sld [smem:[%s9926_s0 + %s8638_s15]]   ;;  %s8642_s15 = smov 35  }
  0x45   :  { %s8880_s27 = sld [smem:[%s9926_s0 + %s8639_s22]]   ;;  %s8643_s22 = smov 36  }
  0x46   :  { %s8885_s4 = sld [smem:[%s9926_s0 + %s8640_s28]]   ;;  %s8644_s28 = smov 37  }
  0x49   :  { %9980 = sst [smem:[#allocation74_spill]] %s8870_s9 }
  0x4a   :  { %9981 = sst [smem:[#allocation75_spill]] %s8875_s12 }
  0x4b   :  { %9982 = sst [smem:[#allocation76_spill]] %s8880_s27 }
  0x4c   :  { %9983 = sst [smem:[#allocation77_spill]] %s8885_s4 }
  0x4d   :  { %s8890_s9 = sld [smem:[%s9926_s0 + %s8641_s7]]   ;;  %s8645_s7 = smov 38  }
  0x4e   :  { %s8895_s12 = sld [smem:[%s9926_s0 + %s8642_s15]]   ;;  %s8646_s15 = smov 39  }
  0x4f   :  { %s8900_s27 = sld [smem:[%s9926_s0 + %s8643_s22]]   ;;  %s8647_s22 = smov 40  }
  0x50   :  { %s8905_s4 = sld [smem:[%s9926_s0 + %s8644_s28]]   ;;  %s8648_s28 = smov 41  }
  0x51   :  { %s8925_s6 = sld [smem:[%s9926_s0 + %s8648_s28]]   ;;  %s8652_s28 = smov 45  }
  0x53   :  { %9984 = sst [smem:[#allocation78_spill]] %s8890_s9 }
  0x54   :  { %9985 = sst [smem:[#allocation79_spill]] %s8895_s12 }
  0x55   :  { %9986 = sst [smem:[#allocation80_spill]] %s8900_s27 }
  0x56   :  { %s8910_s9 = sld [smem:[%s9926_s0 + %s8645_s7]]   ;;  %s8649_s7 = smov 42  }
  0x57   :  { %s8915_s12 = sld [smem:[%s9926_s0 + %s8646_s15]]   ;;  %s8650_s15 = smov 43  }
  0x58   :  { %s8920_s27 = sld [smem:[%s9926_s0 + %s8647_s22]]   ;;  %s8651_s22 = smov 44  }
  0x59   :  { %9988 = sst [smem:[#allocation82_spill]] %s8925_s6 }
  0x5a   :  { %s8930_s20 = sld [smem:[%s9926_s0 + %s8649_s7]]   ;;  %s8653_s7 = smov 46  }
  0x5b   :  { %s8940_s30 = sld [smem:[%s9926_s0 + %s8651_s22]]   ;;  %s8655_s22 = smov 48  }
  0x5c   :  { %s8945_s6 = sld [smem:[%s9926_s0 + %s8652_s28]]   ;;  %s8656_s28 = smov 49  }
  0x5d   :  { %9987 = sst [smem:[#allocation81_spill]] %s8915_s12 }
  0x5e   :  { %s8935_s12 = sld [smem:[%s9926_s0 + %s8650_s15]]   ;;  %s8654_s15 = smov 47  }
  0x5f   :  { %s8950_s24 = sld [smem:[%s9926_s0 + %s8653_s7]]   ;;  %s8657_s7 = smov 50  }
  0x60   :  { %s8955_s19 = sld [smem:[%s9926_s0 + %s8654_s15]]   ;;  %s8658_s15 = smov 51  }
  0x61   :  { %s8960_s8 = sld [smem:[%s9926_s0 + %s8655_s22]]   ;;  %s8659_s22 = smov 52  }
  0x62   :  { %9989 = sst [smem:[#allocation83_spill]] %s8945_s6 }
  0x63   :  { %s8965_s6 = sld [smem:[%s9926_s0 + %s8656_s28]]   ;;  %s8660_s28 = smov 53  }
  0x64   :  { %s8970_s3 = sld [smem:[%s9926_s0 + %s8657_s7]]   ;;  %s8661_s7 = smov 54  }
  0x65   :  { %s8980_s14 = sld [smem:[%s9926_s0 + %s8659_s22]]   ;;  %s8663_s22 = smov 56  }
  0x66   :  { %9990 = sst [smem:[#allocation84_spill]] %s8955_s19 }
  0x67   :  { %s8975_s19 = sld [smem:[%s9926_s0 + %s8658_s15]]   ;;  %s8662_s15 = smov 55  }
  0x68   :  { %s8985_s21 = sld [smem:[%s9926_s0 + %s8660_s28]]   ;;  %s8664_s28 = smov 57  }
  0x69   :  { %s8990_s17 = sld [smem:[%s9926_s0 + %s8661_s7]]   ;;  %s8665_s7 = smov 58  }
  0x6a   :  { %s9000_s29 = sld [smem:[%s9926_s0 + %s8663_s22]]   ;;  %s8667_s22 = smov 60  }
  0x6b   :  { %9992 = sst [smem:[#allocation86_spill]] %s8980_s14 }
  0x6c   :  { %s9010_s5 = sld [smem:[%s9926_s0 + %s8665_s7]]   ;;  %s8669_s7 = smov 62  }
  0x6d   :  { %9991 = sst [smem:[#allocation85_spill]] %s8975_s19 }
  0x6e   :  { %9993 = sst [smem:[#allocation87_spill]] %s8985_s21 }
  0x6f   :  { %s8995_s19 = sld [smem:[%s9926_s0 + %s8662_s15]]   ;;  %s8666_s15 = smov 59  }
  0x70   :  { %s9005_s21 = sld [smem:[%s9926_s0 + %s8664_s28]]   ;;  %s8668_s28 = smov 61  }
  0x71   :  { %s9015_s13 = sld [smem:[%s9926_s0 + %s8666_s15]]   ;;  %s8670_s15 = smov 63  }
  0x72   :  { %9996 = sst [smem:[#allocation90_spill]] %s9010_s5 }
  0x73   :  { %s9020_s25 = sld [smem:[%s9926_s0 + %s8667_s22]]   ;;  %s8671_s22 = smov 64  }
  0x74   :  { %s9030_s5 = sld [smem:[%s9926_s0 + %s8669_s7]]   ;;  %s8673_s7 = smov 66  }
  0x75   :  { %9994 = sst [smem:[#allocation88_spill]] %s8995_s19 }
  0x76   :  { %9995 = sst [smem:[#allocation89_spill]] %s9005_s21 }
  0x77   :  { %9997 = sst [smem:[#allocation91_spill]] %s9015_s13 }
  0x78   :  { %s9025_s21 = sld [smem:[%s9926_s0 + %s8668_s28]]   ;;  %s8672_s28 = smov 65  }
  0x79   :  { %s9035_s13 = sld [smem:[%s9926_s0 + %s8670_s15]]   ;;  %s8674_s15 = smov 67  }
  0x7a   :  { %s9040_s19 = sld [smem:[%s9926_s0 + %s8671_s22]]   ;;  %s8675_s22 = smov 68  }
  0x7b   :  { %s9050_s14 = sld [smem:[%s9926_s0 + %s8673_s7]]  }
  0x7e   :  { %9998 = sst [smem:[#allocation92_spill]] %s9025_s21 }
  0x7f   :  { %9999 = sst [smem:[#allocation93_spill]] %s9035_s13 }
  0x80   :  { %10000 = sst [smem:[#allocation94_spill]] %s9040_s19 }
  0x81   :  { %s9045_s21 = sld [smem:[%s9926_s0 + %s8672_s28]]   ;;  %s8676_s28 = smov 69  }
  0x82   :  { %s9055_s13 = sld [smem:[%s9926_s0 + %s8674_s15]]  }
  0x83   :  { %s9060_s19 = sld [smem:[%s9926_s0 + %s8675_s22]]  }
  0x87   :  { %10001 = sst [smem:[#allocation95_spill]] %s9045_s21 }
  0x88   :  { %s9065_s21 = sld [smem:[%s9926_s0 + %s8676_s28]]  }
  0x89   :  { %145 = vsyncpa [#allocation3], 0 }
  0x8a   :  { %146 = vsyncpa [#allocation6], 0 }
  0x8b   :  { %147 = vsyncpa [#allocation9], 0 }
  0x8c   :  { %148 = vsyncpa [#allocation12], 0 }
  0x8d   :  { %149 = vsyncpa [#allocation15], 0 }
  0x8e   :  { %150 = vsyncpa [#allocation18], 0 }
  0x8f   :  { %151 = vsyncpa [#allocation21], 0 }
  0x90   :  { %152 = vsyncpa [#allocation24], 0 }
  0x91   :  { %153 = vsyncpa [#allocation27], 0 }
  0x92   :  { %154 = vsyncpa [#allocation30], 0 }
  0x93   :  { %155 = vsyncpa [#allocation4], 0  ;;  %s8677_s7 = smov [#allocation5]   ;;  %s8678_s11 = smov [#allocation8]  }
  0x94   :  { %s246_s10 = sshll.u32 %s8677_s7, 4  ;;  %s270_s15 = sshll.u32 %s8678_s11, 4  ;;  %s247_s10 = int_to_ptr.vmem [resolvable:$true] %s246_s10  ;;  %s271_s15 = int_to_ptr.vmem [resolvable:$true] %s270_s15 }
  0x95   :  { %s8194_s16 = scalar_lea.vmem %s247_s10, 16  ;;  %s8198_s0 = scalar_lea.vmem %s247_s10, 32 }
  0x96   :  { %p8195_p0 = scmp.ne.s32.totalorder %s247_s10, %s8194_s16  ;;  %p8199_p1 = scmp.lt.s32.totalorder %s247_s10, %s247_s10 }
  0x97   :  { %p8200_p2 = scmp.lt.s32.totalorder %s8198_s0, %s8194_s16 }
  0x99   :  { %p8201_p3 = por %p8200_p2, %p8199_p1 }
  0x9b   :  { %p8202_p4 = pnand %p8201_p3, %p8195_p0 }
  0x9d   :  { %8205 = shalt.err (!%p8202_p4)
}
  0x9e   :  { %249 = dma.hbm_to_vmem [thread:$0]  %s8910_s9, 16, %s247_s10, [#allocation6]  }
  0x9f   :  { %s8214_s18 = scalar_lea.vmem %s271_s15, 16  ;;  %s8218_s22 = scalar_lea.vmem %s271_s15, 32 }
  0xa0   :  { %p8215_p5 = scmp.ne.s32.totalorder %s271_s15, %s8214_s18  ;;  %p8219_p6 = scmp.lt.s32.totalorder %s271_s15, %s271_s15 }
  0xa1   :  { %p8220_p7 = scmp.lt.s32.totalorder %s8218_s22, %s8214_s18 }
  0xa3   :  { %p8221_p8 = por %p8220_p7, %p8219_p6 }
  0xa5   :  { %p8222_p9 = pnand %p8221_p8, %p8215_p5 }
  0xa7   :  { %8225 = shalt.err (!%p8222_p9)
}
  0xa8   :  { %273 = dma.hbm_to_vmem [thread:$0]  %s8930_s20, 16, %s271_s15, [#allocation9]  }
  0xa9   :  { %s8679_s23 = smov [#allocation11]   ;;  %s8680_s28 = smov [#allocation14]  }
  0xaa   :  { %s290_s26 = sshll.u32 %s8679_s23, 4  ;;  %s314_s1 = sshll.u32 %s8680_s28, 4  ;;  %s291_s26 = int_to_ptr.vmem [resolvable:$true] %s290_s26  ;;  %s315_s1 = int_to_ptr.vmem [resolvable:$true] %s314_s1 }
  0xab   :  { %s8234_s2 = scalar_lea.vmem %s291_s26, 16  ;;  %s8238_s7 = scalar_lea.vmem %s291_s26, 32 }
  0xac   :  { %p8235_p10 = scmp.ne.s32.totalorder %s291_s26, %s8234_s2  ;;  %p8239_p11 = scmp.lt.s32.totalorder %s291_s26, %s291_s26 }
  0xad   :  { %p8240_p12 = scmp.lt.s32.totalorder %s8238_s7, %s8234_s2 }
  0xaf   :  { %p8241_p13 = por %p8240_p12, %p8239_p11 }
  0xb1   :  { %p8242_p0 = pnand %p8241_p13, %p8235_p10 }
  0xb3   :  { %8245 = shalt.err (!%p8242_p0)
}
  0xb4   :  { %293 = dma.hbm_to_vmem [thread:$0]  %s8940_s30, 16, %s291_s26, [#allocation12]  }
  0xb5   :  { %s8254_s9 = scalar_lea.vmem %s315_s1, 16  ;;  %s8258_s10 = scalar_lea.vmem %s315_s1, 32 }
  0xb6   :  { %p8255_p1 = scmp.ne.s32.totalorder %s315_s1, %s8254_s9  ;;  %p8259_p2 = scmp.lt.s32.totalorder %s315_s1, %s315_s1 }
  0xb7   :  { %p8260_p3 = scmp.lt.s32.totalorder %s8258_s10, %s8254_s9 }
  0xb9   :  { %p8261_p4 = por %p8260_p3, %p8259_p2 }
  0xbb   :  { %p8262_p5 = pnand %p8261_p4, %p8255_p1 }
  0xbd   :  { %8265 = shalt.err (!%p8262_p5)
}
  0xbe   :  { %317 = dma.hbm_to_vmem [thread:$0]  %s8960_s8, 16, %s315_s1, [#allocation15]  }
  0xbf   :  { %s8681_s20 = smov [#allocation17]   ;;  %s8682_s15 = smov [#allocation20]  }
  0xc0   :  { %s334_s11 = sshll.u32 %s8681_s20, 4  ;;  %s358_s16 = sshll.u32 %s8682_s15, 4  ;;  %s335_s11 = int_to_ptr.vmem [resolvable:$true] %s334_s11  ;;  %s359_s16 = int_to_ptr.vmem [resolvable:$true] %s358_s16 }
  0xc1   :  { %s8274_s0 = scalar_lea.vmem %s335_s11, 16  ;;  %s8278_s18 = scalar_lea.vmem %s335_s11, 32 }
  0xc2   :  { %p8275_p6 = scmp.ne.s32.totalorder %s335_s11, %s8274_s0  ;;  %p8279_p7 = scmp.lt.s32.totalorder %s335_s11, %s335_s11 }
  0xc3   :  { %p8280_p8 = scmp.lt.s32.totalorder %s8278_s18, %s8274_s0 }
  0xc5   :  { %p8281_p9 = por %p8280_p8, %p8279_p7 }
  0xc7   :  { %p8282_p10 = pnand %p8281_p9, %p8275_p6 }
  0xc9   :  { %8285 = shalt.err (!%p8282_p10)
}
  0xca   :  { %337 = dma.hbm_to_vmem [thread:$0]  %s8970_s3, 16, %s335_s11, [#allocation18]  }
  0xcb   :  { %s8294_s30 = scalar_lea.vmem %s359_s16, 16  ;;  %s8298_s22 = scalar_lea.vmem %s359_s16, 32 }
  0xcc   :  { %p8295_p11 = scmp.ne.s32.totalorder %s359_s16, %s8294_s30  ;;  %p8299_p12 = scmp.lt.s32.totalorder %s359_s16, %s359_s16 }
  0xcd   :  { %p8300_p13 = scmp.lt.s32.totalorder %s8298_s22, %s8294_s30 }
  0xcf   :  { %p8301_p0 = por %p8300_p13, %p8299_p12 }
  0xd1   :  { %p8302_p1 = pnand %p8301_p0, %p8295_p11 }
  0xd3   :  { %8305 = shalt.err (!%p8302_p1)
}
  0xd4   :  { %361 = dma.hbm_to_vmem [thread:$0]  %s8990_s17, 16, %s359_s16, [#allocation21]  }
  0xd5   :  { %s8683_s8 = smov [#allocation23]   ;;  %s8684_s26 = smov [#allocation26]  }
  0xd6   :  { %s378_s23 = sshll.u32 %s8683_s8, 4  ;;  %s402_s28 = sshll.u32 %s8684_s26, 4  ;;  %s379_s23 = int_to_ptr.vmem [resolvable:$true] %s378_s23  ;;  %s403_s28 = int_to_ptr.vmem [resolvable:$true] %s402_s28 }
  0xd7   :  { %s8314_s1 = scalar_lea.vmem %s379_s23, 16  ;;  %s8318_s2 = scalar_lea.vmem %s379_s23, 32 }
  0xd8   :  { %p8315_p2 = scmp.ne.s32.totalorder %s379_s23, %s8314_s1  ;;  %p8319_p3 = scmp.lt.s32.totalorder %s379_s23, %s379_s23 }
  0xd9   :  { %p8320_p4 = scmp.lt.s32.totalorder %s8318_s2, %s8314_s1 }
  0xdb   :  { %p8321_p5 = por %p8320_p4, %p8319_p3 }
  0xdd   :  { %p8322_p6 = pnand %p8321_p5, %p8315_p2 }
  0xdf   :  { %8325 = shalt.err (!%p8322_p6)
}
  0xe0   :  { %381 = dma.hbm_to_vmem [thread:$0]  %s9000_s29, 16, %s379_s23, [#allocation24]  }
  0xe1   :  { %s8334_s3 = scalar_lea.vmem %s403_s28, 16  ;;  %s8338_s7 = scalar_lea.vmem %s403_s28, 32 }
  0xe2   :  { %p8335_p7 = scmp.ne.s32.totalorder %s403_s28, %s8334_s3  ;;  %p8339_p8 = scmp.lt.s32.totalorder %s403_s28, %s403_s28 }
  0xe3   :  { %p8340_p9 = scmp.lt.s32.totalorder %s8338_s7, %s8334_s3 }
  0xe5   :  { %p8341_p10 = por %p8340_p9, %p8339_p8 }
  0xe7   :  { %p8342_p11 = pnand %p8341_p10, %p8335_p7 }
  0xe9   :  { %8345 = shalt.err (!%p8342_p11)
}
  0xea   :  { %405 = dma.hbm_to_vmem [thread:$0]  %s9020_s25, 16, %s403_s28, [#allocation27]  }
  0xeb   :  { %s8685_s17 = smov [#allocation29]   ;;  %s8686_s10 = smov [#allocation2]  }
  0xec   :  { %s422_s9 = sshll.u32 %s8685_s17, 4  ;;  %s236_s20 = sshll.u32 %s8686_s10, 4  ;;  %s423_s9 = int_to_ptr.vmem [resolvable:$true] %s422_s9  ;;  %s237_s20 = int_to_ptr.vmem [resolvable:$true] %s236_s20 }
  0xed   :  { %s8354_s11 = scalar_lea.vmem %s423_s9, 16  ;;  %s8358_s15 = scalar_lea.vmem %s423_s9, 32 }
  0xee   :  { %p8355_p12 = scmp.ne.s32.totalorder %s423_s9, %s8354_s11  ;;  %p8359_p13 = scmp.lt.s32.totalorder %s423_s9, %s423_s9 }
  0xef   :  { %p8360_p0 = scmp.lt.s32.totalorder %s8358_s15, %s8354_s11 }
  0xf1   :  { %p8361_p1 = por %p8360_p0, %p8359_p13 }
  0xf3   :  { %p8362_p2 = pnand %p8361_p1, %p8355_p12 }
  0xf5   :  { %8365 = shalt.err (!%p8362_p2)
}
  0xf6   :  { %425 = dma.hbm_to_vmem [thread:$0]  %s9030_s5, 16, %s423_s9, [#allocation30]  }
  0xf7   :  { %s8374_s29 = scalar_lea.vmem %s237_s20, 16  ;;  %s8378_s16 = scalar_lea.vmem %s237_s20, 32 }
  0xf8   :  { %p8375_p3 = scmp.ne.s32.totalorder %s237_s20, %s8374_s29  ;;  %p8379_p4 = scmp.lt.s32.totalorder %s237_s20, %s237_s20 }
  0xf9   :  { %p8380_p5 = scmp.lt.s32.totalorder %s8378_s16, %s8374_s29 }
  0xfb   :  { %p8381_p6 = por %p8380_p5, %p8379_p4 }
  0xfd   :  { %p8382_p7 = pnand %p8381_p6, %p8375_p3 }
  0xff   :  { %8385 = shalt.err (!%p8382_p7)
}
 0x100   :  { %239 = dma.hbm_to_vmem [thread:$0]  %s8905_s4, 16, %s237_s20, [#allocation3]  }
 0x101   :  { %s8687_s25 = smov [#allocation7]   ;;  %s8688_s18 = smov [#allocation10]  }
 0x102   :  { %s258_s0 = sshll.u32 %s8687_s25, 4  ;;  %s280_s30 = sshll.u32 %s8688_s18, 4  ;;  %s259_s0 = int_to_ptr.vmem [resolvable:$true] %s258_s0  ;;  %s281_s30 = int_to_ptr.vmem [resolvable:$true] %s280_s30 }
 0x103   :  { %s8394_s22 = scalar_lea.vmem %s259_s0, 16  ;;  %s8398_s8 = scalar_lea.vmem %s259_s0, 32 }
 0x104   :  { %p8395_p8 = scmp.ne.s32.totalorder %s259_s0, %s8394_s22  ;;  %p8399_p9 = scmp.lt.s32.totalorder %s259_s0, %s259_s0 }
 0x105   :  { %p8400_p10 = scmp.lt.s32.totalorder %s8398_s8, %s8394_s22 }
 0x107   :  { %p8401_p11 = por %p8400_p10, %p8399_p9 }
 0x109   :  { %p8402_p12 = pnand %p8401_p11, %p8395_p8 }
 0x10b   :  { %8405 = shalt.err (!%p8402_p12)
}
 0x10c   :  { %261 = dma.hbm_to_vmem [thread:$0]  %s8920_s27, 16, %s259_s0, [#allocation6]  }
 0x10d   :  { %s8414_s5 = scalar_lea.vmem %s281_s30, 16  ;;  %s8418_s23 = scalar_lea.vmem %s281_s30, 32 }
 0x10e   :  { %p8415_p13 = scmp.ne.s32.totalorder %s281_s30, %s8414_s5  ;;  %p8419_p0 = scmp.lt.s32.totalorder %s281_s30, %s281_s30 }
 0x10f   :  { %p8420_p1 = scmp.lt.s32.totalorder %s8418_s23, %s8414_s5 }
 0x111   :  { %p8421_p2 = por %p8420_p1, %p8419_p0 }
 0x113   :  { %p8422_p3 = pnand %p8421_p2, %p8415_p13 }
 0x115   :  { %8425 = shalt.err (!%p8422_p3)
}
 0x116   :  { %283 = dma.hbm_to_vmem [thread:$0]  %s8935_s12, 16, %s281_s30, [#allocation9]  }
 0x117   :  { %s8689_s4 = smov [#allocation13]   ;;  %s8690_s28 = smov [#allocation16]  }
 0x118   :  { %s302_s26 = sshll.u32 %s8689_s4, 4  ;;  %s324_s1 = sshll.u32 %s8690_s28, 4  ;;  %s303_s26 = int_to_ptr.vmem [resolvable:$true] %s302_s26  ;;  %s325_s1 = int_to_ptr.vmem [resolvable:$true] %s324_s1 }
 0x119   :  { %s8434_s2 = scalar_lea.vmem %s303_s26, 16  ;;  %s8438_s3 = scalar_lea.vmem %s303_s26, 32 }
 0x11a   :  { %p8435_p4 = scmp.ne.s32.totalorder %s303_s26, %s8434_s2  ;;  %p8439_p5 = scmp.lt.s32.totalorder %s303_s26, %s303_s26 }
 0x11b   :  { %p8440_p6 = scmp.lt.s32.totalorder %s8438_s3, %s8434_s2 }
 0x11d   :  { %p8441_p7 = por %p8440_p6, %p8439_p5 }
 0x11f   :  { %p8442_p8 = pnand %p8441_p7, %p8435_p4 }
 0x121   :  { %8445 = shalt.err (!%p8442_p8)
}
 0x122   :  { %305 = dma.hbm_to_vmem [thread:$0]  %s8950_s24, 16, %s303_s26, [#allocation12]  }
 0x123   :  { %s8454_s27 = scalar_lea.vmem %s325_s1, 16  ;;  %s8458_s7 = scalar_lea.vmem %s325_s1, 32 }
 0x124   :  { %p8455_p9 = scmp.ne.s32.totalorder %s325_s1, %s8454_s27  ;;  %p8459_p10 = scmp.lt.s32.totalorder %s325_s1, %s325_s1 }
 0x125   :  { %p8460_p11 = scmp.lt.s32.totalorder %s8458_s7, %s8454_s27 }
 0x127   :  { %p8461_p12 = por %p8460_p11, %p8459_p10 }
 0x129   :  { %p8462_p13 = pnand %p8461_p12, %p8455_p9 }
 0x12b   :  { %8465 = shalt.err (!%p8462_p13)
}
 0x12c   :  { %327 = dma.hbm_to_vmem [thread:$0]  %s8965_s6, 16, %s325_s1, [#allocation15]  }
 0x12d   :  { %s8691_s12 = smov [#allocation19]   ;;  %s8692_s9 = smov [#allocation22]  }
 0x12e   :  { %s346_s17 = sshll.u32 %s8691_s12, 4  ;;  %s368_s10 = sshll.u32 %s8692_s9, 4  ;;  %s347_s17 = int_to_ptr.vmem [resolvable:$true] %s346_s17  ;;  %s369_s10 = int_to_ptr.vmem [resolvable:$true] %s368_s10 }
 0x12f   :  { %s8474_s20 = scalar_lea.vmem %s347_s17, 16  ;;  %s8478_s11 = scalar_lea.vmem %s347_s17, 32 }
 0x130   :  { %p8475_p0 = scmp.ne.s32.totalorder %s347_s17, %s8474_s20  ;;  %p8479_p1 = scmp.lt.s32.totalorder %s347_s17, %s347_s17 }
 0x131   :  { %p8480_p2 = scmp.lt.s32.totalorder %s8478_s11, %s8474_s20 }
 0x133   :  { %p8481_p3 = por %p8480_p2, %p8479_p1 }
 0x135   :  { %p8482_p4 = pnand %p8481_p3, %p8475_p0 }
 0x137   :  { %8485 = shalt.err (!%p8482_p4)
}
 0x138   :  { %s10002_s24 = sld [smem:[#allocation86_spill]]  ;;  %s8494_s15 = scalar_lea.vmem %s369_s10, 16 }
 0x139   :  { %p8495_p5 = scmp.ne.s32.totalorder %s369_s10, %s8494_s15  ;;  %s8498_s29 = scalar_lea.vmem %s369_s10, 32 }
 0x13a   :  { %p8499_p6 = scmp.lt.s32.totalorder %s369_s10, %s369_s10  ;;  %p8500_p7 = scmp.lt.s32.totalorder %s8498_s29, %s8494_s15 }
 0x13c   :  { %p8501_p8 = por %p8500_p7, %p8499_p6 }
 0x13e   :  { %349 = dma.hbm_to_vmem [thread:$0]  %s10002_s24, 16, %s347_s17, [#allocation18]  }
 0x13f   :  { %p8502_p9 = pnand %p8501_p8, %p8495_p5 }
 0x141   :  { %8505 = shalt.err (!%p8502_p9)
}
 0x142   :  { %s10003_s6 = sld [smem:[#allocation88_spill]]  ;;  %s8693_s16 = smov [#allocation25]  }
 0x143   :  { %s390_s25 = sshll.u32 %s8693_s16, 4  ;;  %s8694_s0 = smov [#allocation28]   ;;  %s391_s25 = int_to_ptr.vmem [resolvable:$true] %s390_s25 }
 0x144   :  { %s412_s18 = sshll.u32 %s8694_s0, 4  ;;  %s8514_s30 = scalar_lea.vmem %s391_s25, 16  ;;  %s413_s18 = int_to_ptr.vmem [resolvable:$true] %s412_s18 }
 0x145   :  { %p8515_p10 = scmp.ne.s32.totalorder %s391_s25, %s8514_s30  ;;  %s8518_s22 = scalar_lea.vmem %s391_s25, 32 }
 0x146   :  { %p8519_p11 = scmp.lt.s32.totalorder %s391_s25, %s391_s25  ;;  %p8520_p12 = scmp.lt.s32.totalorder %s8518_s22, %s8514_s30 }
 0x148   :  { %371 = dma.hbm_to_vmem [thread:$0]  %s10003_s6, 16, %s369_s10, [#allocation21]  }
 0x149   :  { %p8521_p13 = por %p8520_p12, %p8519_p11 }
 0x14b   :  { %p8522_p0 = pnand %p8521_p13, %p8515_p10 }
 0x14d   :  { %8525 = shalt.err (!%p8522_p0)
}
 0x14e   :  { %s10004_s8 = sld [smem:[#allocation90_spill]]  ;;  %s8534_s5 = scalar_lea.vmem %s413_s18, 16 }
 0x14f   :  { %p8535_p1 = scmp.ne.s32.totalorder %s413_s18, %s8534_s5  ;;  %s8538_s23 = scalar_lea.vmem %s413_s18, 32 }
 0x150   :  { %p8539_p2 = scmp.lt.s32.totalorder %s413_s18, %s413_s18  ;;  %p8540_p3 = scmp.lt.s32.totalorder %s8538_s23, %s8534_s5 }
 0x152   :  { %p8541_p4 = por %p8540_p3, %p8539_p2 }
 0x154   :  { %393 = dma.hbm_to_vmem [thread:$0]  %s10004_s8, 16, %s391_s25, [#allocation24]  }
 0x155   :  { %p8542_p5 = pnand %p8541_p4, %p8535_p1 }
 0x157   :  { %8545 = shalt.err (!%p8542_p5)
}
 0x158   :  { %s10005_s4 = sld [smem:[#allocation92_spill]]  ;;  %s8695_s26 = smov [#allocation31]  }
 0x159   :  { %s434_s28 = sshll.u32 %s8695_s26, 4  ;;  %s435_s28 = int_to_ptr.vmem [resolvable:$true] %s434_s28 }
 0x15a   :  { %s8554_s1 = scalar_lea.vmem %s435_s28, 16  ;;  %s8558_s2 = scalar_lea.vmem %s435_s28, 32 }
 0x15b   :  { %p8555_p6 = scmp.ne.s32.totalorder %s435_s28, %s8554_s1  ;;  %p8559_p7 = scmp.lt.s32.totalorder %s435_s28, %s435_s28 }
 0x15c   :  { %p8560_p8 = scmp.lt.s32.totalorder %s8558_s2, %s8554_s1 }
 0x15e   :  { %415 = dma.hbm_to_vmem [thread:$0]  %s10005_s4, 16, %s413_s18, [#allocation27]  }
 0x15f   :  { %p8561_p9 = por %p8560_p8, %p8559_p7 }
 0x161   :  { %p8562_p10 = pnand %p8561_p9, %p8555_p6 }
 0x163   :  { %8565 = shalt.err (!%p8562_p10)
}
 0x164   :  { %s10006_s3 = sld [smem:[#allocation94_spill]] }
 0x16a   :  { %437 = dma.hbm_to_vmem [thread:$0]  %s10006_s3, 16, %s435_s28, [#allocation30]  }
 0x16b   :  { %8586 = dma.done.wait [#allocation3], 16  }
 0x16c   :  { %8587 = vsyncadd [#allocation3], 4294967280 }
 0x16d   :  { %8588 = dma.done.wait [#allocation6], 32  }
 0x16e   :  { %8589 = vsyncadd [#allocation6], 4294967264 }
 0x16f   :  { %8590 = dma.done.wait [#allocation9], 32  }
 0x170   :  { %8591 = vsyncadd [#allocation9], 4294967264 }
 0x171   :  { %8592 = dma.done.wait [#allocation12], 32  }
 0x172   :  { %8593 = vsyncadd [#allocation12], 4294967264 }
 0x173   :  { %8594 = dma.done.wait [#allocation15], 32  }
 0x174   :  { %8595 = vsyncadd [#allocation15], 4294967264 }
 0x175   :  { %8596 = dma.done.wait [#allocation18], 32  }
 0x176   :  { %8597 = vsyncadd [#allocation18], 4294967264 }
 0x177   :  { %8598 = dma.done.wait [#allocation21], 32  }
 0x178   :  { %8599 = vsyncadd [#allocation21], 4294967264 }
 0x179   :  { %8600 = dma.done.wait [#allocation24], 32  }
 0x17a   :  { %8601 = vsyncadd [#allocation24], 4294967264 }
 0x17b   :  { %8602 = dma.done.wait [#allocation27], 32  }
 0x17c   :  { %8603 = vsyncadd [#allocation27], 4294967264 }
 0x17d   :  { %8604 = dma.done.wait [#allocation30], 32  }
 0x17e   :  { %8605 = vsyncadd [#allocation30], 4294967264  ;;  %s10007_s27 = sld [smem:[#allocation49_spill]]  ;;  %v8696_v0 = vmov 0.0   ;;  %vm8697_vm0 = vmmov 0   ;;  %v8698_v1 = vmov 0   ;;  %v588_v7 = vlaneseq }
 0x17f   :  { %s10008_s7 = sld [smem:[#allocation46_spill]]  ;;  %7390 = vmatprep.subr.mxu0 %v8696_v0  ;;  %7394 = vmatprep.mubr.msk.f32.mxu0 %vm8697_vm0, %v8696_v0  ;;  %vm9949_vm1 = vcmask 130048   ;;  %vm610_vm4 = vcmask 64512   ;;  %vm704_vm5 = vcmask 259072   ;;  %vm744_vm6 = vcmask 261120   ;;  %s8699_s29 = smov 88  }
 0x180   :  { %s10009_s12 = sld [smem:[#allocation44_spill]]  ;;  %8039 = vset.pattern.permute.xlu0 %v8698_v1  ;;  %7397 = vmatprep.subr.mxu1 %v8696_v0  ;;  %v9103_v8 = vand.u32 127, %v588_v7  ;;  %s8700_s6 = smov 96   ;;  %v9154_v49 = vshrl.u32 %v588_v7, 7  ;;  %v8702_v50 = vmov -1e+09  }
 0x181   :  { %7399 = vmatprep.mubr.msk.f32.mxu1 %vm8697_vm0, %v8696_v0  ;;  %8040 = vset.pattern.permute.xlu1 %v8698_v1  ;;  %s10010_s17 = sld [smem:[#allocation50_spill]]  ;;  %s8701_s16 = smov 120  }
 0x182   :  { %s10011_s9 = sld [smem:[#allocation47_spill]]  ;;  %vm696_vm7 = vcmp.ge.s32.totalorder %v9103_v8, 3  ;;  %vm697_vm8 = vcmp.lt.s32.totalorder %v9103_v8, 6  ;;  %vm693_vm9 = vcmp.ge.s32.totalorder %v9154_v49, 3  ;;  %vm694_vm10 = vcmp.lt.s32.totalorder %v9154_v49, 6  ;;  %s8703_s25 = smov 56  }
 0x183   :  { %s10012_s10 = sld [smem:[#allocation48_spill]]  ;;  %vm687_vm11 = vcmp.lt.s32.totalorder %v9154_v49, 3  ;;  %vm690_vm12 = vcmp.lt.s32.totalorder %v9103_v8, 3  ;;  %vm698_vm13 = vmand %vm696_vm7, %vm697_vm8  ;;  %s8704_s0 = smov 112   ;;  %vm917_vm7 = vcmask 1045504   ;;  %vm913_vm8 = vcmask 48128  }
 0x184   :  { %v503_v2 = vld [vmem:[%s10007_s27 + $0x8] sm:$0xff]  ;;  %v502_v3 = vld [vmem:[%s10007_s27] sm:$0xff]  ;;  %s10013_s20 = sld [smem:[#allocation53_spill]]  ;;  %vm695_vm14 = vmand %vm693_vm9, %vm694_vm10  ;;  %s8705_s18 = smov 64  }
 0x185   :  { %7391 = vmatpush3.msra.mxu0 %v503_v2  ;;  %v501_v4 = vld [vmem:[%s10008_s7] sm:$0xff]  ;;  %s10014_s11 = sld [smem:[#allocation51_spill]]  ;;  %vm692_vm15 = vmand %vm687_vm11, %vm690_vm12  ;;  %s8706_s30 = smov 80   ;;  %vm3558_vm11 = vcmp.ge.s32.totalorder %v9103_v8, 5  ;;  %vm3559_vm12 = vcmp.lt.s32.totalorder %v9103_v8, 10 }
 0x186   :  { %v587_v5 = vld [vmem:[%s10009_s12] sm:$0x3f]  ;;  %7392 = vmatprep.subr.mxu0 %v8696_v0  ;;  %s10015_s24 = sld [smem:[#allocation52_spill]]  ;;  %s8707_s8 = smov 48  }
 0x187   :  { %591 = vperm.xlu0 %8039, %v587_v5   ;;  %vm595_vm2 = vcmp.lt.s32.totalorder %v587_v5, 0  ;;  %7393 = vmatpush3.msra.mxu0 %v502_v3  ;;  %v6948_v9 = vld [vmem:[%s10010_s17] ss:$0 sm:$0xff]  ;;  %s10016_s15 = sld [smem:[#allocation54_spill]]  ;;  %s8708_s5 = smov 104  }
 0x188   :  { %v596_v6 = vsel %vm595_vm2, 1.0, %v8696_v0  ;;  %7395 = vmatmul.mubr.msk.f32.vlgmr.msra.gmra.mxu0 %vm9949_vm1, %v501_v4  ;;  %7402 = vmatprep.subr.mxu0 %v8696_v0  ;;  %v585_v12 = vld [vmem:[%s10011_s9] sm:$0xff]  ;;  %vm699_vm2 = vmand %vm695_vm14, %vm698_vm13  ;;  %vm899_vm1 = vcmask 46080   ;;  %s10017_s22 = sld [smem:[#allocation55_spill]]  ;;  %s8709_s23 = smov 72   ;;  %vm3544_vm13 = vcmp.lt.s32.totalorder %v9154_v49, 5 }
 0x189   :  { %7410 = vmatprep.mubr.msk.f32.mxu0 %vm8697_vm0, %v8696_v0  ;;  %v6950_v17 = vld [vmem:[%s10012_s10] ss:$0 sm:$0xff]  ;;  %s8710_s4 = smov 40   ;;  %s10018_s26 = sld [smem:[#allocation56_spill]]  ;;  %vm3548_vm14 = vcmp.lt.s32.totalorder %v9103_v8, 5 }
 0x18a   :  { %v736_v29 = vld [vmem:[%s10013_s20 + $0x18] sm:$0xff]  ;;  %v735_v30 = vld [vmem:[%s10013_s20 + $0x10] sm:$0xff]  ;;  %v734_v31 = vld [vmem:[%s10013_s20 + $0x8] sm:$0xff]  ;;  %s10019_s28 = sld [smem:[#allocation59_spill]] }
 0x18b   :  { %600 = vperm.xlu0 %8039, %v596_v6   ;;  %7403 = vmatpush3.msra.mxu0 %v736_v29  ;;  %v733_v32 = vld [vmem:[%s10013_s20] sm:$0xff]  ;;  %s10020_s1 = sld [smem:[#allocation57_spill]] }
 0x18c   :  { %7404 = vmatprep.subr.mxu0 %v8696_v0  ;;  %v6952_v37 = vld [vmem:[%s10014_s11] ss:$0 sm:$0xff]  ;;  %s10021_s2 = sld [smem:[#allocation58_spill]] }
 0x18d   :  { %7405 = vmatpush3.msra.mxu0 %v735_v30  ;;  %v6953_v39 = vld [vmem:[%s10015_s24] ss:$0 sm:$0xff]  ;;  %s10022_s3 = sld [smem:[#allocation61_spill]] }
 0x18e   :  { %7406 = vmatprep.subr.mxu0 %v8696_v0  ;;  %v6954_v42 = vld [vmem:[%s10016_s15] ss:$0 sm:$0xff]  ;;  %s10023_s27 = sld [smem:[#allocation60_spill]] }
 0x18f   :  { %7407 = vmatpush3.msra.mxu0 %v734_v31  ;;  %s10024_s7 = sld [smem:[#allocation62_spill]] }
 0x190   :  { %7408 = vmatprep.subr.mxu0 %v8696_v0  ;;  %s10025_s12 = sld [smem:[#allocation65_spill]] }
 0x191   :  { %7409 = vmatpush3.msra.mxu0 %v733_v32  ;;  %s10026_s17 = sld [smem:[#allocation63_spill]] }
 0x192   :  { %7413 = vmatprep.subr.mxu0 %v8696_v0  ;;  %s10027_s9 = sld [smem:[#allocation64_spill]] }
 0x193   :  { %s10028_s10 = sld [smem:[#allocation66_spill]] }
 0x194   :  { %s10029_s20 = sld [smem:[#allocation67_spill]] }
 0x195   :  { %s10030_s11 = sld [smem:[#allocation45_spill]] }
 0x196   :  { %s10031_s24 = sld [smem:[#allocation68_spill]] }
 0x197   :  { %s10032_s15 = sld [smem:[#allocation71_spill]] }
 0x202   :  { %v592_v10 = vpop.permute.xlu0 %591 }
 0x203   :  { %vm593_vm3 = vcmp.eq.s32.totalorder %v9103_v8, %v592_v10 }
 0x204   :  { %v594_v15 = vsel %vm593_vm3, 1.0, %v8696_v0  ;;  %vm700_vm3 = vmor %vm692_vm15, %vm699_vm2  ;;  %vm3552_vm2 = vcmp.ge.s32.totalorder %v9154_v49, 5 }
 0x205   :  { %v9163_v51 = vsel %vm700_vm3, 0.0, %v8702_v50  ;;  %vm3560_vm15 = vmand %vm3558_vm11, %vm3559_vm12  ;;  %vm3832_vm11 = vcmask 1041408   ;;  %vm6801_vm12 = vcmask 1024  }
 0x206   :  { %v601_v18 = vpop.permute.xlu0 %600 }
 0x207   :  { %v609_v19 = vmul.f32 %v6950_v17, %v601_v18  ;;  %v819_v17 = vld [vmem:[%s10017_s22 + $0x8] sm:$0xff] }
 0x248   :  { %v581_v11 = vpop.f32.mrf.mxu0 }
 0x249   :  { %v582_v13 = vadd.f32 %v6948_v9, %v581_v11 }
 0x24a   :  { %v7396_v14 = vpop.f32.mrf.mxu0 }
 0x24b   :  { %v586_v16 = vadd.f32 %v585_v12, %v582_v13 }
 0x24d   :  { %7398 = vmatpush3.msra.mxu1 %v586_v16  ;;  %v818_v16 = vld [vmem:[%s10017_s22] sm:$0xff] }
 0x24e   :  { %7400 = vmatmul.mubr.msk.f32.vlgmr.msra.gmra.mxu1 %vm610_vm4, %v594_v15  ;;  %7423 = vmatprep.subr.mxu1 %v8696_v0 }
 0x24f   :  { %7425 = vmatprep.mubr.msk.f32.mxu1 %vm8697_vm0, %v8696_v0 }
 0x30e   :  { %v680_v20 = vpop.f32.mrf.mxu1 }
 0x30f   :  { %v9114_v21 = vadd.f32 %v680_v20, %v609_v19 }
 0x310   :  { %v7401_v22 = vpop.f32.mrf.mxu1 }
 0x311   :  { %v705_v23 = vsel %vm704_vm5, %v9114_v21, 0.0 }
 0x312   :  { %706 = vadd.xlane.f32.xlu1 %v705_v23 }
 0x39b   :  { %v707_v24 = vpop.xlane.xlu1 %706 }
 0x39c   :  { %v709_v25 = vmul.f32 0.03125, %v707_v24 }
 0x39e   :  { %v710_v26 = vsub.f32 %v9114_v21, %v709_v25 }
 0x3a0   :  { %v711_v27 = vmul.f32 %v710_v26, %v710_v26 }
 0x3a2   :  { %v712_v28 = vsel %vm704_vm5, %v711_v27, 0.0 }
 0x3a3   :  { %713 = vadd.xlane.f32.xlu1 %v712_v28 }
 0x42c   :  { %v714_v33 = vpop.xlane.xlu1 %713 }
 0x42d   :  { %v715_v34 = vmul.f32 0.03125, %v714_v33 }
 0x42f   :  { %v716_v35 = vadd.f32 1e-05, %v715_v34 }
 0x431   :  { %8046 = vrsqrt.f32 %v716_v35 }
 0x43e   :  { %v8047_v36 = vpop.eup %8046 }
 0x43f   :  { %v718_v38 = vmul.f32 %v8047_v36, %v710_v26 }
 0x441   :  { %v725_v40 = vmul.f32 %v6952_v37, %v718_v38 }
 0x443   :  { %v732_v41 = vadd.f32 %v6953_v39, %v725_v40 }
 0x445   :  { %7411 = vmatmul.mubr.msk.f32.vlgmr.msra.gmra.mxu0 %vm744_vm6, %v732_v41 }
 0x446   :  { %7415 = vmatprep.mubr.msk.f32.mxu0 %vm8697_vm0, %v8696_v0 }
 0x505   :  { %v814_v43 = vpop.f32.mrf.mxu0 }
 0x506   :  { %v9134_v44 = vadd.f32 %v6954_v42, %v814_v43 }
 0x507   :  { %v7412_v45 = vpop.f32.mrf.mxu0 }
 0x508   :  { %992 = vrot.lane.b32.xlu1 %v9134_v44, %s8699_s29  ;;  %823 = vrot.lane.b32.xlu0 %v9134_v44, %s8700_s6 }
 0x50c   :  { %990 = vrot.lane.b32.xlu0 %v9134_v44, %s8701_s16 }
 0x57a   :  { %v993_v46 = vpop.permute.xlu1 %992  ;;  %v824_v47 = vpop.permute.xlu0 %823 }
 0x57b   :  { %7414 = vmatpush3.xpose.msk.msra.mxu0 %vm610_vm4, %v824_v47  ;;  %7424 = vmatpush3.xpose.msk.msra.mxu1 %vm610_vm4, %v993_v46  ;;  %v820_v46 = vld [vmem:[%s10017_s22 + $0x10] sm:$0xff] }
 0x57c   :  { %7418 = vmatprep.subr.mxu0 %v8696_v0  ;;  %7433 = vmatprep.subr.mxu1 %v8696_v0 }
 0x57e   :  { %7416 = vmatmul.mubr.msk.f32.vlgmr.msra.gmra.mxu0 %vm610_vm4, %v9134_v44  ;;  %v991_v48 = vpop.permute.xlu0 %990 }
 0x57f   :  { %7426 = vmatmul.mubr.msk.f32.vlgmr.msra.gmra.mxu1 %vm610_vm4, %v991_v48  ;;  %7420 = vmatprep.mubr.msk.f32.mxu0 %vm8697_vm0, %v8696_v0 }
 0x580   :  { %7435 = vmatprep.mubr.msk.f32.mxu1 %vm8697_vm0, %v8696_v0  ;;  %7434 = vmatpush3.msra.mxu1 %v819_v17 }
 0x581   :  { %7443 = vmatprep.subr.mxu1 %v8696_v0 }
 0x63e   :  { %v895_v52 = vpop.f32.mrf.mxu0 }
 0x63f   :  { %v896_v53 = vadd.f32 %v895_v52, %v9163_v51  ;;  %v1064_v54 = vpop.f32.mrf.mxu1 }
 0x640   :  { %v1065_v55 = vadd.f32 %v1064_v54, %v9163_v51  ;;  %v7417_v56 = vpop.f32.mrf.mxu0 }
 0x641   :  { %v7427_v57 = vpop.f32.mrf.mxu1  ;;  %v900_v58 = vsel %vm899_vm1, %v896_v53, -inf }
 0x642   :  { %901 = vmax.xlane.f32.xlu0 %v900_v58  ;;  %v1068_v59 = vsel %vm899_vm1, %v1065_v55, -inf }
 0x643   :  { %1069 = vmax.xlane.f32.xlu1 %v1068_v59 }
 0x654   :  { %1079 = vrot.lane.b32.xlu1 %v9134_v44, %s8703_s25 }
 0x658   :  { %1302 = vrot.lane.b32.xlu1 %v9134_v44, %s8704_s0 }
 0x6cb   :  { %v902_v60 = vpop.xlane.xlu0 %901 }
 0x6cc   :  { %v903_v61 = vsub.f32 %v896_v53, %v902_v60  ;;  %v1070_v62 = vpop.xlane.xlu1 %1069 }
 0x6cd   :  { %v1071_v63 = vsub.f32 %v1065_v55, %v1070_v62 }
 0x6ce   :  { %v904_v1 = vmul.f32 1.442695, %v903_v61 }
 0x6cf   :  { %v1072_v2 = vmul.f32 1.442695, %v1071_v63 }
 0x6d0   :  { %8048 = vpow2.f32 %v904_v1  ;;  %v1080_v13 = vpop.permute.xlu1 %1079 }
 0x6d1   :  { %8050 = vpow2.f32 %v1072_v2 }
 0x6d4   :  { %v1303_v24 = vpop.permute.xlu1 %1302 }
 0x6dd   :  { %v8049_v3 = vpop.eup %8048 }
 0x6de   :  { %v906_v4 = vsel %vm899_vm1, %v8049_v3, 0.0  ;;  %v8051_v5 = vpop.eup %8050 }
 0x6df   :  { %907 = vadd.xlane.f32.xlu0 %v906_v4  ;;  %v1074_v6 = vsel %vm899_vm1, %v8051_v5, 0.0 }
 0x6e3   :  { %1075 = vadd.xlane.f32.xlu0 %v1074_v6 }
 0x6f9   :  { %911 = vrot.lane.b32.xlu0 %v9134_v44, %s8705_s18 }
 0x6fd   :  { %1304 = vrot.lane.b32.xlu0 %v9134_v44, %s8706_s30 }
 0x768   :  { %v908_v7 = vpop.xlane.xlu0 %907 }
 0x769   :  { %8052 = vrcp.f32 %v908_v7 }
 0x76c   :  { %v1076_v9 = vpop.xlane.xlu0 %1075 }
 0x76d   :  { %8054 = vrcp.f32 %v1076_v9 }
 0x770   :  { %v912_v10 = vpop.permute.xlu0 %911 }
 0x771   :  { %7419 = vmatpush3.msk.msra.mxu0 %vm917_vm7, %v912_v10  ;;  %v6976_v10 = vld [vmem:[%s10018_s26] ss:$0 sm:$0xff]  ;;  %s10034_s26 = sld [smem:[#allocation70_spill]] }
 0x772   :  { %7428 = vmatprep.subr.mxu0 %v8696_v0 }
 0x774   :  { %v1305_v22 = vpop.permute.xlu0 %1304 }
 0x776   :  { %v8053_v11 = vpop.eup %8052 }
 0x777   :  { %v910_v12 = vmul.f32 %v8053_v11, %v8049_v3 }
 0x779   :  { %7421 = vmatmul.mubr.msk.f32.vlgmr.msra.gmra.mxu0 %vm913_vm8, %v910_v12 }
 0x77a   :  { %v8055_v14 = vpop.eup %8054  ;;  %7429 = vmatpush3.msk.msra.mxu0 %vm917_vm7, %v1080_v13  ;;  %7430 = vmatprep.mubr.msk.f32.mxu0 %vm8697_vm0, %v8696_v0 }
 0x77b   :  { %v1078_v15 = vmul.f32 %v8055_v14, %v8051_v5  ;;  %7438 = vmatprep.subr.mxu0 %v8696_v0  ;;  %v821_v5 = vld [vmem:[%s10017_s22 + $0x18] sm:$0xff]  ;;  %s10033_s22 = sld [smem:[#allocation69_spill]] }
 0x77d   :  { %7431 = vmatmul.mubr.msk.f32.vlgmr.msra.gmra.mxu0 %vm913_vm8, %v1078_v15 }
 0x77e   :  { %7440 = vmatprep.mubr.msk.f32.mxu0 %vm8697_vm0, %v8696_v0  ;;  %7439 = vmatpush3.msra.mxu0 %v818_v16 }
 0x77f   :  { %7448 = vmatprep.subr.mxu0 %v8696_v0 }
 0x839   :  { %v986_v18 = vpop.f32.mrf.mxu0 }
 0x83a   :  { %7441 = vmatmul.mubr.msk.f32.vlgmr.msra.gmra.mxu0 %vm610_vm4, %v986_v18 }
 0x83b   :  { %v7422_v19 = vpop.f32.mrf.mxu0  ;;  %7450 = vmatprep.mubr.msk.f32.mxu0 %vm8697_vm0, %v8696_v0 }
 0x83d   :  { %v1152_v20 = vpop.f32.mrf.mxu0 }
 0x83e   :  { %7436 = vmatmul.mubr.msk.f32.vlgmr.msra.gmra.mxu1 %vm610_vm4, %v1152_v20  ;;  %v1823_v20 = vld [vmem:[%s10019_s28 + $0x18] sm:$0xff] }
 0x83f   :  { %7444 = vmatpush3.xpose.msk.msra.mxu1 %vm610_vm4, %v1305_v22  ;;  %v7432_v23 = vpop.f32.mrf.mxu0  ;;  %7445 = vmatprep.mubr.msk.f32.mxu1 %vm8697_vm0, %v8696_v0  ;;  %v1822_v22 = vld [vmem:[%s10019_s28 + $0x10] sm:$0xff] }
 0x840   :  { %7453 = vmatprep.subr.mxu1 %v8696_v0  ;;  %v1820_v23 = vld [vmem:[%s10019_s28] sm:$0xff] }
 0x842   :  { %7446 = vmatmul.mubr.msk.f32.vlgmr.msra.gmra.mxu1 %vm610_vm4, %v1303_v24 }
 0x843   :  { %7455 = vmatprep.mubr.msk.f32.mxu1 %vm8697_vm0, %v8696_v0  ;;  %7454 = vmatpush3.msra.mxu1 %v820_v46  ;;  %v1916_v46 = vld [vmem:[%s10022_s3 + $0x18] sm:$0xff] }
 0x844   :  { %7463 = vmatprep.subr.mxu1 %v8696_v0 }
 0x8fa   :  { %v1298_v25 = vpop.f32.mrf.mxu0 }
 0x8fc   :  { %v7442_v26 = vpop.f32.mrf.mxu0 }
 0x8fe   :  { %v1225_v27 = vpop.f32.mrf.mxu1 }
 0x8ff   :  { %v1299_v28 = vadd.f32 %v1298_v25, %v1225_v27 }
 0x900   :  { %v7437_v29 = vpop.f32.mrf.mxu1 }
 0x902   :  { %v1376_v30 = vpop.f32.mrf.mxu1 }
 0x903   :  { %v1377_v31 = vadd.f32 %v1376_v30, %v9163_v51  ;;  %v6978_v30 = vld [vmem:[%s10021_s2] ss:$0 sm:$0xff]  ;;  %s10037_s2 = sld [smem:[#allocation74_spill]] }
 0x904   :  { %v7447_v32 = vpop.f32.mrf.mxu1 }
 0x905   :  { %v1380_v33 = vsel %vm899_vm1, %v1377_v31, -inf }
 0x906   :  { %1381 = vmax.xlane.f32.xlu0 %v1380_v33  ;;  %v1928_v33 = vld [vmem:[%s10022_s3 + $0x78] sm:$0xff] }
 0x91c   :  { %1391 = vrot.lane.b32.xlu0 %v9134_v44, %s8707_s8 }
 0x920   :  { %1542 = vrot.lane.b32.xlu0 %v9134_v44, %s8708_s5 }
 0x98f   :  { %v1382_v34 = vpop.xlane.xlu0 %1381 }
 0x990   :  { %v1383_v35 = vsub.f32 %v1377_v31, %v1382_v34  ;;  %v1927_v34 = vld [vmem:[%s10022_s3 + $0x70] sm:$0xff] }
 0x992   :  { %v1384_v36 = vmul.f32 1.442695, %v1383_v35  ;;  %v1926_v35 = vld [vmem:[%s10022_s3 + $0x68] sm:$0xff] }
 0x993   :  { %v1392_v37 = vpop.permute.xlu0 %1391 }
 0x994   :  { %8056 = vpow2.f32 %v1384_v36  ;;  %7449 = vmatpush3.msk.msra.mxu0 %vm917_vm7, %v1392_v37  ;;  %v1925_v36 = vld [vmem:[%s10022_s3 + $0x60] sm:$0xff]  ;;  %v1924_v37 = vld [vmem:[%s10022_s3 + $0x58] sm:$0xff] }
 0x995   :  { %7458 = vmatprep.subr.mxu0 %v8696_v0 }
 0x997   :  { %v1543_v45 = vpop.permute.xlu0 %1542 }
 0x9a1   :  { %v8057_v38 = vpop.eup %8056 }
 0x9a2   :  { %v1386_v39 = vsel %vm899_vm1, %v8057_v38, 0.0 }
 0x9a3   :  { %1387 = vadd.xlane.f32.xlu1 %v1386_v39  ;;  %v1922_v39 = vld [vmem:[%s10022_s3 + $0x48] sm:$0xff] }
 0x9b4   :  { %1544 = vrot.lane.b32.xlu1 %v9134_v44, %s8709_s23 }
 0xa2c   :  { %v1388_v40 = vpop.xlane.xlu1 %1387 }
 0xa2d   :  { %8058 = vrcp.f32 %v1388_v40  ;;  %v1921_v40 = vld [vmem:[%s10022_s3 + $0x40] sm:$0xff] }
 0xa30   :  { %v1545_v43 = vpop.permute.xlu1 %1544 }
 0xa3a   :  { %v8059_v41 = vpop.eup %8058 }
 0xa3b   :  { %v1390_v42 = vmul.f32 %v8059_v41, %v8057_v38  ;;  %v1923_v38 = vld [vmem:[%s10022_s3 + $0x50] sm:$0xff]  ;;  %v1920_v41 = vld [vmem:[%s10022_s3 + $0x38] sm:$0xff] }
 0xa3d   :  { %7451 = vmatmul.mubr.msk.f32.vlgmr.msra.gmra.mxu0 %vm913_vm8, %v1390_v42  ;;  %v1919_v42 = vld [vmem:[%s10022_s3 + $0x30] sm:$0xff] }
 0xa3e   :  { %7459 = vmatpush3.xpose.msk.msra.mxu0 %vm610_vm4, %v1545_v43  ;;  %7460 = vmatprep.mubr.msk.f32.mxu0 %vm8697_vm0, %v8696_v0  ;;  %v1918_v43 = vld [vmem:[%s10022_s3 + $0x28] sm:$0xff] }
 0xa3f   :  { %7468 = vmatprep.subr.mxu0 %v8696_v0 }
 0xa41   :  { %7461 = vmatmul.mubr.msk.f32.vlgmr.msra.gmra.mxu0 %vm610_vm4, %v1543_v45  ;;  %v1917_v45 = vld [vmem:[%s10022_s3 + $0x20] sm:$0xff] }
 0xa42   :  { %7470 = vmatprep.mubr.msk.f32.mxu0 %vm8697_vm0, %v8696_v0  ;;  %7469 = vmatpush3.msra.mxu0 %v821_v5 }
 0xa43   :  { %7484 = vmatprep.subr.mxu0 %v8696_v0 }
 0xafd   :  { %v1464_v47 = vpop.f32.mrf.mxu0 }
 0xafe   :  { %7456 = vmatmul.mubr.msk.f32.vlgmr.msra.gmra.mxu1 %vm610_vm4, %v1464_v47  ;;  %v1915_v47 = vld [vmem:[%s10022_s3 + $0x10] sm:$0xff] }
 0xaff   :  { %v7452_v48 = vpop.f32.mrf.mxu0  ;;  %7465 = vmatprep.mubr.msk.f32.mxu1 %vm8697_vm0, %v8696_v0 }
 0xb00   :  { %v1914_v48 = vld [vmem:[%s10022_s3 + $0x8] sm:$0xff] }
 0xb01   :  { %v1616_v52 = vpop.f32.mrf.mxu0 }
 0xb02   :  { %v1617_v53 = vadd.f32 %v1616_v52, %v9163_v51  ;;  %v1913_v52 = vld [vmem:[%s10022_s3] sm:$0xff]  ;;  %s10038_s3 = sld [smem:[#allocation77_spill]] }
 0xb03   :  { %v7462_v54 = vpop.f32.mrf.mxu0 }
 0xb04   :  { %v1620_v55 = vsel %vm899_vm1, %v1617_v53, -inf }
 0xb05   :  { %1621 = vmax.xlane.f32.xlu1 %v1620_v55 }
 0xb8e   :  { %v1622_v56 = vpop.xlane.xlu1 %1621 }
 0xb8f   :  { %v1623_v57 = vsub.f32 %v1617_v53, %v1622_v56  ;;  %v6979_v53 = vld [vmem:[%s10023_s27] ss:$0 sm:$0xff]  ;;  %s10039_s27 = sld [smem:[#allocation75_spill]] }
 0xb91   :  { %v1624_v58 = vmul.f32 1.442695, %v1623_v57 }
 0xb93   :  { %8060 = vpow2.f32 %v1624_v58 }
 0xba0   :  { %v8061_v59 = vpop.eup %8060 }
 0xba1   :  { %v1626_v60 = vsel %vm899_vm1, %v8061_v59, 0.0 }
 0xba2   :  { %1627 = vadd.xlane.f32.xlu0 %v1626_v60 }
 0xbb8   :  { %1631 = vrot.lane.b32.xlu0 %v9134_v44, %s8710_s4 }
 0xbbe   :  { %v1537_v61 = vpop.f32.mrf.mxu1 }
 0xbbf   :  { %v1541_v62 = vadd.f32 %v1537_v61, %v1299_v28  ;;  %v6977_v28 = vld [vmem:[%s10020_s1] ss:$0 sm:$0xff]  ;;  %s10036_s1 = sld [smem:[#allocation72_spill]] }
 0xbc0   :  { %v7457_v63 = vpop.f32.mrf.mxu1 }
 0xc2b   :  { %v1628_v1 = vpop.xlane.xlu0 %1627 }
 0xc2c   :  { %8062 = vrcp.f32 %v1628_v1 }
 0xc2f   :  { %v1632_v2 = vpop.permute.xlu0 %1631 }
 0xc30   :  { %7464 = vmatpush3.msk.msra.mxu1 %vm917_vm7, %v1632_v2 }
 0xc31   :  { %7473 = vmatprep.subr.mxu1 %v8696_v0 }
 0xc39   :  { %v8063_v3 = vpop.eup %8062 }
 0xc3a   :  { %v1630_v4 = vmul.f32 %v8063_v3, %v8061_v59  ;;  %v6981_v3 = vld [vmem:[%s10024_s7] ss:$0 sm:$0xff]  ;;  %s10040_s7 = sld [smem:[#allocation76_spill]] }
 0xc3c   :  { %7466 = vmatmul.mubr.msk.f32.vlgmr.msra.gmra.mxu1 %vm913_vm8, %v1630_v4 }
 0xc3d   :  { %7481 = vmatprep.mubr.msk.f32.mxu1 %vm8697_vm0, %v8696_v0  ;;  %7474 = vmatpush3.msra.mxu1 %v1823_v20 }
 0xc3e   :  { %7475 = vmatprep.subr.mxu1 %v8696_v0 }
 0xc3f   :  { %7476 = vmatpush3.msra.mxu1 %v1822_v22 }
 0xc40   :  { %7477 = vmatprep.subr.mxu1 %v8696_v0 }
 0xcfc   :  { %v1704_v44 = vpop.f32.mrf.mxu1 }
 0xcfd   :  { %7471 = vmatmul.mubr.msk.f32.vlgmr.msra.gmra.mxu0 %vm610_vm4, %v1704_v44 }
 0xcfe   :  { %v7467_v6 = vpop.f32.mrf.mxu1  ;;  %7516 = vmatprep.mubr.msk.f32.mxu0 %vm8697_vm0, %v8696_v0  ;;  %7485 = vmatpush3.msra.mxu0 %v1928_v33 }
 0xcff   :  { %7486 = vmatprep.subr.mxu0 %v8696_v0 }
 0xd00   :  { %7487 = vmatpush3.msra.mxu0 %v1927_v34 }
 0xd01   :  { %7488 = vmatprep.subr.mxu0 %v8696_v0 }
 0xd02   :  { %7489 = vmatpush3.msra.mxu0 %v1926_v35 }
 0xd03   :  { %7490 = vmatprep.subr.mxu0 %v8696_v0 }
 0xd04   :  { %7491 = vmatpush3.msra.mxu0 %v1925_v36 }
 0xd05   :  { %7492 = vmatprep.subr.mxu0 %v8696_v0 }
 0xd06   :  { %7493 = vmatpush3.msra.mxu0 %v1924_v37 }
 0xd07   :  { %7494 = vmatprep.subr.mxu0 %v8696_v0 }
 0xd08   :  { %7495 = vmatpush3.msra.mxu0 %v1923_v38 }
 0xd09   :  { %7496 = vmatprep.subr.mxu0 %v8696_v0 }
 0xd0a   :  { %7497 = vmatpush3.msra.mxu0 %v1922_v39 }
 0xd0b   :  { %7498 = vmatprep.subr.mxu0 %v8696_v0 }
 0xd0c   :  { %7499 = vmatpush3.msra.mxu0 %v1921_v40 }
 0xd0d   :  { %7500 = vmatprep.subr.mxu0 %v8696_v0 }
 0xd0e   :  { %7501 = vmatpush3.msra.mxu0 %v1920_v41 }
 0xd0f   :  { %7502 = vmatprep.subr.mxu0 %v8696_v0 }
 0xd10   :  { %7503 = vmatpush3.msra.mxu0 %v1919_v42 }
 0xd11   :  { %7504 = vmatprep.subr.mxu0 %v8696_v0 }
 0xd12   :  { %7505 = vmatpush3.msra.mxu0 %v1918_v43 }
 0xd13   :  { %7506 = vmatprep.subr.mxu0 %v8696_v0 }
 0xd14   :  { %7507 = vmatpush3.msra.mxu0 %v1917_v45 }
 0xd15   :  { %7508 = vmatprep.subr.mxu0 %v8696_v0 }
 0xd16   :  { %7509 = vmatpush3.msra.mxu0 %v1916_v46 }
 0xd17   :  { %7510 = vmatprep.subr.mxu0 %v8696_v0 }
 0xd18   :  { %7511 = vmatpush3.msra.mxu0 %v1915_v47 }
 0xd19   :  { %7512 = vmatprep.subr.mxu0 %v8696_v0 }
 0xd1a   :  { %7513 = vmatpush3.msra.mxu0 %v1914_v48  ;;  %v2120_v48 = vld [vmem:[%s10029_s20] sm:$0xff] }
 0xd1b   :  { %7514 = vmatprep.subr.mxu0 %v8696_v0 }
 0xd1c   :  { %7515 = vmatpush3.msra.mxu0 %v1913_v52 }
 0xd1d   :  { %7555 = vmatprep.subr.mxu0 %v8696_v0 }
 0xdbd   :  { %v1777_v7 = vpop.f32.mrf.mxu0 }
 0xdbe   :  { %v1781_v9 = vadd.f32 %v1777_v7, %v1541_v62 }
 0xdbf   :  { %v7472_v11 = vpop.f32.mrf.mxu0 }
 0xdc0   :  { %v1782_v12 = vadd.f32 %v1781_v9, %v9114_v21  ;;  %v1821_v21 = vld [vmem:[%s10019_s28 + $0x8] sm:$0xff]  ;;  %s10035_s28 = sld [smem:[#allocation73_spill]] }
 0xdc1   :  { %7478 = vmatpush3.msra.mxu1 %v1821_v21  ;;  %v6982_v21 = vld [vmem:[%s10026_s17] ss:$0 sm:$0xff]  ;;  %s10042_s17 = sld [smem:[#allocation79_spill]] }
 0xdc2   :  { %v9245_v13 = vadd.f32 %v6976_v10, %v1782_v12  ;;  %7479 = vmatprep.subr.mxu1 %v8696_v0 }
 0xdc3   :  { %7480 = vmatpush3.msra.mxu1 %v1820_v23 }
 0xdc4   :  { %v1793_v14 = vsel %vm704_vm5, %v9245_v13, 0.0  ;;  %7519 = vmatprep.subr.mxu1 %v8696_v0 }
 0xdc5   :  { %1794 = vadd.xlane.f32.xlu1 %v1793_v14 }
 0xe4e   :  { %v1795_v15 = vpop.xlane.xlu1 %1794 }
 0xe4f   :  { %v1796_v16 = vmul.f32 0.03125, %v1795_v15  ;;  %v2039_v15 = vld [vmem:[%s10025_s12 + $0x18] sm:$0xff] }
 0xe51   :  { %v1797_v17 = vsub.f32 %v9245_v13, %v1796_v16  ;;  %v2038_v16 = vld [vmem:[%s10025_s12 + $0x10] sm:$0xff] }
 0xe53   :  { %v1798_v18 = vmul.f32 %v1797_v17, %v1797_v17 }
 0xe55   :  { %v1799_v19 = vsel %vm704_vm5, %v1798_v18, 0.0 }
 0xe56   :  { %1800 = vadd.xlane.f32.xlu1 %v1799_v19 }
 0xedf   :  { %v1801_v24 = vpop.xlane.xlu1 %1800 }
 0xee0   :  { %v1802_v25 = vmul.f32 0.03125, %v1801_v24  ;;  %v6983_v24 = vld [vmem:[%s10027_s9] ss:$0 sm:$0xff]  ;;  %s10043_s9 = sld [smem:[#allocation80_spill]] }
 0xee2   :  { %v1803_v26 = vadd.f32 1e-05, %v1802_v25 }
 0xee4   :  { %8064 = vrsqrt.f32 %v1803_v26 }
 0xef1   :  { %v8065_v27 = vpop.eup %8064 }
 0xef2   :  { %v1805_v29 = vmul.f32 %v8065_v27, %v1797_v17  ;;  %v2036_v17 = vld [vmem:[%s10025_s12] sm:$0xff] }
 0xef3   :  { %v6984_v27 = vld [vmem:[%s10028_s10] ss:$0 sm:$0xff]  ;;  %s10044_s10 = sld [smem:[#allocation81_spill]] }
 0xef4   :  { %v1812_v31 = vmul.f32 %v6977_v28, %v1805_v29 }
 0xef6   :  { %v1819_v32 = vadd.f32 %v6978_v30, %v1812_v31 }
 0xef8   :  { %7482 = vmatmul.mubr.msk.f32.vlgmr.msra.gmra.mxu1 %vm744_vm6, %v1819_v32 }
 0xef9   :  { %7527 = vmatprep.mubr.msk.f32.mxu1 %vm8697_vm0, %v8696_v0  ;;  %7520 = vmatpush3.msra.mxu1 %v2039_v15 }
 0xefa   :  { %7521 = vmatprep.subr.mxu1 %v8696_v0 }
 0xefb   :  { %7522 = vmatpush3.msra.mxu1 %v2038_v16 }
 0xefc   :  { %7523 = vmatprep.subr.mxu1 %v8696_v0 }
 0xfb8   :  { %v1900_v54 = vpop.f32.mrf.mxu1 }
 0xfb9   :  { %v1901_v55 = vadd.f32 %v6979_v53, %v1900_v54 }
 0xfba   :  { %v7483_v56 = vpop.f32.mrf.mxu1 }
 0xfbb   :  { %v1905_v57 = vmul.f32 0.044715, %v1901_v55  ;;  %v1904_v63 = vmul.f32 0.5, %v1901_v55 }
 0xfbd   :  { %v1906_v58 = vmul.f32 %v1905_v57, %v1901_v55 }
 0xfbf   :  { %v1907_v59 = vmul.f32 %v1906_v58, %v1901_v55 }
 0xfc1   :  { %v1908_v60 = vadd.f32 %v1907_v59, %v1901_v55 }
 0xfc3   :  { %v1909_v61 = vmul.f32 0.7978846, %v1908_v60 }
 0xfc5   :  { %8066 = vtanh.f32 %v1909_v61 }
 0xfd2   :  { %v8067_v62 = vpop.eup %8066 }
 0xfd3   :  { %v1911_v1 = vadd.f32 1.0, %v8067_v62 }
 0xfd5   :  { %v1912_v2 = vmul.f32 %v1911_v1, %v1904_v63 }
 0xfd7   :  { %7517 = vmatmul.mubr.f32.vlgmr.msra.gmra.mxu0 %v1912_v2 }
 0xfd8   :  { %7557 = vmatprep.mubr.msk.f32.mxu0 %vm8697_vm0, %v8696_v0  ;;  %7556 = vmatpush3.msra.mxu0 %v2120_v48 }
 0xfd9   :  { %7565 = vmatprep.subr.mxu0 %v8696_v0 }
0x1097   :  { %v2002_v4 = vpop.f32.mrf.mxu0 }
0x1098   :  { %v2003_v5 = vadd.f32 %v6981_v3, %v2002_v4 }
0x1099   :  { %v7518_v44 = vpop.f32.mrf.mxu0 }
0x109a   :  { %v9301_v6 = vadd.f32 %v2003_v5, %v9245_v13  ;;  %v2037_v13 = vld [vmem:[%s10025_s12 + $0x8] sm:$0xff]  ;;  %s10041_s12 = sld [smem:[#allocation78_spill]] }
0x109b   :  { %7524 = vmatpush3.msra.mxu1 %v2037_v13  ;;  %v2121_v44 = vld [vmem:[%s10029_s20 + $0x8] sm:$0xff] }
0x109c   :  { %v2009_v7 = vsel %vm704_vm5, %v9301_v6, 0.0  ;;  %7525 = vmatprep.subr.mxu1 %v8696_v0 }
0x109d   :  { %2010 = vadd.xlane.f32.xlu1 %v2009_v7  ;;  %7526 = vmatpush3.msra.mxu1 %v2036_v17 }
0x109e   :  { %7530 = vmatprep.subr.mxu1 %v8696_v0 }
0x1126   :  { %v2011_v9 = vpop.xlane.xlu1 %2010 }
0x1127   :  { %v2012_v10 = vmul.f32 0.03125, %v2011_v9 }
0x1129   :  { %v2013_v11 = vsub.f32 %v9301_v6, %v2012_v10 }
0x112b   :  { %v2014_v12 = vmul.f32 %v2013_v11, %v2013_v11 }
0x112d   :  { %v2015_v14 = vsel %vm704_vm5, %v2014_v12, 0.0 }
0x112e   :  { %2016 = vadd.xlane.f32.xlu1 %v2015_v14 }
0x11b7   :  { %v2017_v18 = vpop.xlane.xlu1 %2016 }
0x11b8   :  { %v2018_v19 = vmul.f32 0.03125, %v2017_v18 }
0x11ba   :  { %v2019_v20 = vadd.f32 1e-05, %v2018_v19 }
0x11bc   :  { %8068 = vrsqrt.f32 %v2019_v20 }
0x11c9   :  { %v8069_v22 = vpop.eup %8068 }
0x11ca   :  { %v2021_v23 = vmul.f32 %v8069_v22, %v2013_v11 }
0x11cc   :  { %v2028_v25 = vmul.f32 %v6982_v21, %v2021_v23 }
0x11ce   :  { %v2035_v26 = vadd.f32 %v6983_v24, %v2028_v25 }
0x11d0   :  { %7528 = vmatmul.mubr.msk.f32.vlgmr.msra.gmra.mxu1 %vm744_vm6, %v2035_v26 }
0x11d1   :  { %7532 = vmatprep.mubr.msk.f32.mxu1 %vm8697_vm0, %v8696_v0 }
0x1290   :  { %v2116_v28 = vpop.f32.mrf.mxu1 }
0x1291   :  { %v9321_v29 = vadd.f32 %v6984_v27, %v2116_v28 }
0x1292   :  { %v7529_v30 = vpop.f32.mrf.mxu1 }
0x1293   :  { %2125 = vrot.lane.b32.xlu1 %v9321_v29, %s8700_s6  ;;  %v2122_v30 = vld [vmem:[%s10029_s20 + $0x10] sm:$0xff] }
0x1305   :  { %v2126_v31 = vpop.permute.xlu1 %2125 }
0x1306   :  { %7531 = vmatpush3.xpose.msk.msra.mxu1 %vm610_vm4, %v2126_v31 }
0x1307   :  { %7535 = vmatprep.subr.mxu1 %v8696_v0 }
0x1309   :  { %7533 = vmatmul.mubr.msk.f32.vlgmr.msra.gmra.mxu1 %vm610_vm4, %v9321_v29 }
0x130a   :  { %7537 = vmatprep.mubr.msk.f32.mxu1 %vm8697_vm0, %v8696_v0 }
0x13c9   :  { %v2197_v32 = vpop.f32.mrf.mxu1 }
0x13ca   :  { %v2198_v33 = vadd.f32 %v2197_v32, %v9163_v51 }
0x13cb   :  { %v7534_v34 = vpop.f32.mrf.mxu1 }
0x13cc   :  { %v2201_v35 = vsel %vm899_vm1, %v2198_v33, -inf }
0x13cd   :  { %2202 = vmax.xlane.f32.xlu0 %v2201_v35 }
0x13e3   :  { %2212 = vrot.lane.b32.xlu0 %v9321_v29, %s8705_s18 }
0x13e7   :  { %2289 = vrot.lane.b32.xlu0 %v9321_v29, %s8701_s16 }
0x1456   :  { %v2203_v36 = vpop.xlane.xlu0 %2202 }
0x1457   :  { %v2204_v37 = vsub.f32 %v2198_v33, %v2203_v36 }
0x1459   :  { %v2205_v38 = vmul.f32 1.442695, %v2204_v37  ;;  %v3419_v37 = vld [vmem:[%s10030_s11] sm:$0xff] }
0x145a   :  { %v2213_v39 = vpop.permute.xlu0 %2212  ;;  %vm3431_vm9 = vcmp.lt.s32.totalorder %v3419_v37, 0 }
0x145b   :  { %8070 = vpow2.f32 %v2205_v38  ;;  %7536 = vmatpush3.msk.msra.mxu1 %vm917_vm7, %v2213_v39  ;;  %v9411_v38 = vld [vmem:[%s10030_s11 + $0x8] sm:$0x3]  ;;  %v3433_v39 = vsel %vm3431_vm9, 1.0, %v8696_v0  ;;  %s10046_s11 = sld [smem:[#allocation83_spill]] }
0x145c   :  { %7540 = vmatprep.subr.mxu1 %v8696_v0  ;;  %vm3432_vm10 = vcmp.lt.s32.totalorder %v9411_v38, 0 }
0x145e   :  { %v2290_v47 = vpop.permute.xlu0 %2289 }
0x1468   :  { %v8071_v40 = vpop.eup %8070 }
0x1469   :  { %v2207_v41 = vsel %vm899_vm1, %v8071_v40, 0.0 }
0x146a   :  { %2208 = vadd.xlane.f32.xlu1 %v2207_v41 }
0x147b   :  { %2291 = vrot.lane.b32.xlu1 %v9321_v29, %s8699_s29 }
0x14f3   :  { %v2209_v42 = vpop.xlane.xlu1 %2208 }
0x14f4   :  { %8072 = vrcp.f32 %v2209_v42 }
0x14f7   :  { %v2292_v46 = vpop.permute.xlu1 %2291 }
0x1501   :  { %v8073_v43 = vpop.eup %8072 }
0x1502   :  { %v2211_v45 = vmul.f32 %v8073_v43, %v8071_v40  ;;  %v3434_v40 = vsel %vm3432_vm10, 1.0, %v8696_v0 }
0x1503   :  { %v8041_v41 = vpack.i.bf16 %v3434_v40, %v3433_v39  ;;  %v3212_v39 = vld [vmem:[%s10035_s28] sm:$0xff] }
0x1504   :  { %7538 = vmatmul.mubr.msk.f32.vlgmr.msra.gmra.mxu1 %vm913_vm8, %v2211_v45  ;;  %v7009_v40 = vld [vmem:[%s10036_s1] ss:$0 sm:$0xff] }
0x1505   :  { %7541 = vmatpush3.xpose.msk.msra.mxu1 %vm610_vm4, %v2292_v46  ;;  %7542 = vmatprep.mubr.msk.f32.mxu1 %vm8697_vm0, %v8696_v0 }
0x1506   :  { %7545 = vmatprep.subr.mxu1 %v8696_v0 }
0x1508   :  { %7543 = vmatmul.mubr.msk.f32.vlgmr.msra.gmra.mxu1 %vm610_vm4, %v2290_v47 }
0x1509   :  { %7547 = vmatprep.mubr.msk.f32.mxu1 %vm8697_vm0, %v8696_v0 }
0x15c4   :  { %v2285_v52 = vpop.f32.mrf.mxu1 }
0x15c5   :  { %7558 = vmatmul.mubr.msk.f32.vlgmr.msra.gmra.mxu0 %vm610_vm4, %v2285_v52 }
0x15c6   :  { %v7539_v53 = vpop.f32.mrf.mxu1  ;;  %7567 = vmatprep.mubr.msk.f32.mxu0 %vm8697_vm0, %v8696_v0 }
0x15c8   :  { %v2363_v54 = vpop.f32.mrf.mxu1 }
0x15c9   :  { %v2364_v55 = vadd.f32 %v2363_v54, %v9163_v51 }
0x15ca   :  { %v7544_v56 = vpop.f32.mrf.mxu1 }
0x15cb   :  { %v2367_v57 = vsel %vm899_vm1, %v2364_v55, -inf }
0x15cc   :  { %2368 = vmax.xlane.f32.xlu0 %v2367_v57  ;;  %v2123_v57 = vld [vmem:[%s10029_s20 + $0x18] sm:$0xff]  ;;  %s10045_s20 = sld [smem:[#allocation82_spill]] }
0x15e2   :  { %2378 = vrot.lane.b32.xlu0 %v9321_v29, %s8703_s25 }
0x15e6   :  { %2601 = vrot.lane.b32.xlu0 %v9321_v29, %s8704_s0 }
0x1655   :  { %v2369_v58 = vpop.xlane.xlu0 %2368 }
0x1656   :  { %v2370_v59 = vsub.f32 %v2364_v55, %v2369_v58 }
0x1658   :  { %v2371_v60 = vmul.f32 1.442695, %v2370_v59 }
0x1659   :  { %v2379_v61 = vpop.permute.xlu0 %2378 }
0x165a   :  { %8074 = vpow2.f32 %v2371_v60  ;;  %7546 = vmatpush3.msk.msra.mxu1 %vm917_vm7, %v2379_v61 }
0x165b   :  { %7550 = vmatprep.subr.mxu1 %v8696_v0 }
0x165d   :  { %v2602_v11 = vpop.permute.xlu0 %2601 }
0x1667   :  { %v8075_v62 = vpop.eup %8074 }
0x1668   :  { %v2373_v63 = vsel %vm899_vm1, %v8075_v62, 0.0 }
0x1669   :  { %2374 = vadd.xlane.f32.xlu1 %v2373_v63 }
0x167a   :  { %2603 = vrot.lane.b32.xlu1 %v9321_v29, %s8706_s30 }
0x1685   :  { %v9366_v1 = vpop.f32.mrf.mxu0 }
0x1687   :  { %v7559_v2 = vpop.f32.mrf.mxu0 }
0x16f2   :  { %v2375_v3 = vpop.xlane.xlu1 %2374 }
0x16f3   :  { %8076 = vrcp.f32 %v2375_v3 }
0x16f6   :  { %v2604_v9 = vpop.permute.xlu1 %2603 }
0x1700   :  { %v8077_v4 = vpop.eup %8076 }
0x1701   :  { %v2377_v5 = vmul.f32 %v8077_v4, %v8075_v62  ;;  %v7006_v62 = vld [vmem:[%s10031_s24] ss:$0 sm:$0xff]  ;;  %s10047_s24 = sld [smem:[#allocation84_spill]] }
0x1703   :  { %7548 = vmatmul.mubr.msk.f32.vlgmr.msra.gmra.mxu1 %vm913_vm8, %v2377_v5 }
0x1704   :  { %7551 = vmatpush3.msra.mxu1 %v2121_v44  ;;  %7552 = vmatprep.mubr.msk.f32.mxu1 %vm8697_vm0, %v8696_v0 }
0x1705   :  { %7560 = vmatprep.subr.mxu1 %v8696_v0 }
0x17c3   :  { %v2451_v7 = vpop.f32.mrf.mxu1 }
0x17c4   :  { %7553 = vmatmul.mubr.msk.f32.vlgmr.msra.gmra.mxu1 %vm610_vm4, %v2451_v7 }
0x17c5   :  { %7561 = vmatpush3.xpose.msk.msra.mxu1 %vm610_vm4, %v2604_v9  ;;  %v7549_v10 = vpop.f32.mrf.mxu1  ;;  %7562 = vmatprep.mubr.msk.f32.mxu1 %vm8697_vm0, %v8696_v0 }
0x17c6   :  { %7570 = vmatprep.subr.mxu1 %v8696_v0  ;;  %v3122_v10 = vld [vmem:[%s10032_s15 + $0x18] sm:$0xff] }
0x17c8   :  { %7563 = vmatmul.mubr.msk.f32.vlgmr.msra.gmra.mxu1 %vm610_vm4, %v2602_v11  ;;  %v3121_v11 = vld [vmem:[%s10032_s15 + $0x10] sm:$0xff] }
0x17c9   :  { %7572 = vmatprep.mubr.msk.f32.mxu1 %vm8697_vm0, %v8696_v0  ;;  %7571 = vmatpush3.msra.mxu1 %v2122_v30  ;;  %v3220_v30 = vld [vmem:[%s10035_s28 + $0x40] sm:$0xff] }
0x17ca   :  { %7580 = vmatprep.subr.mxu1 %v8696_v0 }
0x1884   :  { %v9381_v12 = vpop.f32.mrf.mxu1 }
0x1885   :  { %v2598_v47 = vadd.f32 %v9366_v1, %v9381_v12  ;;  %v3119_v12 = vld [vmem:[%s10032_s15] sm:$0xff] }
0x1886   :  { %v7554_v14 = vpop.f32.mrf.mxu1 }
0x1888   :  { %v2675_v15 = vpop.f32.mrf.mxu1 }
0x1889   :  { %v2676_v16 = vadd.f32 %v2675_v15, %v9163_v51 }
0x188a   :  { %v7564_v13 = vpop.f32.mrf.mxu1 }
0x188b   :  { %v2679_v17 = vsel %vm899_vm1, %v2676_v16, -inf }
0x188c   :  { %2680 = vmax.xlane.f32.xlu0 %v2679_v17  ;;  %v7007_v17 = vld [vmem:[%s10033_s22] ss:$0 sm:$0xff] }
0x18a2   :  { %2690 = vrot.lane.b32.xlu0 %v9321_v29, %s8707_s8 }
0x18a6   :  { %2841 = vrot.lane.b32.xlu0 %v9321_v29, %s8708_s5 }
0x1915   :  { %v2681_v18 = vpop.xlane.xlu0 %2680 }
0x1916   :  { %v2682_v19 = vsub.f32 %v2676_v16, %v2681_v18 }
0x1918   :  { %v2683_v20 = vmul.f32 1.442695, %v2682_v19  ;;  %v7008_v19 = vld [vmem:[%s10034_s26] ss:$0 sm:$0xff] }
0x1919   :  { %v2691_v22 = vpop.permute.xlu0 %2690 }
0x191a   :  { %8078 = vpow2.f32 %v2683_v20  ;;  %7566 = vmatpush3.msk.msra.mxu0 %vm917_vm7, %v2691_v22 }
0x191b   :  { %7575 = vmatprep.subr.mxu0 %v8696_v0 }
0x191d   :  { %v2842_v28 = vpop.permute.xlu0 %2841 }
0x1927   :  { %v8079_v21 = vpop.eup %8078 }
0x1928   :  { %v2685_v23 = vsel %vm899_vm1, %v8079_v21, 0.0 }
0x1929   :  { %2686 = vadd.xlane.f32.xlu1 %v2685_v23  ;;  %v3226_v23 = vld [vmem:[%s10035_s28 + $0x70] sm:$0xff] }
0x193a   :  { %2843 = vrot.lane.b32.xlu1 %v9321_v29, %s8709_s23 }
0x19b2   :  { %v2687_v24 = vpop.xlane.xlu1 %2686 }
0x19b3   :  { %8080 = vrcp.f32 %v2687_v24  ;;  %v3225_v24 = vld [vmem:[%s10035_s28 + $0x68] sm:$0xff] }
0x19b6   :  { %v2844_v27 = vpop.permute.xlu1 %2843 }
0x19c0   :  { %v8081_v25 = vpop.eup %8080 }
0x19c1   :  { %v2689_v26 = vmul.f32 %v8081_v25, %v8079_v21  ;;  %v3227_v21 = vld [vmem:[%s10035_s28 + $0x78] sm:$0xff]  ;;  %v3224_v25 = vld [vmem:[%s10035_s28 + $0x60] sm:$0xff] }
0x19c3   :  { %7568 = vmatmul.mubr.msk.f32.vlgmr.msra.gmra.mxu0 %vm913_vm8, %v2689_v26  ;;  %v3223_v26 = vld [vmem:[%s10035_s28 + $0x58] sm:$0xff] }
0x19c4   :  { %7576 = vmatpush3.xpose.msk.msra.mxu0 %vm610_vm4, %v2844_v27  ;;  %7577 = vmatprep.mubr.msk.f32.mxu0 %vm8697_vm0, %v8696_v0  ;;  %v3222_v27 = vld [vmem:[%s10035_s28 + $0x50] sm:$0xff] }
0x19c5   :  { %7585 = vmatprep.subr.mxu0 %v8696_v0 }
0x19c7   :  { %7578 = vmatmul.mubr.msk.f32.vlgmr.msra.gmra.mxu0 %vm610_vm4, %v2842_v28  ;;  %v3221_v28 = vld [vmem:[%s10035_s28 + $0x48] sm:$0xff] }
0x19c8   :  { %7587 = vmatprep.mubr.msk.f32.mxu0 %vm8697_vm0, %v8696_v0  ;;  %7586 = vmatpush3.msra.mxu0 %v2123_v57 }
0x19c9   :  { %7601 = vmatprep.subr.mxu0 %v8696_v0 }
0x1a83   :  { %v2763_v31 = vpop.f32.mrf.mxu0 }
0x1a84   :  { %7573 = vmatmul.mubr.msk.f32.vlgmr.msra.gmra.mxu1 %vm610_vm4, %v2763_v31  ;;  %v3219_v31 = vld [vmem:[%s10035_s28 + $0x38] sm:$0xff] }
0x1a85   :  { %v7569_v32 = vpop.f32.mrf.mxu0  ;;  %7582 = vmatprep.mubr.msk.f32.mxu1 %vm8697_vm0, %v8696_v0 }
0x1a86   :  { %v3218_v32 = vld [vmem:[%s10035_s28 + $0x30] sm:$0xff] }
0x1a87   :  { %v2915_v33 = vpop.f32.mrf.mxu0 }
0x1a88   :  { %v2916_v34 = vadd.f32 %v2915_v33, %v9163_v51  ;;  %v3217_v33 = vld [vmem:[%s10035_s28 + $0x28] sm:$0xff] }
0x1a89   :  { %v7579_v35 = vpop.f32.mrf.mxu0 }
0x1a8a   :  { %v2919_v36 = vsel %vm899_vm1, %v2916_v34, -inf  ;;  %v3215_v35 = vld [vmem:[%s10035_s28 + $0x18] sm:$0xff] }
0x1a8b   :  { %2920 = vmax.xlane.f32.xlu0 %v2919_v36  ;;  %v3214_v36 = vld [vmem:[%s10035_s28 + $0x10] sm:$0xff] }
0x1aa1   :  { %2930 = vrot.lane.b32.xlu0 %v9321_v29, %s8710_s4 }
0x1aa5   :  { %3422 = vperm.xlu0 %8039, %v3419_v37   ;;  %v3213_v37 = vld [vmem:[%s10035_s28 + $0x8] sm:$0xff] }
0x1aa9   :  { %8042 = vperm.xlu0 %8039, %v8041_v41  }
0x1b14   :  { %v2921_v51 = vpop.xlane.xlu0 %2920 }
0x1b15   :  { %v2922_v42 = vsub.f32 %v2916_v34, %v2921_v51  ;;  %v3216_v34 = vld [vmem:[%s10035_s28 + $0x20] sm:$0xff] }
0x1b17   :  { %v2923_v43 = vmul.f32 1.442695, %v2922_v42 }
0x1b18   :  { %v2931_v45 = vpop.permute.xlu0 %2930 }
0x1b19   :  { %8082 = vpow2.f32 %v2923_v43  ;;  %7581 = vmatpush3.msk.msra.mxu1 %vm917_vm7, %v2931_v45 }
0x1b1a   :  { %7590 = vmatprep.subr.mxu1 %v8696_v0 }
0x1b26   :  { %v8083_v46 = vpop.eup %8082 }
0x1b27   :  { %v2925_v29 = vsel %vm899_vm1, %v8083_v46, 0.0 }
0x1b28   :  { %2926 = vadd.xlane.f32.xlu1 %v2925_v29 }
0x1b44   :  { %v2836_v48 = vpop.f32.mrf.mxu1 }
0x1b45   :  { %v2840_v52 = vadd.f32 %v2836_v48, %v2598_v47 }
0x1b46   :  { %v7574_v53 = vpop.f32.mrf.mxu1 }
0x1bb1   :  { %v2927_v54 = vpop.xlane.xlu1 %2926 }
0x1bb2   :  { %8084 = vrcp.f32 %v2927_v54 }
0x1bbf   :  { %v8085_v55 = vpop.eup %8084 }
0x1bc0   :  { %v2929_v56 = vmul.f32 %v8085_v55, %v8083_v46  ;;  %v7011_v55 = vld [vmem:[%s10037_s2] ss:$0 sm:$0xff] }
0x1bc2   :  { %7583 = vmatmul.mubr.msk.f32.vlgmr.msra.gmra.mxu1 %vm913_vm8, %v2929_v56 }
0x1bc3   :  { %7598 = vmatprep.mubr.msk.f32.mxu1 %vm8697_vm0, %v8696_v0  ;;  %7591 = vmatpush3.msra.mxu1 %v3122_v10 }
0x1bc4   :  { %7592 = vmatprep.subr.mxu1 %v8696_v0 }
0x1bc5   :  { %7593 = vmatpush3.msra.mxu1 %v3121_v11 }
0x1bc6   :  { %7594 = vmatprep.subr.mxu1 %v8696_v0 }
0x1c82   :  { %v3003_v58 = vpop.f32.mrf.mxu1 }
0x1c83   :  { %7588 = vmatmul.mubr.msk.f32.vlgmr.msra.gmra.mxu0 %vm610_vm4, %v3003_v58 }
0x1c84   :  { %v7584_v59 = vpop.f32.mrf.mxu1  ;;  %7633 = vmatprep.mubr.msk.f32.mxu0 %vm8697_vm0, %v8696_v0  ;;  %7602 = vmatpush3.msra.mxu0 %v3227_v21 }
0x1c85   :  { %7603 = vmatprep.subr.mxu0 %v8696_v0 }
0x1c86   :  { %7604 = vmatpush3.msra.mxu0 %v3226_v23 }
0x1c87   :  { %7605 = vmatprep.subr.mxu0 %v8696_v0 }
0x1c88   :  { %7606 = vmatpush3.msra.mxu0 %v3225_v24 }
0x1c89   :  { %7607 = vmatprep.subr.mxu0 %v8696_v0 }
0x1c8a   :  { %7608 = vmatpush3.msra.mxu0 %v3224_v25  ;;  %v7016_v25 = vld [vmem:[%s10042_s17] ss:$0 sm:$0xff] }
0x1c8b   :  { %7609 = vmatprep.subr.mxu0 %v8696_v0 }
0x1c8c   :  { %7610 = vmatpush3.msra.mxu0 %v3223_v26 }
0x1c8d   :  { %7611 = vmatprep.subr.mxu0 %v8696_v0 }
0x1c8e   :  { %7612 = vmatpush3.msra.mxu0 %v3222_v27 }
0x1c8f   :  { %7613 = vmatprep.subr.mxu0 %v8696_v0 }
0x1c90   :  { %7614 = vmatpush3.msra.mxu0 %v3221_v28 }
0x1c91   :  { %7615 = vmatprep.subr.mxu0 %v8696_v0 }
0x1c92   :  { %7616 = vmatpush3.msra.mxu0 %v3220_v30  ;;  %v3539_v30 = vld [vmem:[%s10043_s9 + $0x8] sm:$0x3] }
0x1c93   :  { %7617 = vmatprep.subr.mxu0 %v8696_v0 }
0x1c94   :  { %7618 = vmatpush3.msra.mxu0 %v3219_v31 }
0x1c95   :  { %7619 = vmatprep.subr.mxu0 %v8696_v0 }
0x1c96   :  { %7620 = vmatpush3.msra.mxu0 %v3218_v32 }
0x1c97   :  { %7621 = vmatprep.subr.mxu0 %v8696_v0 }
0x1c98   :  { %7622 = vmatpush3.msra.mxu0 %v3217_v33 }
0x1c99   :  { %7623 = vmatprep.subr.mxu0 %v8696_v0 }
0x1c9a   :  { %7624 = vmatpush3.msra.mxu0 %v3216_v34  ;;  %v3538_v34 = vld [vmem:[%s10043_s9] sm:$0xff] }
0x1c9b   :  { %7625 = vmatprep.subr.mxu0 %v8696_v0 }
0x1c9c   :  { %7626 = vmatpush3.msra.mxu0 %v3215_v35 }
0x1c9d   :  { %7627 = vmatprep.subr.mxu0 %v8696_v0 }
0x1c9e   :  { %7628 = vmatpush3.msra.mxu0 %v3214_v36 }
0x1c9f   :  { %7629 = vmatprep.subr.mxu0 %v8696_v0 }
0x1ca0   :  { %7630 = vmatpush3.msra.mxu0 %v3213_v37 }
0x1ca1   :  { %7631 = vmatprep.subr.mxu0 %v8696_v0 }
0x1ca2   :  { %7632 = vmatpush3.msra.mxu0 %v3212_v39 }
0x1d43   :  { %v3076_v60 = vpop.f32.mrf.mxu0 }
0x1d44   :  { %v3080_v61 = vadd.f32 %v3076_v60, %v2840_v52 }
0x1d45   :  { %v7589_v63 = vpop.f32.mrf.mxu0 }
0x1d46   :  { %v3081_v1 = vadd.f32 %v3080_v61, %v9301_v6  ;;  %v3120_v6 = vld [vmem:[%s10032_s15 + $0x8] sm:$0xff]  ;;  %s10048_s15 = sld [smem:[#allocation85_spill]] }
0x1d47   :  { %7595 = vmatpush3.msra.mxu1 %v3120_v6  ;;  %v7012_v6 = vld [vmem:[%s10039_s27] ss:$0 sm:$0xff] }
0x1d48   :  { %v9433_v2 = vadd.f32 %v7006_v62, %v3081_v1  ;;  %7596 = vmatprep.subr.mxu1 %v8696_v0 }
0x1d49   :  { %7597 = vmatpush3.msra.mxu1 %v3119_v12  ;;  %v3423_v12 = vpop.permute.xlu0 %3422 }
0x1d4a   :  { %v3092_v3 = vsel %vm704_vm5, %v9433_v2, 0.0  ;;  %7636 = vmatprep.subr.mxu1 %v8696_v0 }
0x1d4b   :  { %3093 = vadd.xlane.f32.xlu1 %v3092_v3 }
0x1d4d   :  { %v8043_v23 = vpop.permute.xlu0 %8042 }
0x1d4e   :  { %v8045_v24 = vunpack.i.h.bf16 %v8043_v23  ;;  %v8044_v26 = vunpack.i.l.bf16 %v8043_v23 }
0x1d50   :  { %v3453_v27 = vmul.f32 %v8045_v24, %v7016_v25  ;;  %v3452_v32 = vmul.f32 %v8044_v26, %v7016_v25 }
0x1dd4   :  { %v3094_v4 = vpop.xlane.xlu1 %3093 }
0x1dd5   :  { %v3095_v5 = vmul.f32 0.03125, %v3094_v4  ;;  %v3338_v4 = vld [vmem:[%s10038_s3 + $0x18] sm:$0xff] }
0x1dd7   :  { %v3096_v44 = vsub.f32 %v9433_v2, %v3095_v5  ;;  %v3337_v5 = vld [vmem:[%s10038_s3 + $0x10] sm:$0xff] }
0x1dd9   :  { %v3097_v7 = vmul.f32 %v3096_v44, %v3096_v44 }
0x1ddb   :  { %v3098_v9 = vsel %vm704_vm5, %v3097_v7, 0.0 }
0x1ddc   :  { %3099 = vadd.xlane.f32.xlu1 %v3098_v9 }
0x1e65   :  { %v3100_v14 = vpop.xlane.xlu1 %3099 }
0x1e66   :  { %v3101_v15 = vmul.f32 0.03125, %v3100_v14 }
0x1e68   :  { %v3102_v16 = vadd.f32 1e-05, %v3101_v15  ;;  %v7013_v15 = vld [vmem:[%s10040_s7] ss:$0 sm:$0xff] }
0x1e6a   :  { %8086 = vrsqrt.f32 %v3102_v16 }
0x1e77   :  { %v8087_v13 = vpop.eup %8086 }
0x1e78   :  { %v3104_v18 = vmul.f32 %v8087_v13, %v3096_v44  ;;  %v3336_v44 = vld [vmem:[%s10038_s3 + $0x8] sm:$0xff] }
0x1e7a   :  { %v3111_v20 = vmul.f32 %v7007_v17, %v3104_v18  ;;  %v7014_v18 = vld [vmem:[%s10041_s12] ss:$0 sm:$0xff] }
0x1e7c   :  { %v3118_v22 = vadd.f32 %v7008_v19, %v3111_v20 }
0x1e7e   :  { %7599 = vmatmul.mubr.msk.f32.vlgmr.msra.gmra.mxu1 %vm744_vm6, %v3118_v22 }
0x1e7f   :  { %7644 = vmatprep.mubr.msk.f32.mxu1 %vm8697_vm0, %v8696_v0  ;;  %7637 = vmatpush3.msra.mxu1 %v3338_v4  ;;  %vm3427_vm0 = vcmp.eq.s32.totalorder %v9103_v8, %v3423_v12 }
0x1e80   :  { %7638 = vmatprep.subr.mxu1 %v8696_v0  ;;  %v3429_v13 = vsel %vm3427_vm0, 1.0, %v8696_v0  ;;  %vm3801_vm0 = vcmask 74752  }
0x1e81   :  { %7639 = vmatpush3.msra.mxu1 %v3337_v5 }
0x1e82   :  { %7640 = vmatprep.subr.mxu1 %v8696_v0 }
0x1e83   :  { %7641 = vmatpush3.msra.mxu1 %v3336_v44 }
0x1e84   :  { %7642 = vmatprep.subr.mxu1 %v8696_v0 }
0x1f3e   :  { %v3199_v41 = vpop.f32.mrf.mxu1 }
0x1f3f   :  { %v3200_v51 = vadd.f32 %v7009_v40, %v3199_v41 }
0x1f40   :  { %v7600_v42 = vpop.f32.mrf.mxu1 }
0x1f41   :  { %v3204_v43 = vmul.f32 0.044715, %v3200_v51  ;;  %v3203_v52 = vmul.f32 0.5, %v3200_v51 }
0x1f43   :  { %v3205_v45 = vmul.f32 %v3204_v43, %v3200_v51 }
0x1f45   :  { %v3206_v46 = vmul.f32 %v3205_v45, %v3200_v51 }
0x1f47   :  { %v3207_v29 = vadd.f32 %v3206_v46, %v3200_v51 }
0x1f49   :  { %v3208_v47 = vmul.f32 0.7978846, %v3207_v29 }
0x1f4b   :  { %8088 = vtanh.f32 %v3208_v47 }
0x1f58   :  { %v8089_v48 = vpop.eup %8088 }
0x1f59   :  { %v3210_v53 = vadd.f32 1.0, %v8089_v48 }
0x1f5b   :  { %v3211_v54 = vmul.f32 %v3210_v53, %v3203_v52  ;;  %v3615_v52 = vld [vmem:[%s10044_s10 + $0x18] sm:$0xff]  ;;  %v3614_v53 = vld [vmem:[%s10044_s10 + $0x10] sm:$0xff] }
0x1f5d   :  { %7634 = vmatmul.mubr.f32.vlgmr.msra.gmra.mxu0 %v3211_v54  ;;  %v3613_v54 = vld [vmem:[%s10044_s10 + $0x8] sm:$0xff] }
0x201d   :  { %v3301_v56 = vpop.f32.mrf.mxu0 }
0x201e   :  { %v3302_v57 = vadd.f32 %v7011_v55, %v3301_v56  ;;  %v3612_v55 = vld [vmem:[%s10044_s10] sm:$0xff] }
0x201f   :  { %v7635_v58 = vpop.f32.mrf.mxu0 }
0x2020   :  { %v3305_v59 = vadd.f32 %v3302_v57, %v9433_v2  ;;  %v3335_v2 = vld [vmem:[%s10038_s3] sm:$0xff] }
0x2021   :  { %7643 = vmatpush3.msra.mxu1 %v3335_v2 }
0x2022   :  { %v3308_v60 = vsel %vm704_vm5, %v3305_v59, 0.0 }
0x2023   :  { %3309 = vadd.xlane.f32.xlu1 %v3308_v60 }
0x20ac   :  { %v3310_v61 = vpop.xlane.xlu1 %3309 }
0x20ad   :  { %v3311_v62 = vmul.f32 0.03125, %v3310_v61 }
0x20af   :  { %v3312_v63 = vsub.f32 %v3305_v59, %v3311_v62 }
0x20b1   :  { %v3313_v1 = vmul.f32 %v3312_v63, %v3312_v63 }
0x20b3   :  { %v3314_v3 = vsel %vm704_vm5, %v3313_v1, 0.0  ;;  %vm3572_vm5 = vcmask 254976  }
0x20b4   :  { %3315 = vadd.xlane.f32.xlu1 %v3314_v3  ;;  %v7021_v3 = vld [vmem:[#allocation5] ss:$0 sm:$0xff] }
0x20c5   :  { %3425 = vperm.xlu1 %8040, %v9411_v38  }
0x213d   :  { %v3316_v7 = vpop.xlane.xlu1 %3315 }
0x213e   :  { %v3317_v9 = vmul.f32 0.03125, %v3316_v7 }
0x2140   :  { %v3318_v10 = vadd.f32 1e-05, %v3317_v9 }
0x2141   :  { %v3426_v17 = vpop.permute.xlu1 %3425 }
0x2142   :  { %8090 = vrsqrt.f32 %v3318_v10  ;;  %vm3428_vm1 = vcmp.eq.s32.totalorder %v9103_v8, %v3426_v17  ;;  %v7022_v10 = vld [vmem:[#allocation7] ss:$0 sm:$0xff] }
0x2143   :  { %v3430_v21 = vsel %vm3428_vm1, 1.0, %v8696_v0  ;;  %vm3797_vm1 = vcmask 80896  }
0x214f   :  { %v8091_v11 = vpop.eup %8090 }
0x2150   :  { %v3320_v14 = vmul.f32 %v8091_v11, %v3312_v63  ;;  %v7020_v63 = vld [vmem:[#allocation2] ss:$0 sm:$0xff] }
0x2152   :  { %v3327_v16 = vmul.f32 %v7012_v6, %v3320_v14 }
0x2154   :  { %v3334_v38 = vadd.f32 %v7013_v15, %v3327_v16 }
0x2156   :  { %7645 = vmatmul.mubr.msk.f32.vlgmr.msra.gmra.mxu1 %vm744_vm6, %v3334_v38 }
0x2157   :  { %7649 = vmatprep.mubr.msk.f32.mxu1 %vm913_vm8, %v3429_v13 }
0x2216   :  { %v3415_v19 = vpop.f32.mrf.mxu1 }
0x2217   :  { %v3416_v20 = vadd.f32 %v7014_v18, %v3415_v19  ;;  %v3542_v19 = vadd.s32 8, %v9154_v49 }
0x2218   :  { %v7646_v22 = vpop.f32.mrf.mxu1 }
0x2219   :  { %7647 = vmatprep.subr.msk.mxu1 %vm917_vm7, %v3416_v20  ;;  %vm3555_vm3 = vcmp.lt.s32.totalorder %v3542_v19, 10 }
0x221a   :  { %7648 = vmatpush3.msk.msra.mxu1 %vm917_vm7, %v3416_v20  ;;  %vm3550_vm7 = vmand %vm3544_vm13, %vm3548_vm14  ;;  %vm6799_vm13 = vcmask 7168  }
0x221b   :  { %7650 = vmatmul.mubr.msk.f32.vlgmr.msra.gmra.mxu1 %vm913_vm8, %v3430_v21  ;;  %7652 = vmatprep.subr.mxu1 %v3615_v52  ;;  %vm3561_vm8 = vmand %vm3552_vm2, %vm3560_vm15 }
0x221c   :  { %7653 = vmatpush3.msra.mxu1 %v3615_v52  ;;  %vm3562_vm9 = vmand %vm3555_vm3, %vm3560_vm15  ;;  %vm6849_vm15 = vcmask 0  }
0x221d   :  { %7654 = vmatprep.subr.mxu1 %v3614_v53  ;;  %vm3563_vm10 = vmor %vm3550_vm7, %vm3561_vm8  ;;  %v9566_v20 = vsel %vm3562_vm9, 0.0, %v8702_v50 }
0x221e   :  { %7655 = vmatpush3.msra.mxu1 %v3614_v53  ;;  %v9569_v21 = vsel %vm3563_vm10, 0.0, %v8702_v50 }
0x221f   :  { %7656 = vmatprep.subr.mxu1 %v3613_v54 }
0x2220   :  { %7657 = vmatpush3.msra.mxu1 %v3613_v54 }
0x2221   :  { %7658 = vmatprep.subr.mxu1 %v3612_v55 }
0x2222   :  { %7659 = vmatpush3.msra.mxu1 %v3612_v55 }
0x22db   :  { %v7651_v28 = vpop.f32.mrf.mxu1 }
0x22dc   :  { %v3535_v31 = vadd.f32 %v7651_v28, %v3453_v27 }
0x22dd   :  { %v3529_v33 = vpop.f32.mrf.mxu1 }
0x22de   :  { %v9511_v35 = vadd.f32 %v3539_v30, %v3535_v31  ;;  %v3530_v0 = vadd.f32 %v3529_v33, %v3452_v32 }
0x22e0   :  { %v9513_v36 = vadd.f32 %v3538_v34, %v3530_v0  ;;  %v3573_v37 = vsel %vm3572_vm5, %v9511_v35, 0.0 }
0x22e1   :  { %3574 = vadd.xlane.f32.xlu1 %v3573_v37 }
0x22e2   :  { %v3569_v39 = vsel %vm744_vm6, %v9513_v36, 0.0 }
0x22e3   :  { %3570 = vadd.xlane.f32.xlu0 %v3569_v39 }
0x236a   :  { %v3575_v40 = vpop.xlane.xlu1 %3574 }
0x236b   :  { %v3577_v41 = vmul.f32 0.03125, %v3575_v40 }
0x236c   :  { %v3571_v51 = vpop.xlane.xlu0 %3570 }
0x236d   :  { %v3576_v42 = vmul.f32 0.03125, %v3571_v51  ;;  %v3579_v43 = vsub.f32 %v9511_v35, %v3577_v41 }
0x236f   :  { %v3578_v45 = vsub.f32 %v9513_v36, %v3576_v42  ;;  %v3581_v47 = vmul.f32 %v3579_v43, %v3579_v43 }
0x2371   :  { %v3580_v46 = vmul.f32 %v3578_v45, %v3578_v45  ;;  %v3585_v48 = vsel %vm3572_vm5, %v3581_v47, 0.0 }
0x2373   :  { %v3582_v29 = vsel %vm744_vm6, %v3580_v46, 0.0 }
0x2374   :  { %3583 = vadd.xlane.f32.xlu0 %v3582_v29 }
0x2378   :  { %3586 = vadd.xlane.f32.xlu0 %v3585_v48 }
0x23fd   :  { %v3584_v56 = vpop.xlane.xlu0 %3583 }
0x23fe   :  { %v3588_v57 = vmul.f32 0.03125, %v3584_v56 }
0x2400   :  { %v3590_v58 = vadd.f32 1e-05, %v3588_v57 }
0x2401   :  { %v3587_v59 = vpop.xlane.xlu0 %3586 }
0x2402   :  { %8092 = vrsqrt.f32 %v3590_v58  ;;  %v3589_v60 = vmul.f32 0.03125, %v3587_v59 }
0x2404   :  { %v3591_v61 = vadd.f32 1e-05, %v3589_v60 }
0x2406   :  { %8094 = vrsqrt.f32 %v3591_v61 }
0x240f   :  { %v8093_v62 = vpop.eup %8092 }
0x2410   :  { %v3594_v1 = vmul.f32 %v8093_v62, %v3578_v45 }
0x2412   :  { %v3602_v4 = vmul.f32 %v7020_v63, %v3594_v1 }
0x2413   :  { %v8095_v5 = vpop.eup %8094 }
0x2414   :  { %v3595_v44 = vmul.f32 %v8095_v5, %v3579_v43  ;;  %v3610_v2 = vadd.f32 %v7021_v3, %v3602_v4 }
0x2416   :  { %v3603_v7 = vmul.f32 %v7020_v63, %v3595_v44  ;;  %7660 = vmatprep.mubr.msk.f32.mxu1 %vm744_vm6, %v3610_v2  ;;  %v3705_v44 = vld [vmem:[%s10045_s20 + $0x8] sm:$0xff] }
0x2418   :  { %v3611_v9 = vadd.f32 %v7021_v3, %v3603_v7 }
0x241a   :  { %7661 = vmatmul.mubr.msk.f32.vlgmr.msra.gmra.mxu1 %vm744_vm6, %v3611_v9 }
0x24da   :  { %v7662_v11 = vpop.f32.mrf.mxu1 }
0x24db   :  { %v9529_v6 = vadd.f32 %v7662_v11, %v7022_v10 }
0x24dc   :  { %v3695_v12 = vpop.f32.mrf.mxu1 }
0x24dd   :  { %v9531_v14 = vadd.f32 %v7022_v10, %v3695_v12  ;;  %3712 = vrot.lane.b32.xlu0 %v9529_v6, %s8700_s6  ;;  %v3704_v12 = vld [vmem:[%s10045_s20] sm:$0xff] }
0x24df   :  { %3710 = vrot.lane.b32.xlu1 %v9531_v14, %s8700_s6  ;;  %7667 = vmatprep.mubr.msk.f32.mxu1 %vm610_vm4, %v9531_v14 }
0x24e1   :  { %3916 = vrot.lane.b32.xlu0 %v9529_v6, %s8699_s29 }
0x24e3   :  { %3914 = vrot.lane.b32.xlu1 %v9531_v14, %s8699_s29 }
0x24e5   :  { %3910 = vrot.lane.b32.xlu0 %v9531_v14, %s8701_s16 }
0x24e7   :  { %3912 = vrot.lane.b32.xlu1 %v9529_v6, %s8701_s16 }
0x254f   :  { %v3713_v15 = vpop.permute.xlu0 %3712 }
0x2550   :  { %7663 = vmatprep.subr.msk.mxu1 %vm610_vm4, %v3713_v15 }
0x2551   :  { %7664 = vmatpush3.xpose.msk.msra.mxu1 %vm610_vm4, %v3713_v15  ;;  %v3711_v16 = vpop.permute.xlu1 %3710 }
0x2552   :  { %7665 = vmatprep.subr.msk.mxu1 %vm610_vm4, %v3711_v16 }
0x2553   :  { %v3917_v38 = vpop.permute.xlu0 %3916 }
0x2555   :  { %7666 = vmatpush3.xpose.msk.msra.mxu1 %vm610_vm4, %v3711_v16  ;;  %v3915_v17 = vpop.permute.xlu1 %3914 }
0x2556   :  { %7677 = vmatprep.subr.msk.mxu1 %vm610_vm4, %v3917_v38 }
0x2557   :  { %v3911_v13 = vpop.permute.xlu0 %3910 }
0x2558   :  { %7668 = vmatmul.mubr.msk.f32.vlgmr.msra.gmra.mxu1 %vm610_vm4, %v9529_v6 }
0x2559   :  { %7678 = vmatpush3.xpose.msk.msra.mxu1 %vm610_vm4, %v3917_v38  ;;  %7681 = vmatprep.mubr.msk.f32.mxu1 %vm610_vm4, %v3911_v13  ;;  %v3913_v18 = vpop.permute.xlu1 %3912 }
0x255a   :  { %7679 = vmatprep.subr.msk.mxu1 %vm610_vm4, %v3915_v17 }
0x255d   :  { %7680 = vmatpush3.xpose.msk.msra.mxu1 %vm610_vm4, %v3915_v17 }
0x255e   :  { %7696 = vmatprep.subr.mxu1 %v3704_v12 }
0x2560   :  { %7682 = vmatmul.mubr.msk.f32.vlgmr.msra.gmra.mxu1 %vm610_vm4, %v3913_v18 }
0x2561   :  { %7697 = vmatpush3.msra.mxu1 %v3704_v12 }
0x2618   :  { %v7669_v22 = vpop.f32.mrf.mxu1 }
0x2619   :  { %v3794_v23 = vadd.f32 %v7669_v22, %v9566_v20 }
0x261a   :  { %v3788_v24 = vpop.f32.mrf.mxu1 }
0x261b   :  { %v3789_v8 = vadd.f32 %v3788_v24, %v9569_v21  ;;  %v3802_v49 = vsel %vm3801_vm0, %v3794_v23, -inf }
0x261c   :  { %3803 = vmax.xlane.f32.xlu1 %v3802_v49 }
0x261d   :  { %v3798_v25 = vsel %vm3797_vm1, %v3789_v8, -inf }
0x261e   :  { %3799 = vmax.xlane.f32.xlu0 %v3798_v25 }
0x2620   :  { %v7683_v26 = vpop.f32.mrf.mxu1 }
0x2621   :  { %v3998_v50 = vadd.f32 %v7683_v26, %v9566_v20 }
0x2622   :  { %v3992_v27 = vpop.f32.mrf.mxu1 }
0x2623   :  { %v3993_v28 = vadd.f32 %v3992_v27, %v9569_v21  ;;  %v4004_v31 = vsel %vm3801_vm0, %v3998_v50, -inf }
0x2625   :  { %v4001_v30 = vsel %vm3797_vm1, %v3993_v28, -inf }
0x2626   :  { %4002 = vmax.xlane.f32.xlu0 %v4001_v30 }
0x262a   :  { %4005 = vmax.xlane.f32.xlu0 %v4004_v31 }
0x262d   :  { %3823 = vrot.lane.b32.xlu1 %v9529_v6, %s8705_s18 }
0x26a5   :  { %v3804_v32 = vpop.xlane.xlu1 %3803 }
0x26a6   :  { %v3806_v33 = vsub.f32 %v3794_v23, %v3804_v32 }
0x26a7   :  { %v3800_v34 = vpop.xlane.xlu0 %3799 }
0x26a8   :  { %v3809_v0 = vmul.f32 1.442695, %v3806_v33  ;;  %v3805_v37 = vsub.f32 %v3789_v8, %v3800_v34 }
0x26a9   :  { %v3824_v39 = vpop.permute.xlu1 %3823 }
0x26aa   :  { %8096 = vpow2.f32 %v3809_v0  ;;  %v3807_v40 = vmul.f32 1.442695, %v3805_v37  ;;  %7670 = vmatprep.subr.msk.mxu0 %vm3832_vm11, %v3824_v39 }
0x26ab   :  { %7671 = vmatpush3.msk.msra.mxu0 %vm3832_vm11, %v3824_v39 }
0x26ac   :  { %8098 = vpow2.f32 %v3807_v40 }
0x26af   :  { %v4003_v41 = vpop.xlane.xlu0 %4002 }
0x26b0   :  { %v4007_v53 = vsub.f32 %v3993_v28, %v4003_v41 }
0x26b2   :  { %v4009_v54 = vmul.f32 1.442695, %v4007_v53 }
0x26b3   :  { %v4006_v51 = vpop.xlane.xlu0 %4005 }
0x26b4   :  { %v4008_v42 = vsub.f32 %v3998_v50, %v4006_v51 }
0x26b6   :  { %v4011_v43 = vmul.f32 1.442695, %v4008_v42 }
0x26b7   :  { %v8097_v45 = vpop.eup %8096 }
0x26b8   :  { %8100 = vpow2.f32 %v4011_v43  ;;  %v3814_v46 = vsel %vm3801_vm0, %v8097_v45, 0.0 }
0x26b9   :  { %v8099_v29 = vpop.eup %8098  ;;  %3815 = vadd.xlane.f32.xlu0 %v3814_v46  ;;  %8102 = vpow2.f32 %v4009_v54 }
0x26ba   :  { %v3811_v47 = vsel %vm3797_vm1, %v8099_v29, 0.0 }
0x26bb   :  { %3812 = vadd.xlane.f32.xlu1 %v3811_v47 }
0x26c5   :  { %v8101_v48 = vpop.eup %8100 }
0x26c6   :  { %v4016_v52 = vsel %vm3801_vm0, %v8101_v48, 0.0  ;;  %v8103_v55 = vpop.eup %8102 }
0x26c7   :  { %4017 = vadd.xlane.f32.xlu0 %v4016_v52  ;;  %v4013_v56 = vsel %vm3797_vm1, %v8103_v55, 0.0 }
0x26cc   :  { %4025 = vrot.lane.b32.xlu1 %v9529_v6, %s8703_s25 }
0x26dd   :  { %3821 = vrot.lane.b32.xlu0 %v9531_v14, %s8705_s18 }
0x26e1   :  { %4279 = vrot.lane.b32.xlu0 %v9529_v6, %s8706_s30 }
0x26e5   :  { %4273 = vrot.lane.b32.xlu0 %v9531_v14, %s8704_s0 }
0x26e9   :  { %4563 = vrot.lane.b32.xlu0 %v9529_v6, %s8709_s23 }
0x26ed   :  { %4557 = vrot.lane.b32.xlu0 %v9531_v14, %s8708_s5 }
0x26f0   :  { %4014 = vadd.xlane.f32.xlu1 %v4013_v56 }
0x2701   :  { %4023 = vrot.lane.b32.xlu1 %v9531_v14, %s8703_s25 }
0x2705   :  { %4277 = vrot.lane.b32.xlu1 %v9531_v14, %s8706_s30 }
0x2709   :  { %4275 = vrot.lane.b32.xlu1 %v9529_v6, %s8704_s0 }
0x270d   :  { %4561 = vrot.lane.b32.xlu1 %v9531_v14, %s8709_s23 }
0x2711   :  { %4559 = vrot.lane.b32.xlu1 %v9529_v6, %s8708_s5 }
0x2742   :  { %v3816_v57 = vpop.xlane.xlu0 %3815 }
0x2743   :  { %8104 = vrcp.f32 %v3816_v57 }
0x2744   :  { %v3813_v58 = vpop.xlane.xlu1 %3812 }
0x2745   :  { %8106 = vrcp.f32 %v3813_v58 }
0x2748   :  { %v4026_v3 = vpop.permute.xlu1 %4025 }
0x2750   :  { %v4018_v59 = vpop.xlane.xlu0 %4017  ;;  %v8105_v60 = vpop.eup %8104 }
0x2751   :  { %v3820_v1 = vmul.f32 %v8105_v60, %v8097_v45  ;;  %8108 = vrcp.f32 %v4018_v59 }
0x2752   :  { %v8107_v61 = vpop.eup %8106 }
0x2753   :  { %v3818_v62 = vmul.f32 %v8107_v61, %v8099_v29 }
0x2754   :  { %v3822_v63 = vpop.permute.xlu0 %3821 }
0x2755   :  { %7672 = vmatprep.subr.mxu0 %v3822_v63  ;;  %7674 = vmatprep.mubr.msk.f32.mxu0 %vm3797_vm1, %v3818_v62 }
0x2756   :  { %7673 = vmatpush3.msra.mxu0 %v3822_v63  ;;  %v3706_v63 = vld [vmem:[%s10045_s20 + $0x10] sm:$0xff] }
0x2757   :  { %7675 = vmatmul.mubr.msk.f32.vlgmr.msra.gmra.mxu0 %vm3797_vm1, %v3820_v1  ;;  %7684 = vmatprep.subr.msk.mxu0 %vm3832_vm11, %v4026_v3 }
0x2758   :  { %7685 = vmatpush3.msk.msra.mxu0 %vm3832_vm11, %v4026_v3  ;;  %v4280_v11 = vpop.permute.xlu0 %4279 }
0x275c   :  { %v4274_v38 = vpop.permute.xlu0 %4273 }
0x275e   :  { %v8109_v2 = vpop.eup %8108 }
0x275f   :  { %v4022_v10 = vmul.f32 %v8109_v2, %v8101_v48 }
0x2760   :  { %v4564_v19 = vpop.permute.xlu0 %4563 }
0x2764   :  { %v4558_v23 = vpop.permute.xlu0 %4557 }
0x2779   :  { %v4015_v4 = vpop.xlane.xlu1 %4014 }
0x277a   :  { %8110 = vrcp.f32 %v4015_v4 }
0x277d   :  { %v4024_v5 = vpop.permute.xlu1 %4023 }
0x277e   :  { %7686 = vmatprep.subr.mxu0 %v4024_v5 }
0x277f   :  { %7687 = vmatpush3.msra.mxu0 %v4024_v5 }
0x2780   :  { %7691 = vmatprep.subr.mxu0 %v3705_v44 }
0x2781   :  { %v4278_v17 = vpop.permute.xlu1 %4277 }
0x2785   :  { %v4276_v22 = vpop.permute.xlu1 %4275 }
0x2787   :  { %v8111_v7 = vpop.eup %8110 }
0x2788   :  { %v4020_v9 = vmul.f32 %v8111_v7, %v8103_v55 }
0x2789   :  { %v4562_v24 = vpop.permute.xlu1 %4561 }
0x278a   :  { %7688 = vmatprep.mubr.msk.f32.mxu0 %vm3797_vm1, %v4020_v9 }
0x278b   :  { %7689 = vmatmul.mubr.msk.f32.vlgmr.msra.gmra.mxu0 %vm3797_vm1, %v4022_v10 }
0x278c   :  { %7692 = vmatpush3.msra.mxu0 %v3705_v44 }
0x278d   :  { %7701 = vmatprep.subr.msk.mxu0 %vm610_vm4, %v4280_v11  ;;  %v4560_v8 = vpop.permute.xlu1 %4559 }
0x2817   :  { %v7676_v15 = vpop.f32.mrf.mxu0 }
0x2819   :  { %v3901_v16 = vpop.f32.mrf.mxu0 }
0x281a   :  { %7698 = vmatprep.mubr.msk.f32.mxu1 %vm610_vm4, %v3901_v16 }
0x281b   :  { %7699 = vmatmul.mubr.msk.f32.vlgmr.msra.gmra.mxu1 %vm610_vm4, %v7676_v15 }
0x284b   :  { %v7690_v13 = vpop.f32.mrf.mxu0 }
0x284d   :  { %v4102_v18 = vpop.f32.mrf.mxu0 }
0x284e   :  { %7693 = vmatprep.mubr.msk.f32.mxu0 %vm610_vm4, %v4102_v18 }
0x284f   :  { %7694 = vmatmul.mubr.msk.f32.vlgmr.msra.gmra.mxu0 %vm610_vm4, %v7690_v13 }
0x2850   :  { %7702 = vmatpush3.xpose.msk.msra.mxu0 %vm610_vm4, %v4280_v11  ;;  %7705 = vmatprep.mubr.msk.f32.mxu0 %vm610_vm4, %v4274_v38 }
0x2851   :  { %7703 = vmatprep.subr.msk.mxu0 %vm610_vm4, %v4278_v17 }
0x2854   :  { %7704 = vmatpush3.xpose.msk.msra.mxu0 %vm610_vm4, %v4278_v17 }
0x2855   :  { %7720 = vmatprep.subr.msk.mxu0 %vm610_vm4, %v4564_v19 }
0x2857   :  { %7706 = vmatmul.mubr.msk.f32.vlgmr.msra.gmra.mxu0 %vm610_vm4, %v4276_v22  ;;  %v3707_v22 = vld [vmem:[%s10045_s20 + $0x18] sm:$0xff] }
0x2858   :  { %7721 = vmatpush3.xpose.msk.msra.mxu0 %vm610_vm4, %v4564_v19  ;;  %7724 = vmatprep.mubr.msk.f32.mxu0 %vm610_vm4, %v4558_v23 }
0x2859   :  { %7722 = vmatprep.subr.msk.mxu0 %vm610_vm4, %v4562_v24 }
0x285c   :  { %7723 = vmatpush3.xpose.msk.msra.mxu0 %vm610_vm4, %v4562_v24 }
0x285f   :  { %7725 = vmatmul.mubr.msk.f32.vlgmr.msra.gmra.mxu0 %vm610_vm4, %v4560_v8 }
0x28db   :  { %v7700_v49 = vpop.f32.mrf.mxu1 }
0x28dd   :  { %v4264_v12 = vpop.f32.mrf.mxu1 }
0x290f   :  { %v7695_v25 = vpop.f32.mrf.mxu0 }
0x2910   :  { %v9633_v26 = vadd.f32 %v7700_v49, %v7695_v25 }
0x2911   :  { %v9635_v27 = vpop.f32.mrf.mxu0 }
0x2912   :  { %v4265_v24 = vadd.f32 %v4264_v12, %v9635_v27  ;;  %v5017_v12 = vld [vmem:[%s10047_s24 + $0x58] sm:$0xff] }
0x2917   :  { %v7707_v28 = vpop.f32.mrf.mxu0 }
0x2918   :  { %v4361_v50 = vadd.f32 %v7707_v28, %v9566_v20 }
0x2919   :  { %v4355_v30 = vpop.f32.mrf.mxu0 }
0x291a   :  { %v4356_v31 = vadd.f32 %v4355_v30, %v9569_v21  ;;  %v4367_v32 = vsel %vm3801_vm0, %v4361_v50, -inf }
0x291b   :  { %4368 = vmax.xlane.f32.xlu1 %v4367_v32  ;;  %v7061_v32 = vld [vmem:[#allocation8] ss:$0 sm:$0xff] }
0x291c   :  { %v4364_v33 = vsel %vm3797_vm1, %v4356_v31, -inf }
0x291d   :  { %4365 = vmax.xlane.f32.xlu0 %v4364_v33 }
0x291f   :  { %v7726_v34 = vpop.f32.mrf.mxu0 }
0x2920   :  { %v4645_v57 = vadd.f32 %v7726_v34, %v9566_v20 }
0x2921   :  { %v4639_v0 = vpop.f32.mrf.mxu0 }
0x2922   :  { %v4640_v37 = vadd.f32 %v4639_v0, %v9569_v21  ;;  %v4651_v59 = vsel %vm3801_vm0, %v4645_v57, -inf }
0x2924   :  { %v4648_v39 = vsel %vm3797_vm1, %v4640_v37, -inf }
0x292c   :  { %4388 = vrot.lane.b32.xlu1 %v9529_v6, %s8707_s8 }
0x2950   :  { %4649 = vmax.xlane.f32.xlu1 %v4648_v39 }
0x29a4   :  { %v4369_v40 = vpop.xlane.xlu1 %4368 }
0x29a5   :  { %v4371_v41 = vsub.f32 %v4361_v50, %v4369_v40 }
0x29a6   :  { %v4366_v51 = vpop.xlane.xlu0 %4365 }
0x29a7   :  { %v4374_v42 = vmul.f32 1.442695, %v4371_v41  ;;  %v4370_v43 = vsub.f32 %v4356_v31, %v4366_v51 }
0x29a8   :  { %v4389_v45 = vpop.permute.xlu1 %4388 }
0x29a9   :  { %8112 = vpow2.f32 %v4374_v42  ;;  %v4372_v46 = vmul.f32 1.442695, %v4370_v43  ;;  %7708 = vmatprep.subr.msk.mxu1 %vm3832_vm11, %v4389_v45 }
0x29aa   :  { %7709 = vmatpush3.msk.msra.mxu1 %vm3832_vm11, %v4389_v45 }
0x29ab   :  { %8114 = vpow2.f32 %v4372_v46 }
0x29b6   :  { %v8113_v29 = vpop.eup %8112 }
0x29b7   :  { %v4379_v47 = vsel %vm3801_vm0, %v8113_v29, 0.0 }
0x29b8   :  { %v8115_v48 = vpop.eup %8114  ;;  %4380 = vadd.xlane.f32.xlu0 %v4379_v47 }
0x29b9   :  { %v4376_v52 = vsel %vm3797_vm1, %v8115_v48, 0.0 }
0x29bc   :  { %4377 = vadd.xlane.f32.xlu0 %v4376_v52  ;;  %v4898_v52 = vld [vmem:[%s10046_s11 + $0x10] sm:$0xff] }
0x29d2   :  { %4386 = vrot.lane.b32.xlu0 %v9531_v14, %s8707_s8 }
0x29d9   :  { %v4650_v53 = vpop.xlane.xlu1 %4649 }
0x29da   :  { %v4654_v54 = vsub.f32 %v4640_v37, %v4650_v53  ;;  %v4897_v53 = vld [vmem:[%s10046_s11 + $0x8] sm:$0xff] }
0x29dc   :  { %v4656_v55 = vmul.f32 1.442695, %v4654_v54  ;;  %v4896_v54 = vld [vmem:[%s10046_s11] sm:$0xff] }
0x29de   :  { %8116 = vpow2.f32 %v4656_v55 }
0x29eb   :  { %v8117_v56 = vpop.eup %8116 }
0x29ec   :  { %v4660_v58 = vsel %vm3797_vm1, %v8117_v56, 0.0 }
0x29ed   :  { %4661 = vadd.xlane.f32.xlu1 %v4660_v58 }
0x29f1   :  { %4652 = vmax.xlane.f32.xlu0 %v4651_v59 }
0x29fe   :  { %4672 = vrot.lane.b32.xlu1 %v9529_v6, %s8710_s4 }
0x2a41   :  { %v4381_v60 = vpop.xlane.xlu0 %4380 }
0x2a42   :  { %8118 = vrcp.f32 %v4381_v60 }
0x2a45   :  { %v4378_v61 = vpop.xlane.xlu0 %4377 }
0x2a46   :  { %8120 = vrcp.f32 %v4378_v61 }
0x2a49   :  { %v4387_v62 = vpop.permute.xlu0 %4386 }
0x2a4a   :  { %7710 = vmatprep.subr.mxu1 %v4387_v62 }
0x2a4b   :  { %7711 = vmatpush3.msra.mxu1 %v4387_v62  ;;  %v7062_v62 = vld [vmem:[#allocation10] ss:$0 sm:$0xff] }
0x2a4c   :  { %7715 = vmatprep.subr.mxu1 %v3706_v63 }
0x2a4f   :  { %v8119_v1 = vpop.eup %8118 }
0x2a50   :  { %v4385_v5 = vmul.f32 %v8119_v1, %v8113_v29 }
0x2a53   :  { %v8121_v3 = vpop.eup %8120 }
0x2a54   :  { %v4383_v4 = vmul.f32 %v8121_v3, %v8115_v48  ;;  %v4899_v48 = vld [vmem:[%s10046_s11 + $0x18] sm:$0xff] }
0x2a55   :  { %7739 = vmatprep.subr.mxu0 %v4899_v48 }
0x2a56   :  { %7712 = vmatprep.mubr.msk.f32.mxu1 %vm3797_vm1, %v4383_v4  ;;  %7740 = vmatpush3.msra.mxu0 %v4899_v48 }
0x2a57   :  { %7713 = vmatmul.mubr.msk.f32.vlgmr.msra.gmra.mxu1 %vm3797_vm1, %v4385_v5  ;;  %7741 = vmatprep.subr.mxu0 %v4898_v52  ;;  %v7063_v5 = vld [vmem:[#allocation11] ss:$0 sm:$0xff] }
0x2a58   :  { %7716 = vmatpush3.msra.mxu1 %v3706_v63  ;;  %7742 = vmatpush3.msra.mxu0 %v4898_v52 }
0x2a59   :  { %7743 = vmatprep.subr.mxu0 %v4897_v53 }
0x2a5a   :  { %7744 = vmatpush3.msra.mxu0 %v4897_v53 }
0x2a5b   :  { %7745 = vmatprep.subr.mxu0 %v4896_v54 }
0x2a5c   :  { %7746 = vmatpush3.msra.mxu0 %v4896_v54 }
0x2a76   :  { %v4662_v44 = vpop.xlane.xlu1 %4661 }
0x2a7a   :  { %v4673_v6 = vpop.permute.xlu1 %4672  ;;  %v4653_v2 = vpop.xlane.xlu0 %4652 }
0x2a7b   :  { %v4655_v7 = vsub.f32 %v4645_v57, %v4653_v2  ;;  %7727 = vmatprep.subr.msk.mxu1 %vm3832_vm11, %v4673_v6 }
0x2a7d   :  { %v4658_v9 = vmul.f32 1.442695, %v4655_v7  ;;  %v5021_v7 = vld [vmem:[%s10047_s24 + $0x78] sm:$0xff] }
0x2a7f   :  { %8122 = vpow2.f32 %v4658_v9  ;;  %v5020_v9 = vld [vmem:[%s10047_s24 + $0x70] sm:$0xff] }
0x2a80   :  { %8124 = vrcp.f32 %v4662_v44 }
0x2a8c   :  { %v8123_v10 = vpop.eup %8122 }
0x2a8d   :  { %v4663_v11 = vsel %vm3801_vm0, %v8123_v10, 0.0  ;;  %v8125_v15 = vpop.eup %8124 }
0x2a8e   :  { %4664 = vadd.xlane.f32.xlu0 %v4663_v11  ;;  %v4667_v17 = vmul.f32 %v8125_v15, %v8117_v56  ;;  %v5018_v11 = vld [vmem:[%s10047_s24 + $0x60] sm:$0xff]  ;;  %v5016_v15 = vld [vmem:[%s10047_s24 + $0x50] sm:$0xff] }
0x2aa4   :  { %4670 = vrot.lane.b32.xlu0 %v9531_v14, %s8710_s4 }
0x2b17   :  { %v7714_v16 = vpop.f32.mrf.mxu1  ;;  %v4665_v38 = vpop.xlane.xlu0 %4664 }
0x2b18   :  { %8126 = vrcp.f32 %v4665_v38  ;;  %v5014_v38 = vld [vmem:[%s10047_s24 + $0x40] sm:$0xff] }
0x2b19   :  { %v4465_v13 = vpop.f32.mrf.mxu1 }
0x2b1a   :  { %7717 = vmatprep.mubr.msk.f32.mxu1 %vm610_vm4, %v4465_v13  ;;  %v5013_v13 = vld [vmem:[%s10047_s24 + $0x38] sm:$0xff] }
0x2b1b   :  { %7718 = vmatmul.mubr.msk.f32.vlgmr.msra.gmra.mxu1 %vm610_vm4, %v7714_v16  ;;  %v4671_v18 = vpop.permute.xlu0 %4670  ;;  %v5015_v16 = vld [vmem:[%s10047_s24 + $0x48] sm:$0xff] }
0x2b1c   :  { %7728 = vmatpush3.msk.msra.mxu1 %vm3832_vm11, %v4673_v6  ;;  %7731 = vmatprep.mubr.msk.f32.mxu1 %vm3797_vm1, %v4667_v17  ;;  %v5012_v17 = vld [vmem:[%s10047_s24 + $0x30] sm:$0xff] }
0x2b1d   :  { %7729 = vmatprep.subr.mxu1 %v4671_v18 }
0x2b1e   :  { %7730 = vmatpush3.msra.mxu1 %v4671_v18  ;;  %v5011_v18 = vld [vmem:[%s10047_s24 + $0x28] sm:$0xff] }
0x2b1f   :  { %7734 = vmatprep.subr.mxu1 %v3707_v22 }
0x2b25   :  { %v8127_v14 = vpop.eup %8126 }
0x2b26   :  { %v4669_v19 = vmul.f32 %v8127_v14, %v8123_v10  ;;  %v5019_v10 = vld [vmem:[%s10047_s24 + $0x68] sm:$0xff]  ;;  %v5010_v14 = vld [vmem:[%s10047_s24 + $0x20] sm:$0xff] }
0x2b28   :  { %7732 = vmatmul.mubr.msk.f32.vlgmr.msra.gmra.mxu1 %vm3797_vm1, %v4669_v19  ;;  %v5009_v19 = vld [vmem:[%s10047_s24 + $0x18] sm:$0xff] }
0x2b29   :  { %7735 = vmatpush3.msra.mxu1 %v3707_v22  ;;  %v5008_v22 = vld [vmem:[%s10047_s24 + $0x10] sm:$0xff] }
0x2b2a   :  { %7750 = vmatprep.subr.mxu1 %v5021_v7 }
0x2bdb   :  { %v7719_v23 = vpop.f32.mrf.mxu1 }
0x2bdc   :  { %v4556_v8 = vadd.f32 %v7719_v23, %v9633_v26  ;;  %v5007_v23 = vld [vmem:[%s10047_s24 + $0x8] sm:$0xff] }
0x2bdd   :  { %v4546_v49 = vpop.f32.mrf.mxu1 }
0x2bde   :  { %v4555_v25 = vadd.f32 %v4546_v49, %v4265_v24  ;;  %v5006_v24 = vld [vmem:[%s10047_s24] sm:$0xff] }
0x2be8   :  { %v7733_v28 = vpop.f32.mrf.mxu1 }
0x2bea   :  { %v4749_v50 = vpop.f32.mrf.mxu1 }
0x2beb   :  { %7736 = vmatprep.mubr.msk.f32.mxu1 %vm610_vm4, %v4749_v50 }
0x2bec   :  { %7737 = vmatmul.mubr.msk.f32.vlgmr.msra.gmra.mxu1 %vm610_vm4, %v7733_v28 }
0x2bed   :  { %7751 = vmatpush3.msra.mxu1 %v5021_v7 }
0x2bee   :  { %7752 = vmatprep.subr.mxu1 %v5020_v9 }
0x2bef   :  { %7753 = vmatpush3.msra.mxu1 %v5020_v9 }
0x2bf0   :  { %7754 = vmatprep.subr.mxu1 %v5019_v10 }
0x2bf1   :  { %7755 = vmatpush3.msra.mxu1 %v5019_v10 }
0x2bf2   :  { %7756 = vmatprep.subr.mxu1 %v5018_v11 }
0x2bf3   :  { %7757 = vmatpush3.msra.mxu1 %v5018_v11 }
0x2bf4   :  { %7758 = vmatprep.subr.mxu1 %v5017_v12 }
0x2bf5   :  { %7759 = vmatpush3.msra.mxu1 %v5017_v12 }
0x2bf6   :  { %7760 = vmatprep.subr.mxu1 %v5016_v15 }
0x2bf7   :  { %7761 = vmatpush3.msra.mxu1 %v5016_v15 }
0x2bf8   :  { %7762 = vmatprep.subr.mxu1 %v5015_v16 }
0x2bf9   :  { %7763 = vmatpush3.msra.mxu1 %v5015_v16 }
0x2bfa   :  { %7764 = vmatprep.subr.mxu1 %v5014_v38 }
0x2bfb   :  { %7765 = vmatpush3.msra.mxu1 %v5014_v38  ;;  %v7068_v38 = vld [vmem:[#allocation16] ss:$0 sm:$0xff] }
0x2bfc   :  { %7766 = vmatprep.subr.mxu1 %v5013_v13 }
0x2bfd   :  { %7767 = vmatpush3.msra.mxu1 %v5013_v13 }
0x2bfe   :  { %7768 = vmatprep.subr.mxu1 %v5012_v17 }
0x2bff   :  { %7769 = vmatpush3.msra.mxu1 %v5012_v17 }
0x2c00   :  { %7770 = vmatprep.subr.mxu1 %v5011_v18 }
0x2c01   :  { %7771 = vmatpush3.msra.mxu1 %v5011_v18 }
0x2c02   :  { %7772 = vmatprep.subr.mxu1 %v5010_v14 }
0x2c03   :  { %7773 = vmatpush3.msra.mxu1 %v5010_v14 }
0x2c04   :  { %7774 = vmatprep.subr.mxu1 %v5009_v19 }
0x2c05   :  { %7775 = vmatpush3.msra.mxu1 %v5009_v19  ;;  %v7069_v19 = vld [vmem:[#allocation17] ss:$0 sm:$0xff] }
0x2c06   :  { %7776 = vmatprep.subr.mxu1 %v5008_v22 }
0x2c07   :  { %7777 = vmatpush3.msra.mxu1 %v5008_v22 }
0x2c08   :  { %7778 = vmatprep.subr.mxu1 %v5007_v23 }
0x2c09   :  { %7779 = vmatpush3.msra.mxu1 %v5007_v23 }
0x2c0a   :  { %7780 = vmatprep.subr.mxu1 %v5006_v24 }
0x2c0b   :  { %7781 = vmatpush3.msra.mxu1 %v5006_v24 }
0x2cac   :  { %v7738_v30 = vpop.f32.mrf.mxu1 }
0x2cad   :  { %v4840_v31 = vadd.f32 %v7738_v30, %v4556_v8  ;;  %v7064_v8 = vld [vmem:[#allocation13] ss:$0 sm:$0xff] }
0x2cae   :  { %v4830_v33 = vpop.f32.mrf.mxu1 }
0x2caf   :  { %v4842_v34 = vadd.f32 %v4840_v31, %v9511_v35  ;;  %v4839_v0 = vadd.f32 %v4830_v33, %v4555_v25 }
0x2cb1   :  { %v9674_v37 = vadd.f32 %v7061_v32, %v4842_v34  ;;  %v4841_v27 = vadd.f32 %v4839_v0, %v9513_v36 }
0x2cb3   :  { %v9677_v26 = vadd.f32 %v7061_v32, %v4841_v27  ;;  %v4857_v39 = vsel %vm3572_vm5, %v9674_v37, 0.0 }
0x2cb4   :  { %4858 = vadd.xlane.f32.xlu0 %v4857_v39 }
0x2cb5   :  { %v4854_v40 = vsel %vm744_vm6, %v9677_v26, 0.0 }
0x2cb6   :  { %4855 = vadd.xlane.f32.xlu1 %v4854_v40 }
0x2d3d   :  { %v4859_v41 = vpop.xlane.xlu0 %4858 }
0x2d3e   :  { %v4861_v35 = vmul.f32 0.03125, %v4859_v41 }
0x2d3f   :  { %v4856_v51 = vpop.xlane.xlu1 %4855 }
0x2d40   :  { %v4863_v42 = vsub.f32 %v9674_v37, %v4861_v35  ;;  %v4860_v36 = vmul.f32 0.03125, %v4856_v51 }
0x2d42   :  { %v4862_v43 = vsub.f32 %v9677_v26, %v4860_v36  ;;  %v4865_v45 = vmul.f32 %v4863_v42, %v4863_v42 }
0x2d44   :  { %v4869_v46 = vsel %vm3572_vm5, %v4865_v45, 0.0  ;;  %v4864_v29 = vmul.f32 %v4862_v43, %v4862_v43 }
0x2d45   :  { %4870 = vadd.xlane.f32.xlu0 %v4869_v46 }
0x2d46   :  { %v4866_v47 = vsel %vm744_vm6, %v4864_v29, 0.0 }
0x2d47   :  { %4867 = vadd.xlane.f32.xlu1 %v4866_v47  ;;  %v7067_v47 = vld [vmem:[#allocation14] ss:$0 sm:$0xff] }
0x2dce   :  { %v4871_v55 = vpop.xlane.xlu0 %4870 }
0x2dcf   :  { %v4873_v56 = vmul.f32 0.03125, %v4871_v55 }
0x2dd0   :  { %v4868_v57 = vpop.xlane.xlu1 %4867 }
0x2dd1   :  { %v4875_v58 = vadd.f32 1e-05, %v4873_v56  ;;  %v4872_v59 = vmul.f32 0.03125, %v4868_v57 }
0x2dd3   :  { %8128 = vrsqrt.f32 %v4875_v58  ;;  %v4874_v60 = vadd.f32 1e-05, %v4872_v59 }
0x2dd5   :  { %8130 = vrsqrt.f32 %v4874_v60 }
0x2de0   :  { %v8129_v61 = vpop.eup %8128 }
0x2de1   :  { %v4879_v63 = vmul.f32 %v8129_v61, %v4863_v42 }
0x2de2   :  { %v8131_v1 = vpop.eup %8130 }
0x2de3   :  { %v4878_v3 = vmul.f32 %v8131_v1, %v4862_v43  ;;  %v4887_v4 = vmul.f32 %v7062_v62, %v4879_v63 }
0x2de5   :  { %v4886_v44 = vmul.f32 %v7062_v62, %v4878_v3  ;;  %v4895_v2 = vadd.f32 %v7063_v5, %v4887_v4 }
0x2de7   :  { %v4894_v6 = vadd.f32 %v7063_v5, %v4886_v44  ;;  %v5153_v5 = vld [vmem:[%s10048_s15 + $0x18] sm:$0xff]  ;;  %v5152_v44 = vld [vmem:[%s10048_s15 + $0x10] sm:$0xff] }
0x2de8   :  { %7785 = vmatprep.subr.mxu0 %v5153_v5 }
0x2de9   :  { %7747 = vmatprep.mubr.msk.f32.mxu0 %vm744_vm6, %v4894_v6  ;;  %v5151_v6 = vld [vmem:[%s10048_s15 + $0x8] sm:$0xff] }
0x2dea   :  { %7748 = vmatmul.mubr.msk.f32.vlgmr.msra.gmra.mxu0 %vm744_vm6, %v4895_v2  ;;  %v5150_v2 = vld [vmem:[%s10048_s15] sm:$0xff] }
0x2deb   :  { %7786 = vmatpush3.msra.mxu0 %v5153_v5 }
0x2dec   :  { %7787 = vmatprep.subr.mxu0 %v5152_v44 }
0x2ded   :  { %7788 = vmatpush3.msra.mxu0 %v5152_v44 }
0x2dee   :  { %7789 = vmatprep.subr.mxu0 %v5151_v6 }
0x2def   :  { %7790 = vmatpush3.msra.mxu0 %v5151_v6 }
0x2df0   :  { %7791 = vmatprep.subr.mxu0 %v5150_v2 }
0x2df1   :  { %7792 = vmatpush3.msra.mxu0 %v5150_v2 }
0x2eaa   :  { %v7749_v49 = vpop.f32.mrf.mxu0 }
0x2eab   :  { %v4985_v25 = vadd.f32 %v7749_v49, %v7064_v8 }
0x2eac   :  { %v4979_v28 = vpop.f32.mrf.mxu0 }
0x2ead   :  { %v4991_v50 = vmul.f32 0.044715, %v4985_v25  ;;  %v4980_v30 = vadd.f32 %v7064_v8, %v4979_v28  ;;  %v4989_v45 = vmul.f32 0.5, %v4985_v25  ;;  %v7070_v8 = vld [vmem:[#allocation19] ss:$0 sm:$0xff] }
0x2eaf   :  { %v4993_v31 = vmul.f32 %v4991_v50, %v4985_v25  ;;  %v4990_v32 = vmul.f32 0.044715, %v4980_v30  ;;  %v4988_v36 = vmul.f32 0.5, %v4980_v30 }
0x2eb1   :  { %v4995_v33 = vmul.f32 %v4993_v31, %v4985_v25  ;;  %v4992_v34 = vmul.f32 %v4990_v32, %v4980_v30 }
0x2eb3   :  { %v4997_v0 = vadd.f32 %v4995_v33, %v4985_v25  ;;  %v4994_v27 = vmul.f32 %v4992_v34, %v4980_v30 }
0x2eb5   :  { %v4996_v39 = vadd.f32 %v4994_v27, %v4980_v30  ;;  %v4999_v40 = vmul.f32 0.7978846, %v4997_v0 }
0x2eb7   :  { %v4998_v41 = vmul.f32 0.7978846, %v4996_v39  ;;  %8132 = vtanh.f32 %v4999_v40 }
0x2eb9   :  { %8134 = vtanh.f32 %v4998_v41 }
0x2ec4   :  { %v8133_v35 = vpop.eup %8132 }
0x2ec5   :  { %v5003_v42 = vadd.f32 1.0, %v8133_v35 }
0x2ec6   :  { %v8135_v51 = vpop.eup %8134 }
0x2ec7   :  { %v5002_v43 = vadd.f32 1.0, %v8135_v51  ;;  %v5005_v29 = vmul.f32 %v5003_v42, %v4989_v45 }
0x2ec9   :  { %v5004_v46 = vmul.f32 %v5002_v43, %v4988_v36 }
0x2ecb   :  { %7782 = vmatprep.mubr.f32.mxu1 %v5004_v46 }
0x2ecc   :  { %7783 = vmatmul.mubr.f32.vlgmr.msra.gmra.mxu1 %v5005_v29 }
0x2f8c   :  { %v7784_v48 = vpop.f32.mrf.mxu1 }
0x2f8d   :  { %v5101_v52 = vadd.f32 %v7784_v48, %v7067_v47 }
0x2f8e   :  { %v5095_v53 = vpop.f32.mrf.mxu1 }
0x2f8f   :  { %v9710_v54 = vadd.f32 %v5101_v52, %v9674_v37  ;;  %v5096_v55 = vadd.f32 %v7067_v47, %v5095_v53 }
0x2f91   :  { %v9713_v56 = vadd.f32 %v5096_v55, %v9677_v26  ;;  %v5111_v57 = vsel %vm3572_vm5, %v9710_v54, 0.0 }
0x2f92   :  { %5112 = vadd.xlane.f32.xlu0 %v5111_v57 }
0x2f93   :  { %v5108_v58 = vsel %vm744_vm6, %v9713_v56, 0.0 }
0x2f94   :  { %5109 = vadd.xlane.f32.xlu1 %v5108_v58 }
0x301b   :  { %v5113_v59 = vpop.xlane.xlu0 %5112 }
0x301c   :  { %v5115_v60 = vmul.f32 0.03125, %v5113_v59 }
0x301d   :  { %v5110_v61 = vpop.xlane.xlu1 %5109 }
0x301e   :  { %v5117_v37 = vsub.f32 %v9710_v54, %v5115_v60  ;;  %v5114_v62 = vmul.f32 0.03125, %v5110_v61 }
0x3020   :  { %v5116_v26 = vsub.f32 %v9713_v56, %v5114_v62  ;;  %v5119_v63 = vmul.f32 %v5117_v37, %v5117_v37 }
0x3022   :  { %v5123_v1 = vsel %vm3572_vm5, %v5119_v63, 0.0  ;;  %v5118_v3 = vmul.f32 %v5116_v26, %v5116_v26 }
0x3023   :  { %5124 = vadd.xlane.f32.xlu0 %v5123_v1 }
0x3024   :  { %v5120_v4 = vsel %vm744_vm6, %v5118_v3, 0.0 }
0x3025   :  { %5121 = vadd.xlane.f32.xlu1 %v5120_v4 }
0x30ac   :  { %v5125_v7 = vpop.xlane.xlu0 %5124 }
0x30ad   :  { %v5127_v9 = vmul.f32 0.03125, %v5125_v7 }
0x30ae   :  { %v5122_v10 = vpop.xlane.xlu1 %5121 }
0x30af   :  { %v5129_v11 = vadd.f32 1e-05, %v5127_v9  ;;  %v5126_v12 = vmul.f32 0.03125, %v5122_v10 }
0x30b1   :  { %8136 = vrsqrt.f32 %v5129_v11  ;;  %v5128_v15 = vadd.f32 1e-05, %v5126_v12 }
0x30b3   :  { %8138 = vrsqrt.f32 %v5128_v15 }
0x30be   :  { %v8137_v16 = vpop.eup %8136 }
0x30bf   :  { %v5133_v13 = vmul.f32 %v8137_v16, %v5117_v37 }
0x30c0   :  { %v8139_v17 = vpop.eup %8138 }
0x30c1   :  { %v5132_v18 = vmul.f32 %v8139_v17, %v5116_v26  ;;  %v5141_v14 = vmul.f32 %v7068_v38, %v5133_v13 }
0x30c3   :  { %v5140_v22 = vmul.f32 %v7068_v38, %v5132_v18  ;;  %v5149_v24 = vadd.f32 %v7069_v19, %v5141_v14 }
0x30c5   :  { %v5148_v23 = vadd.f32 %v7069_v19, %v5140_v22 }
0x30c7   :  { %7793 = vmatprep.mubr.msk.f32.mxu0 %vm744_vm6, %v5148_v23 }
0x30c8   :  { %7794 = vmatmul.mubr.msk.f32.vlgmr.msra.gmra.mxu0 %vm744_vm6, %v5149_v24 }
0x3188   :  { %v7795_v49 = vpop.f32.mrf.mxu0 }
0x3189   :  { %v9729_v25 = vadd.f32 %v7795_v49, %v7070_v8 }
0x318a   :  { %v5233_v28 = vpop.f32.mrf.mxu0 }
0x318b   :  { %v9731_v50 = vadd.f32 %v7070_v8, %v5233_v28  ;;  %5250 = vrot.lane.b32.xlu1 %v9729_v25, %s8700_s6 }
0x318d   :  { %5248 = vrot.lane.b32.xlu0 %v9731_v50, %s8700_s6  ;;  %7800 = vmatprep.mubr.msk.f32.mxu0 %vm610_vm4, %v9731_v50  ;;  %s10050_s6 = sld [smem:[#allocation89_spill]] }
0x31fd   :  { %v5251_v30 = vpop.permute.xlu1 %5250 }
0x31fe   :  { %7796 = vmatprep.subr.msk.mxu0 %vm610_vm4, %v5251_v30 }
0x31ff   :  { %7797 = vmatpush3.xpose.msk.msra.mxu0 %vm610_vm4, %v5251_v30  ;;  %v5249_v31 = vpop.permute.xlu0 %5248 }
0x3200   :  { %7798 = vmatprep.subr.msk.mxu0 %vm610_vm4, %v5249_v31 }
0x3203   :  { %7799 = vmatpush3.xpose.msk.msra.mxu0 %vm610_vm4, %v5249_v31 }
0x3206   :  { %7801 = vmatmul.mubr.msk.f32.vlgmr.msra.gmra.mxu0 %vm610_vm4, %v9729_v25 }
0x32c6   :  { %v7802_v32 = vpop.f32.mrf.mxu0 }
0x32c7   :  { %v5332_v33 = vadd.f32 %v7802_v32, %v9566_v20 }
0x32c8   :  { %v5326_v34 = vpop.f32.mrf.mxu0 }
0x32c9   :  { %v5327_v0 = vadd.f32 %v5326_v34, %v9569_v21  ;;  %v5338_v27 = vsel %vm3801_vm0, %v5332_v33, -inf }
0x32ca   :  { %5339 = vmax.xlane.f32.xlu0 %v5338_v27 }
0x32cb   :  { %v5335_v39 = vsel %vm3797_vm1, %v5327_v0, -inf }
0x32cc   :  { %5336 = vmax.xlane.f32.xlu1 %v5335_v39 }
0x32dd   :  { %5359 = vrot.lane.b32.xlu1 %v9729_v25, %s8705_s18 }
0x32e1   :  { %5451 = vrot.lane.b32.xlu1 %v9729_v25, %s8699_s29 }
0x32e5   :  { %5449 = vrot.lane.b32.xlu1 %v9731_v50, %s8699_s29  ;;  %s10049_s29 = sld [smem:[#allocation87_spill]] }
0x32eb   :  { %v5243_v2 = vld [vmem:[%s10049_s29 + $0x8] sm:$0xff]  ;;  %v5242_v24 = vld [vmem:[%s10049_s29] sm:$0xff] }
0x3353   :  { %v5340_v40 = vpop.xlane.xlu0 %5339 }
0x3354   :  { %v5342_v41 = vsub.f32 %v5332_v33, %v5340_v40 }
0x3355   :  { %v5337_v35 = vpop.xlane.xlu1 %5336 }
0x3356   :  { %v5345_v51 = vmul.f32 1.442695, %v5342_v41  ;;  %v5341_v42 = vsub.f32 %v5327_v0, %v5337_v35 }
0x3358   :  { %8140 = vpow2.f32 %v5345_v51  ;;  %v5343_v36 = vmul.f32 1.442695, %v5341_v42 }
0x3359   :  { %v5360_v43 = vpop.permute.xlu1 %5359 }
0x335a   :  { %8142 = vpow2.f32 %v5343_v36  ;;  %7803 = vmatprep.subr.msk.mxu0 %vm3832_vm11, %v5360_v43 }
0x335b   :  { %7804 = vmatpush3.msk.msra.mxu0 %vm3832_vm11, %v5360_v43 }
0x335d   :  { %v5452_v48 = vpop.permute.xlu1 %5451 }
0x3361   :  { %v5450_v52 = vpop.permute.xlu1 %5449 }
0x3365   :  { %v8141_v45 = vpop.eup %8140 }
0x3366   :  { %v5350_v46 = vsel %vm3801_vm0, %v8141_v45, 0.0 }
0x3367   :  { %v8143_v29 = vpop.eup %8142  ;;  %5351 = vadd.xlane.f32.xlu0 %v5350_v46 }
0x3368   :  { %v5347_v47 = vsel %vm3797_vm1, %v8143_v29, 0.0 }
0x3369   :  { %5348 = vadd.xlane.f32.xlu1 %v5347_v47 }
0x337a   :  { %5447 = vrot.lane.b32.xlu1 %v9729_v25, %s8701_s16 }
0x337d   :  { %5357 = vrot.lane.b32.xlu0 %v9731_v50, %s8705_s18  ;;  %s8711_s18 = smov [#allocation32]  }
0x3381   :  { %5445 = vrot.lane.b32.xlu0 %v9731_v50, %s8701_s16  ;;  %s10051_s16 = sld [smem:[#allocation91_spill]] }
0x33f0   :  { %v5352_v53 = vpop.xlane.xlu0 %5351 }
0x33f1   :  { %8144 = vrcp.f32 %v5352_v53 }
0x33f2   :  { %v5349_v55 = vpop.xlane.xlu1 %5348 }
0x33f3   :  { %8146 = vrcp.f32 %v5349_v55 }
0x33f4   :  { %v5358_v57 = vpop.permute.xlu0 %5357 }
0x33f5   :  { %7805 = vmatprep.subr.mxu0 %v5358_v57 }
0x33f6   :  { %7806 = vmatpush3.msra.mxu0 %v5358_v57  ;;  %v5448_v62 = vpop.permute.xlu1 %5447 }
0x33f7   :  { %7810 = vmatprep.subr.msk.mxu0 %vm610_vm4, %v5452_v48 }
0x33f8   :  { %v5446_v37 = vpop.permute.xlu0 %5445 }
0x33fe   :  { %v8145_v58 = vpop.eup %8144 }
0x33ff   :  { %v5356_v61 = vmul.f32 %v8145_v58, %v8141_v45 }
0x3400   :  { %v8147_v59 = vpop.eup %8146 }
0x3401   :  { %v5354_v60 = vmul.f32 %v8147_v59, %v8143_v29 }
0x3403   :  { %7807 = vmatprep.mubr.msk.f32.mxu0 %vm3797_vm1, %v5354_v60 }
0x3404   :  { %7808 = vmatmul.mubr.msk.f32.vlgmr.msra.gmra.mxu0 %vm3797_vm1, %v5356_v61 }
0x3405   :  { %7811 = vmatpush3.xpose.msk.msra.mxu0 %vm610_vm4, %v5452_v48  ;;  %7814 = vmatprep.mubr.msk.f32.mxu0 %vm610_vm4, %v5446_v37 }
0x3406   :  { %7812 = vmatprep.subr.msk.mxu0 %vm610_vm4, %v5450_v52 }
0x3409   :  { %7813 = vmatpush3.xpose.msk.msra.mxu0 %vm610_vm4, %v5450_v52 }
0x340a   :  { %7824 = vmatprep.subr.mxu0 %v5243_v2 }
0x340c   :  { %7815 = vmatmul.mubr.msk.f32.vlgmr.msra.gmra.mxu0 %vm610_vm4, %v5448_v62 }
0x340d   :  { %7825 = vmatpush3.msra.mxu0 %v5243_v2 }
0x34c4   :  { %v7809_v26 = vpop.f32.mrf.mxu0 }
0x34c6   :  { %v5436_v63 = vpop.f32.mrf.mxu0 }
0x34cc   :  { %v7816_v1 = vpop.f32.mrf.mxu0 }
0x34cd   :  { %v5533_v3 = vadd.f32 %v7816_v1, %v9566_v20 }
0x34ce   :  { %v5527_v4 = vpop.f32.mrf.mxu0 }
0x34cf   :  { %v5528_v5 = vadd.f32 %v5527_v4, %v9569_v21  ;;  %v5539_v44 = vsel %vm3801_vm0, %v5533_v3, -inf }
0x34d0   :  { %5540 = vmax.xlane.f32.xlu1 %v5539_v44 }
0x34d1   :  { %v5536_v6 = vsel %vm3797_vm1, %v5528_v5, -inf }
0x34d2   :  { %5537 = vmax.xlane.f32.xlu0 %v5536_v6 }
0x34e1   :  { %5560 = vrot.lane.b32.xlu1 %v9729_v25, %s8703_s25 }
0x34e5   :  { %5814 = vrot.lane.b32.xlu1 %v9729_v25, %s8706_s30 }
0x34e9   :  { %5812 = vrot.lane.b32.xlu1 %v9731_v50, %s8706_s30  ;;  %s6859_s30 = sshll.u32 %s8711_s18, 4  ;;  %s6860_s30 = int_to_ptr.vmem [resolvable:$true] %s6859_s30 }
0x34ea   :  { %p8571_p12 = scmp.lt.s32.totalorder %s6860_s30, %s6860_s30 }
0x34ed   :  { %5810 = vrot.lane.b32.xlu1 %v9729_v25, %s8704_s0 }
0x34f1   :  { %6096 = vrot.lane.b32.xlu1 %v9731_v50, %s8709_s23 }
0x34f5   :  { %6094 = vrot.lane.b32.xlu1 %v9729_v25, %s8708_s5 }
0x3559   :  { %v5541_v7 = vpop.xlane.xlu1 %5540 }
0x355a   :  { %v5543_v9 = vsub.f32 %v5533_v3, %v5541_v7 }
0x355b   :  { %v5538_v10 = vpop.xlane.xlu0 %5537 }
0x355c   :  { %v5546_v11 = vmul.f32 1.442695, %v5543_v9  ;;  %v5542_v12 = vsub.f32 %v5528_v5, %v5538_v10 }
0x355d   :  { %v5561_v15 = vpop.permute.xlu1 %5560 }
0x355e   :  { %8148 = vpow2.f32 %v5546_v11  ;;  %v5544_v16 = vmul.f32 1.442695, %v5542_v12  ;;  %7817 = vmatprep.subr.msk.mxu1 %vm3832_vm11, %v5561_v15  ;;  %v5244_v11 = vld [vmem:[%s10049_s29 + $0x10] sm:$0xff] }
0x355f   :  { %7818 = vmatpush3.msk.msra.mxu1 %vm3832_vm11, %v5561_v15 }
0x3560   :  { %8150 = vpow2.f32 %v5544_v16 }
0x3561   :  { %v5815_v38 = vpop.permute.xlu1 %5814 }
0x3562   :  { %7834 = vmatprep.subr.msk.mxu0 %vm610_vm4, %v5815_v38 }
0x3565   :  { %v5813_v33 = vpop.permute.xlu1 %5812 }
0x3569   :  { %v5811_v27 = vpop.permute.xlu1 %5810 }
0x356b   :  { %v8149_v13 = vpop.eup %8148 }
0x356c   :  { %v5551_v17 = vsel %vm3801_vm0, %v8149_v13, 0.0 }
0x356d   :  { %v8151_v18 = vpop.eup %8150  ;;  %5552 = vadd.xlane.f32.xlu0 %v5551_v17  ;;  %v6097_v40 = vpop.permute.xlu1 %6096 }
0x356e   :  { %v5548_v14 = vsel %vm3797_vm1, %v8151_v18, 0.0 }
0x3571   :  { %5549 = vadd.xlane.f32.xlu0 %v5548_v14  ;;  %v6095_v41 = vpop.permute.xlu1 %6094 }
0x3587   :  { %5558 = vrot.lane.b32.xlu0 %v9731_v50, %s8703_s25  ;;  %s10052_s25 = sld [smem:[#allocation93_spill]] }
0x358b   :  { %5808 = vrot.lane.b32.xlu0 %v9731_v50, %s8704_s0  ;;  %s10053_s0 = sld [smem:[#allocation95_spill]] }
0x358f   :  { %6098 = vrot.lane.b32.xlu0 %v9729_v25, %s8709_s23 }
0x3593   :  { %6092 = vrot.lane.b32.xlu0 %v9731_v50, %s8708_s5  ;;  %s8570_s5 = scalar_lea.vmem %s6860_s30, 32 }
0x35f6   :  { %v5553_v19 = vpop.xlane.xlu0 %5552 }
0x35f7   :  { %8152 = vrcp.f32 %v5553_v19 }
0x35fa   :  { %v5550_v22 = vpop.xlane.xlu0 %5549 }
0x35fb   :  { %8154 = vrcp.f32 %v5550_v22 }
0x35fe   :  { %v5559_v23 = vpop.permute.xlu0 %5558 }
0x35ff   :  { %7819 = vmatprep.subr.mxu1 %v5559_v23 }
0x3600   :  { %7820 = vmatpush3.msra.mxu1 %v5559_v23 }
0x3601   :  { %7829 = vmatprep.subr.mxu1 %v5242_v24 }
0x3602   :  { %v5809_v31 = vpop.permute.xlu0 %5808 }
0x3604   :  { %v8153_v8 = vpop.eup %8152 }
0x3605   :  { %v5557_v30 = vmul.f32 %v8153_v8, %v8149_v13 }
0x3606   :  { %v6099_v0 = vpop.permute.xlu0 %6098 }
0x3608   :  { %v8155_v49 = vpop.eup %8154 }
0x3609   :  { %v5555_v28 = vmul.f32 %v8155_v49, %v8151_v18 }
0x360a   :  { %v6093_v39 = vpop.permute.xlu0 %6092 }
0x360b   :  { %7821 = vmatprep.mubr.msk.f32.mxu1 %vm3797_vm1, %v5555_v28 }
0x360c   :  { %7822 = vmatmul.mubr.msk.f32.vlgmr.msra.gmra.mxu1 %vm3797_vm1, %v5557_v30 }
0x360d   :  { %7831 = vmatprep.mubr.msk.f32.mxu1 %vm610_vm4, %v5436_v63  ;;  %7830 = vmatpush3.msra.mxu1 %v5242_v24 }
0x3610   :  { %7832 = vmatmul.mubr.msk.f32.vlgmr.msra.gmra.mxu1 %vm610_vm4, %v7809_v26 }
0x36cc   :  { %v7823_v32 = vpop.f32.mrf.mxu1 }
0x36ce   :  { %v5637_v34 = vpop.f32.mrf.mxu1 }
0x36cf   :  { %7826 = vmatprep.mubr.msk.f32.mxu0 %vm610_vm4, %v5637_v34 }
0x36d0   :  { %7827 = vmatmul.mubr.msk.f32.vlgmr.msra.gmra.mxu0 %vm610_vm4, %v7823_v32  ;;  %v7833_v22 = vpop.f32.mrf.mxu1 }
0x36d1   :  { %7835 = vmatpush3.xpose.msk.msra.mxu0 %vm610_vm4, %v5815_v38  ;;  %7838 = vmatprep.mubr.msk.f32.mxu0 %vm610_vm4, %v5809_v31 }
0x36d2   :  { %7836 = vmatprep.subr.msk.mxu0 %vm610_vm4, %v5813_v33  ;;  %v5799_v23 = vpop.f32.mrf.mxu1 }
0x36d5   :  { %7837 = vmatpush3.xpose.msk.msra.mxu0 %vm610_vm4, %v5813_v33  ;;  %v5245_v33 = vld [vmem:[%s10049_s29 + $0x18] sm:$0xff] }
0x36d6   :  { %7853 = vmatprep.subr.msk.mxu0 %vm610_vm4, %v6099_v0 }
0x36d8   :  { %7839 = vmatmul.mubr.msk.f32.vlgmr.msra.gmra.mxu0 %vm610_vm4, %v5811_v27 }
0x36d9   :  { %7854 = vmatpush3.xpose.msk.msra.mxu0 %vm610_vm4, %v6099_v0  ;;  %7857 = vmatprep.mubr.msk.f32.mxu0 %vm610_vm4, %v6093_v39 }
0x36da   :  { %7855 = vmatprep.subr.msk.mxu0 %vm610_vm4, %v6097_v40 }
0x36dd   :  { %7856 = vmatpush3.xpose.msk.msra.mxu0 %vm610_vm4, %v6097_v40 }
0x36e0   :  { %7858 = vmatmul.mubr.msk.f32.vlgmr.msra.gmra.mxu0 %vm610_vm4, %v6095_v41 }
0x3790   :  { %v9821_v35 = vpop.f32.mrf.mxu0 }
0x3791   :  { %v5805_v34 = vadd.f32 %v7833_v22, %v9821_v35  ;;  %v6552_v22 = vld [vmem:[%s10051_s16 + $0x58] sm:$0xff] }
0x3792   :  { %v9823_v51 = vpop.f32.mrf.mxu0 }
0x3793   :  { %v5800_v27 = vadd.f32 %v5799_v23, %v9823_v51  ;;  %v6551_v23 = vld [vmem:[%s10051_s16 + $0x50] sm:$0xff] }
0x3798   :  { %v7840_v42 = vpop.f32.mrf.mxu0 }
0x3799   :  { %v5896_v36 = vadd.f32 %v7840_v42, %v9566_v20 }
0x379a   :  { %v5890_v43 = vpop.f32.mrf.mxu0 }
0x379b   :  { %v5891_v45 = vadd.f32 %v5890_v43, %v9569_v21  ;;  %v5902_v46 = vsel %vm3801_vm0, %v5896_v36, -inf }
0x379c   :  { %5903 = vmax.xlane.f32.xlu1 %v5902_v46  ;;  %v7109_v46 = vld [vmem:[#allocation20] ss:$0 sm:$0xff] }
0x379d   :  { %v5899_v29 = vsel %vm3797_vm1, %v5891_v45, -inf }
0x379e   :  { %5900 = vmax.xlane.f32.xlu0 %v5899_v29 }
0x37a0   :  { %v7859_v47 = vpop.f32.mrf.mxu0 }
0x37a1   :  { %v6180_v44 = vadd.f32 %v7859_v47, %v9566_v20 }
0x37a2   :  { %v6174_v48 = vpop.f32.mrf.mxu0 }
0x37a3   :  { %v6175_v52 = vadd.f32 %v6174_v48, %v9569_v21  ;;  %v6186_v2 = vsel %vm3801_vm0, %v6180_v44, -inf }
0x37a5   :  { %v6183_v53 = vsel %vm3797_vm1, %v6175_v52, -inf }
0x37ad   :  { %5923 = vrot.lane.b32.xlu1 %v9729_v25, %s8707_s8 }
0x37d1   :  { %6184 = vmax.xlane.f32.xlu1 %v6183_v53 }
0x3825   :  { %v5904_v55 = vpop.xlane.xlu1 %5903 }
0x3826   :  { %v5906_v57 = vsub.f32 %v5896_v36, %v5904_v55 }
0x3827   :  { %v5901_v58 = vpop.xlane.xlu0 %5900 }
0x3828   :  { %v5909_v59 = vmul.f32 1.442695, %v5906_v57  ;;  %v5905_v60 = vsub.f32 %v5891_v45, %v5901_v58 }
0x3829   :  { %v5924_v61 = vpop.permute.xlu1 %5923 }
0x382a   :  { %8156 = vpow2.f32 %v5909_v59  ;;  %v5907_v37 = vmul.f32 1.442695, %v5905_v60  ;;  %7841 = vmatprep.subr.msk.mxu1 %vm3832_vm11, %v5924_v61 }
0x382b   :  { %7842 = vmatpush3.msk.msra.mxu1 %vm3832_vm11, %v5924_v61 }
0x382c   :  { %8158 = vpow2.f32 %v5907_v37 }
0x3837   :  { %v8157_v62 = vpop.eup %8156 }
0x3838   :  { %v5914_v26 = vsel %vm3801_vm0, %v8157_v62, 0.0 }
0x3839   :  { %v8159_v21 = vpop.eup %8158  ;;  %5915 = vadd.xlane.f32.xlu0 %v5914_v26 }
0x383a   :  { %v5911_v63 = vsel %vm3797_vm1, %v8159_v21, 0.0 }
0x383d   :  { %5912 = vadd.xlane.f32.xlu0 %v5911_v63  ;;  %v6433_v63 = vld [vmem:[%s10050_s6 + $0x10] sm:$0xff] }
0x3853   :  { %5921 = vrot.lane.b32.xlu0 %v9731_v50, %s8707_s8  ;;  %s8566_s8 = scalar_lea.vmem %s6860_s30, 16 }
0x3854   :  { %p8567_p11 = scmp.ne.s32.totalorder %s6860_s30, %s8566_s8  ;;  %p8572_p13 = scmp.lt.s32.totalorder %s8570_s5, %s8566_s8 }
0x3856   :  { %p8573_p0 = por %p8572_p13, %p8571_p12 }
0x3858   :  { %p8574_p1 = pnand %p8573_p0, %p8567_p11 }
0x385a   :  { %v6185_v1 = vpop.xlane.xlu1 %6184 }
0x385b   :  { %v6189_v3 = vsub.f32 %v6175_v52, %v6185_v1  ;;  %v6432_v1 = vld [vmem:[%s10050_s6 + $0x8] sm:$0xff] }
0x385d   :  { %v6191_v4 = vmul.f32 1.442695, %v6189_v3  ;;  %v6431_v3 = vld [vmem:[%s10050_s6] sm:$0xff] }
0x385f   :  { %8160 = vpow2.f32 %v6191_v4 }
0x386c   :  { %v8161_v5 = vpop.eup %8160 }
0x386d   :  { %v6195_v6 = vsel %vm3797_vm1, %v8161_v5, 0.0 }
0x386e   :  { %6196 = vadd.xlane.f32.xlu1 %v6195_v6 }
0x3872   :  { %6187 = vmax.xlane.f32.xlu0 %v6186_v2 }
0x387f   :  { %6207 = vrot.lane.b32.xlu1 %v9729_v25, %s8710_s4 }
0x38c2   :  { %v5916_v7 = vpop.xlane.xlu0 %5915 }
0x38c3   :  { %8162 = vrcp.f32 %v5916_v7 }
0x38c6   :  { %v5913_v9 = vpop.xlane.xlu0 %5912 }
0x38c7   :  { %8164 = vrcp.f32 %v5913_v9 }
0x38ca   :  { %v5922_v10 = vpop.permute.xlu0 %5921 }
0x38cb   :  { %7843 = vmatprep.subr.mxu1 %v5922_v10 }
0x38cc   :  { %7844 = vmatpush3.msra.mxu1 %v5922_v10  ;;  %v7110_v10 = vld [vmem:[#allocation22] ss:$0 sm:$0xff] }
0x38cd   :  { %7848 = vmatprep.subr.mxu1 %v5244_v11 }
0x38d0   :  { %v8163_v12 = vpop.eup %8162 }
0x38d1   :  { %v5920_v16 = vmul.f32 %v8163_v12, %v8157_v62 }
0x38d4   :  { %v8165_v20 = vpop.eup %8164 }
0x38d5   :  { %v5918_v15 = vmul.f32 %v8165_v20, %v8159_v21  ;;  %v6434_v21 = vld [vmem:[%s10050_s6 + $0x18] sm:$0xff] }
0x38d6   :  { %7872 = vmatprep.subr.mxu0 %v6434_v21 }
0x38d7   :  { %7845 = vmatprep.mubr.msk.f32.mxu1 %vm3797_vm1, %v5918_v15  ;;  %7873 = vmatpush3.msra.mxu0 %v6434_v21 }
0x38d8   :  { %7846 = vmatmul.mubr.msk.f32.vlgmr.msra.gmra.mxu1 %vm3797_vm1, %v5920_v16  ;;  %7874 = vmatprep.subr.mxu0 %v6433_v63  ;;  %v7111_v16 = vld [vmem:[#allocation23] ss:$0 sm:$0xff] }
0x38d9   :  { %7849 = vmatpush3.msra.mxu1 %v5244_v11  ;;  %7875 = vmatpush3.msra.mxu0 %v6433_v63 }
0x38da   :  { %7876 = vmatprep.subr.mxu0 %v6432_v1 }
0x38db   :  { %7877 = vmatpush3.msra.mxu0 %v6432_v1 }
0x38dc   :  { %7878 = vmatprep.subr.mxu0 %v6431_v3 }
0x38dd   :  { %7879 = vmatpush3.msra.mxu0 %v6431_v3 }
0x38f7   :  { %v6197_v38 = vpop.xlane.xlu1 %6196 }
0x38fb   :  { %v6208_v25 = vpop.permute.xlu1 %6207  ;;  %v6188_v13 = vpop.xlane.xlu0 %6187 }
0x38fc   :  { %v6190_v17 = vsub.f32 %v6180_v44, %v6188_v13  ;;  %7860 = vmatprep.subr.msk.mxu1 %vm3832_vm11, %v6208_v25 }
0x38fe   :  { %v6193_v18 = vmul.f32 1.442695, %v6190_v17  ;;  %v6556_v17 = vld [vmem:[%s10051_s16 + $0x78] sm:$0xff] }
0x3900   :  { %8166 = vpow2.f32 %v6193_v18  ;;  %v6555_v18 = vld [vmem:[%s10051_s16 + $0x70] sm:$0xff] }
0x3901   :  { %8168 = vrcp.f32 %v6197_v38 }
0x390d   :  { %v8167_v14 = vpop.eup %8166 }
0x390e   :  { %v6198_v19 = vsel %vm3801_vm0, %v8167_v14, 0.0  ;;  %v8169_v24 = vpop.eup %8168 }
0x390f   :  { %6199 = vadd.xlane.f32.xlu0 %v6198_v19  ;;  %v6202_v30 = vmul.f32 %v8169_v24, %v8161_v5  ;;  %v6553_v19 = vld [vmem:[%s10051_s16 + $0x60] sm:$0xff]  ;;  %v6550_v24 = vld [vmem:[%s10051_s16 + $0x48] sm:$0xff] }
0x3925   :  { %6205 = vrot.lane.b32.xlu0 %v9731_v50, %s8710_s4 }
0x3998   :  { %v7847_v8 = vpop.f32.mrf.mxu1  ;;  %v6200_v49 = vpop.xlane.xlu0 %6199 }
0x3999   :  { %8170 = vrcp.f32 %v6200_v49  ;;  %v6548_v49 = vld [vmem:[%s10051_s16 + $0x38] sm:$0xff] }
0x399a   :  { %v6000_v28 = vpop.f32.mrf.mxu1 }
0x399b   :  { %7850 = vmatprep.mubr.msk.f32.mxu1 %vm610_vm4, %v6000_v28  ;;  %v6547_v28 = vld [vmem:[%s10051_s16 + $0x30] sm:$0xff] }
0x399c   :  { %7851 = vmatmul.mubr.msk.f32.vlgmr.msra.gmra.mxu1 %vm610_vm4, %v7847_v8  ;;  %v6206_v31 = vpop.permute.xlu0 %6205  ;;  %v6549_v8 = vld [vmem:[%s10051_s16 + $0x40] sm:$0xff] }
0x399d   :  { %7861 = vmatpush3.msk.msra.mxu1 %vm3832_vm11, %v6208_v25  ;;  %7864 = vmatprep.mubr.msk.f32.mxu1 %vm3797_vm1, %v6202_v30  ;;  %v6546_v30 = vld [vmem:[%s10051_s16 + $0x28] sm:$0xff] }
0x399e   :  { %7862 = vmatprep.subr.mxu1 %v6206_v31 }
0x399f   :  { %7863 = vmatpush3.msra.mxu1 %v6206_v31  ;;  %v6545_v31 = vld [vmem:[%s10051_s16 + $0x20] sm:$0xff] }
0x39a0   :  { %7867 = vmatprep.subr.mxu1 %v5245_v33 }
0x39a6   :  { %v8171_v50 = vpop.eup %8170 }
0x39a7   :  { %v6204_v32 = vmul.f32 %v8171_v50, %v8167_v14  ;;  %v6554_v14 = vld [vmem:[%s10051_s16 + $0x68] sm:$0xff]  ;;  %v6544_v50 = vld [vmem:[%s10051_s16 + $0x18] sm:$0xff] }
0x39a9   :  { %7865 = vmatmul.mubr.msk.f32.vlgmr.msra.gmra.mxu1 %vm3797_vm1, %v6204_v32  ;;  %v6543_v32 = vld [vmem:[%s10051_s16 + $0x10] sm:$0xff] }
0x39aa   :  { %7868 = vmatpush3.msra.mxu1 %v5245_v33  ;;  %v6542_v33 = vld [vmem:[%s10051_s16 + $0x8] sm:$0xff] }
0x39ab   :  { %7883 = vmatprep.subr.mxu1 %v6556_v17 }
0x3a5c   :  { %v7852_v0 = vpop.f32.mrf.mxu1 }
0x3a5d   :  { %v6091_v39 = vadd.f32 %v7852_v0, %v5805_v34  ;;  %v6541_v34 = vld [vmem:[%s10051_s16] sm:$0xff]  ;;  %v7112_v0 = vld [vmem:[#allocation25] ss:$0 sm:$0xff] }
0x3a5e   :  { %v6081_v40 = vpop.f32.mrf.mxu1 }
0x3a5f   :  { %v6090_v41 = vadd.f32 %v6081_v40, %v5800_v27 }
0x3a69   :  { %v7866_v42 = vpop.f32.mrf.mxu1 }
0x3a6b   :  { %v6284_v36 = vpop.f32.mrf.mxu1 }
0x3a6c   :  { %7869 = vmatprep.mubr.msk.f32.mxu1 %vm610_vm4, %v6284_v36 }
0x3a6d   :  { %7870 = vmatmul.mubr.msk.f32.vlgmr.msra.gmra.mxu1 %vm610_vm4, %v7866_v42  ;;  %vm6778_vm4 = vcmask 123904  }
0x3a6e   :  { %7884 = vmatpush3.msra.mxu1 %v6556_v17 }
0x3a6f   :  { %7885 = vmatprep.subr.mxu1 %v6555_v18 }
0x3a70   :  { %7886 = vmatpush3.msra.mxu1 %v6555_v18 }
0x3a71   :  { %7887 = vmatprep.subr.mxu1 %v6554_v14 }
0x3a72   :  { %7888 = vmatpush3.msra.mxu1 %v6554_v14 }
0x3a73   :  { %7889 = vmatprep.subr.mxu1 %v6553_v19 }
0x3a74   :  { %7890 = vmatpush3.msra.mxu1 %v6553_v19 }
0x3a75   :  { %7891 = vmatprep.subr.mxu1 %v6552_v22 }
0x3a76   :  { %7892 = vmatpush3.msra.mxu1 %v6552_v22 }
0x3a77   :  { %7893 = vmatprep.subr.mxu1 %v6551_v23 }
0x3a78   :  { %7894 = vmatpush3.msra.mxu1 %v6551_v23  ;;  %v7116_v23 = vld [vmem:[#allocation28] ss:$0 sm:$0xff] }
0x3a79   :  { %7895 = vmatprep.subr.mxu1 %v6550_v24 }
0x3a7a   :  { %7896 = vmatpush3.msra.mxu1 %v6550_v24 }
0x3a7b   :  { %7897 = vmatprep.subr.mxu1 %v6549_v8 }
0x3a7c   :  { %7898 = vmatpush3.msra.mxu1 %v6549_v8 }
0x3a7d   :  { %7899 = vmatprep.subr.mxu1 %v6548_v49 }
0x3a7e   :  { %7900 = vmatpush3.msra.mxu1 %v6548_v49 }
0x3a7f   :  { %7901 = vmatprep.subr.mxu1 %v6547_v28 }
0x3a80   :  { %7902 = vmatpush3.msra.mxu1 %v6547_v28 }
0x3a81   :  { %7903 = vmatprep.subr.mxu1 %v6546_v30 }
0x3a82   :  { %7904 = vmatpush3.msra.mxu1 %v6546_v30  ;;  %v7117_v30 = vld [vmem:[#allocation29] ss:$0 sm:$0xff] }
0x3a83   :  { %7905 = vmatprep.subr.mxu1 %v6545_v31 }
0x3a84   :  { %7906 = vmatpush3.msra.mxu1 %v6545_v31 }
0x3a85   :  { %7907 = vmatprep.subr.mxu1 %v6544_v50 }
0x3a86   :  { %7908 = vmatpush3.msra.mxu1 %v6544_v50 }
0x3a87   :  { %7909 = vmatprep.subr.mxu1 %v6543_v32 }
0x3a88   :  { %7910 = vmatpush3.msra.mxu1 %v6543_v32 }
0x3a89   :  { %7911 = vmatprep.subr.mxu1 %v6542_v33 }
0x3a8a   :  { %7912 = vmatpush3.msra.mxu1 %v6542_v33  ;;  %v7118_v33 = vld [vmem:[#allocation31] ss:$0 sm:$0xff] }
0x3a8b   :  { %7913 = vmatprep.subr.mxu1 %v6541_v34 }
0x3a8c   :  { %7914 = vmatpush3.msra.mxu1 %v6541_v34 }
0x3b2d   :  { %v7871_v43 = vpop.f32.mrf.mxu1 }
0x3b2e   :  { %v6375_v45 = vadd.f32 %v7871_v43, %v6091_v39 }
0x3b2f   :  { %v6365_v29 = vpop.f32.mrf.mxu1 }
0x3b30   :  { %v6377_v47 = vadd.f32 %v6375_v45, %v9710_v54  ;;  %v6374_v48 = vadd.f32 %v6365_v29, %v6090_v41 }
0x3b32   :  { %v9862_v35 = vadd.f32 %v7109_v46, %v6377_v47  ;;  %v6376_v51 = vadd.f32 %v6374_v48, %v9713_v56 }
0x3b34   :  { %v9865_v52 = vadd.f32 %v7109_v46, %v6376_v51  ;;  %v6392_v53 = vsel %vm3572_vm5, %v9862_v35, 0.0 }
0x3b35   :  { %6393 = vadd.xlane.f32.xlu0 %v6392_v53 }
0x3b36   :  { %v6389_v55 = vsel %vm744_vm6, %v9865_v52, 0.0 }
0x3b37   :  { %6390 = vadd.xlane.f32.xlu1 %v6389_v55 }
0x3bbe   :  { %v6394_v57 = vpop.xlane.xlu0 %6393 }
0x3bbf   :  { %v6396_v54 = vmul.f32 0.03125, %v6394_v57 }
0x3bc0   :  { %v6391_v58 = vpop.xlane.xlu1 %6390 }
0x3bc1   :  { %v6398_v59 = vsub.f32 %v9862_v35, %v6396_v54  ;;  %v6395_v56 = vmul.f32 0.03125, %v6391_v58 }
0x3bc3   :  { %v6397_v60 = vsub.f32 %v9865_v52, %v6395_v56  ;;  %v6400_v61 = vmul.f32 %v6398_v59, %v6398_v59 }
0x3bc5   :  { %v6404_v37 = vsel %vm3572_vm5, %v6400_v61, 0.0  ;;  %v6399_v62 = vmul.f32 %v6397_v60, %v6397_v60 }
0x3bc6   :  { %6405 = vadd.xlane.f32.xlu0 %v6404_v37  ;;  %v7115_v37 = vld [vmem:[#allocation26] ss:$0 sm:$0xff] }
0x3bc7   :  { %v6401_v26 = vsel %vm744_vm6, %v6399_v62, 0.0 }
0x3bc8   :  { %6402 = vadd.xlane.f32.xlu1 %v6401_v26 }
0x3c4f   :  { %v6406_v4 = vpop.xlane.xlu0 %6405 }
0x3c50   :  { %v6408_v5 = vmul.f32 0.03125, %v6406_v4 }
0x3c51   :  { %v6403_v44 = vpop.xlane.xlu1 %6402 }
0x3c52   :  { %v6410_v6 = vadd.f32 1e-05, %v6408_v5  ;;  %v6407_v2 = vmul.f32 0.03125, %v6403_v44 }
0x3c54   :  { %8172 = vrsqrt.f32 %v6410_v6  ;;  %v6409_v7 = vadd.f32 1e-05, %v6407_v2 }
0x3c56   :  { %8174 = vrsqrt.f32 %v6409_v7 }
0x3c61   :  { %v8173_v9 = vpop.eup %8172 }
0x3c62   :  { %v6414_v11 = vmul.f32 %v8173_v9, %v6398_v59 }
0x3c63   :  { %v8175_v12 = vpop.eup %8174 }
0x3c64   :  { %v6413_v20 = vmul.f32 %v8175_v12, %v6397_v60  ;;  %v6422_v15 = vmul.f32 %v7110_v10, %v6414_v11 }
0x3c66   :  { %v6421_v38 = vmul.f32 %v7110_v10, %v6413_v20  ;;  %v6430_v13 = vadd.f32 %v7111_v16, %v6422_v15  ;;  %v6688_v20 = vld [vmem:[%s10052_s25 + $0x18] sm:$0xff]  ;;  %v6687_v15 = vld [vmem:[%s10052_s25 + $0x10] sm:$0xff] }
0x3c67   :  { %7918 = vmatprep.subr.mxu0 %v6688_v20 }
0x3c68   :  { %v6429_v25 = vadd.f32 %v7111_v16, %v6421_v38  ;;  %v6686_v16 = vld [vmem:[%s10052_s25 + $0x8] sm:$0xff]  ;;  %v6685_v38 = vld [vmem:[%s10052_s25] sm:$0xff] }
0x3c6a   :  { %7880 = vmatprep.mubr.msk.f32.mxu0 %vm744_vm6, %v6429_v25 }
0x3c6b   :  { %7881 = vmatmul.mubr.msk.f32.vlgmr.msra.gmra.mxu0 %vm744_vm6, %v6430_v13 }
0x3c6c   :  { %7919 = vmatpush3.msra.mxu0 %v6688_v20 }
0x3c6d   :  { %7920 = vmatprep.subr.mxu0 %v6687_v15 }
0x3c6e   :  { %7921 = vmatpush3.msra.mxu0 %v6687_v15 }
0x3c6f   :  { %7922 = vmatprep.subr.mxu0 %v6686_v16 }
0x3c70   :  { %7923 = vmatpush3.msra.mxu0 %v6686_v16 }
0x3c71   :  { %7924 = vmatprep.subr.mxu0 %v6685_v38 }
0x3c72   :  { %7925 = vmatpush3.msra.mxu0 %v6685_v38 }
0x3d2b   :  { %v7882_v27 = vpop.f32.mrf.mxu0 }
0x3d2c   :  { %v6520_v39 = vadd.f32 %v7882_v27, %v7112_v0 }
0x3d2d   :  { %v6514_v40 = vpop.f32.mrf.mxu0 }
0x3d2e   :  { %v6526_v41 = vmul.f32 0.044715, %v6520_v39  ;;  %v6515_v42 = vadd.f32 %v7112_v0, %v6514_v40  ;;  %v6524_v56 = vmul.f32 0.5, %v6520_v39  ;;  %v6781_v0 = vld [vmem:[%s10053_s0 + $0x8] sm:$0x3]  ;;  %v6780_v40 = vld [vmem:[%s10053_s0] sm:$0xff] }
0x3d30   :  { %v6528_v36 = vmul.f32 %v6526_v41, %v6520_v39  ;;  %v6525_v43 = vmul.f32 0.044715, %v6515_v42  ;;  %v6523_v58 = vmul.f32 0.5, %v6515_v42 }
0x3d32   :  { %v6530_v45 = vmul.f32 %v6528_v36, %v6520_v39  ;;  %v6527_v46 = vmul.f32 %v6525_v43, %v6515_v42 }
0x3d34   :  { %v6532_v29 = vadd.f32 %v6530_v45, %v6520_v39  ;;  %v6529_v47 = vmul.f32 %v6527_v46, %v6515_v42 }
0x3d36   :  { %v6531_v48 = vadd.f32 %v6529_v47, %v6515_v42  ;;  %v6534_v51 = vmul.f32 0.7978846, %v6532_v29  ;;  %v6796_v47 = vld [vmem:[%s9050_s14 + $0x8] sm:$0x3] }
0x3d38   :  { %v6533_v53 = vmul.f32 0.7978846, %v6531_v48  ;;  %8176 = vtanh.f32 %v6534_v51  ;;  %v6815_v48 = vsel %vm6801_vm12, %v6796_v47, 0.0  ;;  %v6795_v51 = vld [vmem:[%s9050_s14] sm:$0xff] }
0x3d3a   :  { %8178 = vtanh.f32 %v6533_v53  ;;  %v6814_v53 = vsel %vm6799_vm13, %v6795_v51, 0.0 }
0x3d45   :  { %v8177_v55 = vpop.eup %8176 }
0x3d46   :  { %v6538_v54 = vadd.f32 1.0, %v8177_v55  ;;  %v6816_v55 = vadd.f32 %v6815_v48, %v6814_v53 }
0x3d47   :  { %v8179_v57 = vpop.eup %8178 }
0x3d48   :  { %v6537_v59 = vadd.f32 1.0, %v8179_v57  ;;  %v6540_v61 = vmul.f32 %v6538_v54, %v6524_v56 }
0x3d4a   :  { %v6539_v60 = vmul.f32 %v6537_v59, %v6523_v58  ;;  %v6827_v58 = vld [vmem:[%s9055_s13] sm:$0xff] }
0x3d4c   :  { %7915 = vmatprep.mubr.f32.mxu1 %v6539_v60 }
0x3d4d   :  { %7916 = vmatmul.mubr.f32.vlgmr.msra.gmra.mxu1 %v6540_v61  ;;  %v6828_v61 = vld [vmem:[%s9055_s13 + $0x8] sm:$0x3] }
0x3e0d   :  { %v7917_v62 = vpop.f32.mrf.mxu1 }
0x3e0e   :  { %v6636_v26 = vadd.f32 %v7917_v62, %v7115_v37 }
0x3e0f   :  { %v6630_v21 = vpop.f32.mrf.mxu1 }
0x3e10   :  { %v6640_v63 = vadd.f32 %v6636_v26, %v9862_v35  ;;  %v6631_v1 = vadd.f32 %v7115_v37, %v6630_v21 }
0x3e12   :  { %v6639_v3 = vadd.f32 %v6631_v1, %v9865_v52  ;;  %v6646_v4 = vsel %vm3572_vm5, %v6640_v63, 0.0 }
0x3e13   :  { %6647 = vadd.xlane.f32.xlu0 %v6646_v4 }
0x3e14   :  { %v6643_v5 = vsel %vm744_vm6, %v6639_v3, 0.0 }
0x3e15   :  { %6644 = vadd.xlane.f32.xlu1 %v6643_v5 }
0x3e9c   :  { %v6648_v44 = vpop.xlane.xlu0 %6647 }
0x3e9d   :  { %v6650_v6 = vmul.f32 0.03125, %v6648_v44 }
0x3e9e   :  { %v6645_v2 = vpop.xlane.xlu1 %6644 }
0x3e9f   :  { %v6652_v7 = vsub.f32 %v6640_v63, %v6650_v6  ;;  %v6649_v9 = vmul.f32 0.03125, %v6645_v2 }
0x3ea1   :  { %v6651_v10 = vsub.f32 %v6639_v3, %v6649_v9  ;;  %v6654_v35 = vmul.f32 %v6652_v7, %v6652_v7 }
0x3ea3   :  { %v6658_v11 = vsel %vm3572_vm5, %v6654_v35, 0.0  ;;  %v6653_v52 = vmul.f32 %v6651_v10, %v6651_v10  ;;  %vm10054_vm5 = vcmask 130048  }
0x3ea4   :  { %6659 = vadd.xlane.f32.xlu0 %v6658_v11 }
0x3ea5   :  { %v6655_v12 = vsel %vm744_vm6, %v6653_v52, 0.0 }
0x3ea6   :  { %6656 = vadd.xlane.f32.xlu1 %v6655_v12 }
0x3f2d   :  { %v6660_v25 = vpop.xlane.xlu0 %6659 }
0x3f2e   :  { %v6662_v13 = vmul.f32 0.03125, %v6660_v25 }
0x3f2f   :  { %v6657_v17 = vpop.xlane.xlu1 %6656 }
0x3f30   :  { %v6664_v18 = vadd.f32 1e-05, %v6662_v13  ;;  %v6661_v14 = vmul.f32 0.03125, %v6657_v17 }
0x3f32   :  { %8180 = vrsqrt.f32 %v6664_v18  ;;  %v6663_v19 = vadd.f32 1e-05, %v6661_v14 }
0x3f34   :  { %8182 = vrsqrt.f32 %v6663_v19 }
0x3f3f   :  { %v8181_v22 = vpop.eup %8180 }
0x3f40   :  { %v6668_v24 = vmul.f32 %v8181_v22, %v6652_v7 }
0x3f41   :  { %v8183_v8 = vpop.eup %8182 }
0x3f42   :  { %v6667_v49 = vmul.f32 %v8183_v8, %v6651_v10  ;;  %v6676_v28 = vmul.f32 %v7116_v23, %v6668_v24 }
0x3f44   :  { %v6675_v31 = vmul.f32 %v7116_v23, %v6667_v49  ;;  %v6684_v32 = vadd.f32 %v7117_v30, %v6676_v28 }
0x3f46   :  { %v6683_v50 = vadd.f32 %v7117_v30, %v6675_v31 }
0x3f48   :  { %7926 = vmatprep.mubr.msk.f32.mxu0 %vm744_vm6, %v6683_v50 }
0x3f49   :  { %7927 = vmatmul.mubr.msk.f32.vlgmr.msra.gmra.mxu0 %vm744_vm6, %v6684_v32  ;;  %vm10055_vm6 = vmmov %vm10054_vm5 }
0x4009   :  { %v7928_v34 = vpop.f32.mrf.mxu0 }
0x400a   :  { %v6774_v27 = vadd.f32 %v7928_v34, %v7118_v33 }
0x400b   :  { %v6768_v39 = vpop.f32.mrf.mxu0 }
0x400c   :  { %v6783_v41 = vsub.f32 %v6774_v27, %v6781_v0  ;;  %v6769_v42 = vadd.f32 %v7118_v33, %v6768_v39  ;;  %6779 = vst.msk [vmem:[%s9060_s19 + $0x8] sm:$0x3] %vm6778_vm4, %v6774_v27 }
0x400e   :  { %v6785_v36 = vmul.f32 %v6783_v41, %v6783_v41  ;;  %6777 = vst.msk [vmem:[%s9060_s19] sm:$0xff] %vm10054_vm5, %v6769_v42  ;;  %v6782_v43 = vsub.f32 %v6769_v42, %v6780_v40 }
0x4010   :  { %v6784_v45 = vmul.f32 %v6782_v43, %v6782_v43  ;;  %v6789_v46 = vsel %vm6778_vm4, %v6785_v36, 0.0 }
0x4011   :  { %6790 = vadd.xlane.f32.xlu0 %v6789_v46 }
0x4012   :  { %v6786_v29 = vsel %vm10055_vm6, %v6784_v45, 0.0 }
0x4013   :  { %6787 = vadd.xlane.f32.xlu1 %v6786_v29 }
0x4015   :  { %6817 = vadd.xlane.f32.xlu0 %v6816_v55 }
0x409a   :  { %v6791_v57 = vpop.xlane.xlu0 %6790 }
0x409b   :  { %v6794_v54 = vmul.f32 0.0625, %v6791_v57 }
0x409c   :  { %v6788_v59 = vpop.xlane.xlu1 %6787 }
0x409d   :  { %v6798_v56 = vmul.f32 %v6796_v47, %v6794_v54  ;;  %v6793_v60 = vmul.f32 0.0625, %v6788_v59  ;;  %v6830_v21 = vmul.f32 %v6828_v61, %v6794_v54 }
0x409e   :  { %v6818_v44 = vpop.xlane.xlu0 %6817 }
0x409f   :  { %v6797_v37 = vmul.f32 %v6795_v51, %v6793_v60  ;;  %v6829_v62 = vmul.f32 %v6827_v58, %v6793_v60  ;;  %v6802_v26 = vsel %vm6801_vm12, %v6798_v56, 0.0  ;;  %v6832_v4 = vsel %vm6801_vm12, %v6830_v21, 0.0 }
0x40a0   :  { %v6819_v6 = vrot.slane %v6818_v44, 4 }
0x40a1   :  { %v6800_v63 = vsel %vm6799_vm13, %v6797_v37, 0.0  ;;  %v6831_v3 = vsel %vm6799_vm13, %v6829_v62, 0.0 }
0x40a2   :  { %v6803_v1 = vadd.f32 %v6802_v26, %v6800_v63  ;;  %v6833_v5 = vadd.f32 %v6832_v4, %v6831_v3  ;;  %v6820_v2 = vadd.f32 %v6819_v6, %v6818_v44 }
0x40a4   :  { %6804 = vadd.xlane.f32.xlu1 %v6803_v1  ;;  %v6821_v7 = vrot.slane %v6820_v2, 2 }
0x40a6   :  { %v6822_v11 = vadd.f32 %v6821_v7, %v6820_v2 }
0x40a8   :  { %6834 = vadd.xlane.f32.xlu1 %v6833_v5  ;;  %v6823_v38 = vrot.slane %v6822_v11, 1 }
0x40aa   :  { %v6824_v14 = vadd.f32 %v6823_v38, %v6822_v11 }
0x412d   :  { %v6805_v9 = vpop.xlane.xlu1 %6804 }
0x412e   :  { %v6806_v10 = vrot.slane %v6805_v9, 4 }
0x4130   :  { %v6807_v35 = vadd.f32 %v6806_v10, %v6805_v9 }
0x4131   :  { %v6835_v52 = vpop.xlane.xlu1 %6834 }
0x4132   :  { %v6808_v12 = vrot.slane %v6807_v35, 2  ;;  %v6836_v20 = vrot.slane %v6835_v52, 4 }
0x4134   :  { %v6837_v15 = vadd.f32 %v6836_v20, %v6835_v52  ;;  %v6809_v16 = vadd.f32 %v6808_v12, %v6807_v35 }
0x4136   :  { %v6838_v25 = vrot.slane %v6837_v15, 2  ;;  %v6810_v13 = vrot.slane %v6809_v16, 1 }
0x4138   :  { %v6839_v17 = vadd.f32 %v6838_v25, %v6837_v15  ;;  %v6811_v18 = vadd.f32 %v6810_v13, %v6809_v16 }
0x413a   :  { %7929 = vpush %v6811_v18  ;;  %v6840_v19 = vrot.slane %v6839_v17, 1 }
0x413b   :  { %7931 = vpush %v6824_v14 }
0x413c   :  { %v6841_v22 = vadd.f32 %v6840_v19, %v6839_v17 }
0x413e   :  { %7933 = vpush %v6841_v22 }
0x416b   :  { %s7930_s13 = spop %7929 }
0x416c   :  { %s7932_s14 = spop %7931  ;;  %v6813_v49 = vstv %s7930_s13 }
0x416d   :  { %v6826_v23 = vstv %s7932_s14 }
0x416e   :  { %vm6844_vm14 = vcmp.eq.f32.partialorder %v6826_v23, 0.0 }
0x416f   :  { %v6845_v24 = vsel %vm6844_vm14, 1.0, %v6826_v23  ;;  %s7934_s19 = spop %7933 }
0x4170   :  { %8184 = vrcp.f32 %v6845_v24  ;;  %v6843_v30 = vstv %s7934_s19 }
0x417d   :  { %v8185_v8 = vpop.eup %8184 }
0x417e   :  { %v6847_v28 = vmul.f32 %v8185_v8, %v6813_v49 }
0x4180   :  { %v6848_v31 = vsel %vm6844_vm14, %v6843_v30, %v6847_v28 }
0x4181   :  { %6850 = vst.msk [vmem:[#allocation32] sm:$0x1] %vm6849_vm15, %v6848_v31 }
0x4182   :  { %8577 = shalt.err (!%p8574_p1)
}
0x4183   :  { %6862 = dma.vmem_to_hbm [thread:$0]  %s6860_s30, 16, %s9065_s21, [#allocation4]  }
0x4184   :  { %8606 = dma.done.wait [#allocation4], 16  }
0x4185   :  { %8607 = vsyncadd [#allocation4], 4294967280 }
0x4186   :  { %6868 = vsyncpa [#allocation3], 1 }
0x4187   :  { %6869 = vsyncpa [#allocation6], 1 }
0x4188   :  { %6870 = vsyncpa [#allocation9], 1 }
0x4189   :  { %6871 = vsyncpa [#allocation12], 1 }
0x418a   :  { %6872 = vsyncpa [#allocation15], 1 }
0x418b   :  { %6873 = vsyncpa [#allocation18], 1 }
0x418c   :  { %6874 = vsyncpa [#allocation21], 1 }
0x418d   :  { %6875 = vsyncpa [#allocation24], 1 }
0x418e   :  { %6876 = vsyncpa [#allocation27], 1 }
0x418f   :  { %6877 = vsyncpa [#allocation30], 1 }
0x4190   :  { %6878 = vsyncpa [#allocation4], 1 }

</bundles_post_ra>
